<compile_context>
chip_gen: v7x
topology: tpu7x:2x2x1
jax: 0.10.0
libtpu: 0.0.40
codegen_flags: <defaults>
</compile_context>

<pallas_src>
import jax
import jax.numpy as jnp
from jax import lax
from jax.experimental import pallas as pl
from jax.experimental.pallas import tpu as pltpu

H = W = 28
KH = KW = 3
INV_SQRT2 = 0.7071067811865476

# staging-plane geometry: data lives at rows [R0, R0+H), cols [C0, C0+W)
PR, PC = 48, 384        # staging plane extent (sublane, lane)
R0, C0 = 8, 128         # data origin (sublane-group / lane-tile aligned)
TR, TC = 32, 128        # working tile handed to the VPU (exactly 4 vregs)

# flat parameter-table offsets (single SMEM operand)
W1_OFF = 0              # 2 * 9  conv1 weights, [c, kh, kw] row-major
B1_OFF = 18             # 2      conv1 bias
W2_OFF = 20             # 4 * 9  conv2 weights, [co, kh, kw] (1 in-ch / group)
B2_OFF = 56             # 4      conv2 bias


def _shifted_planes(scr, p):
    """9 (TR, TC) tiles; tile[di][dj][i, j] == zero-padded(plane p)[i+di, j+dj]
    on the valid (H, W) window.  The staging buffer is zero outside the data
    region, so every tap load already carries the correct zero border."""
    return [[scr[p, R0 - 1 + di:R0 - 1 + di + TR, C0 - 1 + dj:C0 - 1 + dj + TC]
             for dj in range(KW)] for di in range(KH)]


def _conv3x3(taps, p_ref, w_off, b_off):
    """Weighted 9-tap sum (pairwise tree) + bias, on (TR, TC) tiles."""
    prods = [p_ref[w_off + di * KW + dj] * taps[di][dj]
             for di in range(KH) for dj in range(KW)]
    while len(prods) > 1:
        nxt = [prods[i] + prods[i + 1] for i in range(0, len(prods) - 1, 2)]
        if len(prods) % 2:
            nxt.append(prods[-1])
        prods = nxt
    return prods[0] + p_ref[b_off]


def model_kernel(x_ref, p_ref, out_ref, scr):
    # x_ref  : (28, 28)       input image                               (VMEM)
    # p_ref  : (60,)          packed [w1 | b1 | w2 | b2] scalar table   (SMEM)
    # out_ref: (4, 32, 128)   conv2 output, lane-dense channel planes   (VMEM)
    # scr    : (3, 48, 384)   zero-bordered staging planes: x, v6[0], v6[1]
    scr[...] = jnp.zeros_like(scr)
    scr[0, R0:R0 + H, C0:C0 + W] = x_ref[...]   # in-kernel zero padding

    # validity mask of the (H, W) window inside a (TR, TC) working tile
    rows = lax.broadcasted_iota(jnp.int32, (TR, TC), 0)
    cols = lax.broadcasted_iota(jnp.int32, (TR, TC), 1)
    valid = (rows < H) & (cols < W)

    # ---- conv1 (1 -> 2 ch, 3x3, pad 1) + exact erf-GELU ----
    # hoisted: one set of 9 shifted input tiles shared by both channels
    xtaps = _shifted_planes(scr, 0)
    for c in range(2):
        v1 = _conv3x3(xtaps, p_ref, W1_OFF + c * 9, B1_OFF + c)
        v6 = (v1 * 0.5) * (lax.erf(v1 * INV_SQRT2) + 1.0)
        # zero outside the valid window, then park on an aligned staging plane
        scr[1 + c, R0:R0 + TR, C0:C0 + TC] = jnp.where(valid, v6, 0.0)

    # ---- conv2 (2 -> 4 ch, 3x3, pad 1, groups=2) ----
    for ci in range(2):
        vtaps = _shifted_planes(scr, 1 + ci)   # shared by both channels of the group
        for k in range(2):
            co = 2 * ci + k
            out_ref[co, :, :] = _conv3x3(vtaps, p_ref, W2_OFF + co * 9, B2_OFF + co)


@jax.jit
def model_forward(x, w1, b1, w2, b2):
    # x: (1, 1, 28, 28) f32 NCHW
    params = jnp.concatenate([
        w1.reshape(-1), b1.reshape(-1), w2.reshape(-1), b2.reshape(-1)
    ]).astype(jnp.float32)
    out_full = pl.pallas_call(
        model_kernel,
        out_shape=jax.ShapeDtypeStruct((4, TR, TC), jnp.float32),
        in_specs=[
            pl.BlockSpec(memory_space=pltpu.MemorySpace.VMEM),
            pl.BlockSpec(memory_space=pltpu.MemorySpace.SMEM),
        ],
        out_specs=pl.BlockSpec(memory_space=pltpu.MemorySpace.VMEM),
        scratch_shapes=[pltpu.VMEM((3, PR, PC), jnp.float32)],
    )(x[0, 0], params)
    # lane-dense kernel output -> logical NCHW
    return out_full[None, :, :H, :W]


def ref_forward(x, w1, b1, w2, b2):
    v1 = lax.conv_general_dilated(
        x, w1, (1, 1), ((1, 1), (1, 1)),
        dimension_numbers=("NCHW", "OIHW", "NCHW")) + b1[None, :, None, None]
    v6 = (v1 * 0.5) * (lax.erf(v1 * INV_SQRT2) + 1.0)
    v7 = lax.conv_general_dilated(
        v6, w2, (1, 1), ((1, 1), (1, 1)),
        dimension_numbers=("NCHW", "OIHW", "NCHW"),
        feature_group_count=2) + b2[None, :, None, None]
    return v7


if __name__ == "__main__":
    key = jax.random.PRNGKey(0)
    kx, k1, kb1, k2, kb2 = jax.random.split(key, 5)

    x = jax.random.normal(kx, (1, 1, 28, 28), dtype=jnp.float32)
    # deterministic parameter init (PyTorch-ish scale)
    w1 = jax.random.normal(k1, (2, 1, 3, 3), dtype=jnp.float32) * (1.0 / 3.0)
    b1 = jax.random.normal(kb1, (2,), dtype=jnp.float32) * 0.1
    w2 = jax.random.normal(k2, (4, 1, 3, 3), dtype=jnp.float32) * (1.0 / 3.0)
    b2 = jax.random.normal(kb2, (4,), dtype=jnp.float32) * 0.1

    out = jax.block_until_ready(model_forward(x, w1, b1, w2, b2))
    ref = jax.block_until_ready(ref_forward(x, w1, b1, w2, b2))

    assert out.shape == (1, 4, 28, 28), out.shape
    assert jnp.allclose(out, ref, atol=1e-4, rtol=1e-4), float(jnp.max(jnp.abs(out - ref)))
    print("KERNEL_OK")
</pallas_src>

<mosaic_0001>
module attributes {stable_mosaic.version = 11 : i64} {
  func.func @model_kernel(%arg0: memref<28x28xf32, #tpu.memory_space<vmem>>, %arg1: memref<60xf32, #tpu.memory_space<smem>>, %arg2: memref<4x32x128xf32, #tpu.memory_space<vmem>>, %arg3: memref<3x48x384xf32, #tpu.memory_space<vmem>>) attributes {dimension_semantics = [], scalar_prefetch = 0 : i64, scratch_operands = 1 : i64, tpu.core_type = #tpu.core_type<tc>} {
    %cst = arith.constant 0.000000e+00 : f32
    %0 = vector.broadcast %cst : f32 to vector<3x48x384xf32>
    %c0 = arith.constant 0 : index
    %c0_0 = arith.constant 0 : index
    %c0_1 = arith.constant 0 : index
    %1 = vector.load %arg3[%c0, %c0_0, %c0_1] : memref<3x48x384xf32, #tpu.memory_space<vmem>>, vector<3x48x384xf32>
    tpu.vector_store %arg3[%c0, %c0_0, %c0_1], %0 {strides = array<i32>} : memref<3x48x384xf32, #tpu.memory_space<vmem>>, vector<3x48x384xf32>,
    %c0_2 = arith.constant 0 : index
    %c0_3 = arith.constant 0 : index
    %2 = vector.load %arg0[%c0_2, %c0_3] : memref<28x28xf32, #tpu.memory_space<vmem>>, vector<28x28xf32>
    %c0_4 = arith.constant 0 : index
    %c8 = arith.constant 8 : index
    %c128 = arith.constant 128 : index
    %3 = vector.load %arg3[%c0_4, %c8, %c128] : memref<3x48x384xf32, #tpu.memory_space<vmem>>, vector<1x28x28xf32>
    %4 = vector.shape_cast %3 : vector<1x28x28xf32> to vector<28x28xf32>
    %5 = vector.shape_cast %2 : vector<28x28xf32> to vector<1x28x28xf32>
    tpu.vector_store %arg3[%c0_4, %c8, %c128], %5 {strides = array<i32>} : memref<3x48x384xf32, #tpu.memory_space<vmem>>, vector<1x28x28xf32>,
    %6 = tpu.iota {dimensions = array<i32: 0>} : vector<32x128xi32>
    %7 = tpu.iota {dimensions = array<i32: 1>} : vector<32x128xi32>
    %c28_i32 = arith.constant 28 : i32
    %8 = vector.broadcast %c28_i32 : i32 to vector<32x128xi32>
    %9 = arith.cmpi slt, %6, %8 : vector<32x128xi32>
    %c28_i32_5 = arith.constant 28 : i32
    %10 = vector.broadcast %c28_i32_5 : i32 to vector<32x128xi32>
    %11 = arith.cmpi slt, %7, %10 : vector<32x128xi32>
    %12 = arith.andi %9, %11 : vector<32x128xi1>
    %c0_6 = arith.constant 0 : index
    %c7 = arith.constant 7 : index
    %c127 = arith.constant 127 : index
    %13 = vector.load %arg3[%c0_6, %c7, %c127] : memref<3x48x384xf32, #tpu.memory_space<vmem>>, vector<1x32x128xf32>
    %14 = vector.shape_cast %13 : vector<1x32x128xf32> to vector<32x128xf32>
    %c0_7 = arith.constant 0 : index
    %c7_8 = arith.constant 7 : index
    %c128_9 = arith.constant 128 : index
    %15 = vector.load %arg3[%c0_7, %c7_8, %c128_9] : memref<3x48x384xf32, #tpu.memory_space<vmem>>, vector<1x32x128xf32>
    %16 = vector.shape_cast %15 : vector<1x32x128xf32> to vector<32x128xf32>
    %c0_10 = arith.constant 0 : index
    %c7_11 = arith.constant 7 : index
    %c129 = arith.constant 129 : index
    %17 = vector.load %arg3[%c0_10, %c7_11, %c129] : memref<3x48x384xf32, #tpu.memory_space<vmem>>, vector<1x32x128xf32>
    %18 = vector.shape_cast %17 : vector<1x32x128xf32> to vector<32x128xf32>
    %c0_12 = arith.constant 0 : index
    %c8_13 = arith.constant 8 : index
    %c127_14 = arith.constant 127 : index
    %19 = vector.load %arg3[%c0_12, %c8_13, %c127_14] : memref<3x48x384xf32, #tpu.memory_space<vmem>>, vector<1x32x128xf32>
    %20 = vector.shape_cast %19 : vector<1x32x128xf32> to vector<32x128xf32>
    %c0_15 = arith.constant 0 : index
    %c8_16 = arith.constant 8 : index
    %c128_17 = arith.constant 128 : index
    %21 = vector.load %arg3[%c0_15, %c8_16, %c128_17] : memref<3x48x384xf32, #tpu.memory_space<vmem>>, vector<1x32x128xf32>
    %22 = vector.shape_cast %21 : vector<1x32x128xf32> to vector<32x128xf32>
    %c0_18 = arith.constant 0 : index
    %c8_19 = arith.constant 8 : index
    %c129_20 = arith.constant 129 : index
    %23 = vector.load %arg3[%c0_18, %c8_19, %c129_20] : memref<3x48x384xf32, #tpu.memory_space<vmem>>, vector<1x32x128xf32>
    %24 = vector.shape_cast %23 : vector<1x32x128xf32> to vector<32x128xf32>
    %c0_21 = arith.constant 0 : index
    %c9 = arith.constant 9 : index
    %c127_22 = arith.constant 127 : index
    %25 = vector.load %arg3[%c0_21, %c9, %c127_22] : memref<3x48x384xf32, #tpu.memory_space<vmem>>, vector<1x32x128xf32>
    %26 = vector.shape_cast %25 : vector<1x32x128xf32> to vector<32x128xf32>
    %c0_23 = arith.constant 0 : index
    %c9_24 = arith.constant 9 : index
    %c128_25 = arith.constant 128 : index
    %27 = vector.load %arg3[%c0_23, %c9_24, %c128_25] : memref<3x48x384xf32, #tpu.memory_space<vmem>>, vector<1x32x128xf32>
    %28 = vector.shape_cast %27 : vector<1x32x128xf32> to vector<32x128xf32>
    %c0_26 = arith.constant 0 : index
    %c9_27 = arith.constant 9 : index
    %c129_28 = arith.constant 129 : index
    %29 = vector.load %arg3[%c0_26, %c9_27, %c129_28] : memref<3x48x384xf32, #tpu.memory_space<vmem>>, vector<1x32x128xf32>
    %30 = vector.shape_cast %29 : vector<1x32x128xf32> to vector<32x128xf32>
    %c0_29 = arith.constant 0 : index
    %31 = memref.load %arg1[%c0_29] : memref<60xf32, #tpu.memory_space<smem>>
    %32 = vector.broadcast %31 : f32 to vector<32x128xf32>
    %33 = arith.mulf %32, %14 : vector<32x128xf32>
    %c1 = arith.constant 1 : index
    %34 = memref.load %arg1[%c1] : memref<60xf32, #tpu.memory_space<smem>>
    %35 = vector.broadcast %34 : f32 to vector<32x128xf32>
    %36 = arith.mulf %35, %16 : vector<32x128xf32>
    %c2 = arith.constant 2 : index
    %37 = memref.load %arg1[%c2] : memref<60xf32, #tpu.memory_space<smem>>
    %38 = vector.broadcast %37 : f32 to vector<32x128xf32>
    %39 = arith.mulf %38, %18 : vector<32x128xf32>
    %c3 = arith.constant 3 : index
    %40 = memref.load %arg1[%c3] : memref<60xf32, #tpu.memory_space<smem>>
    %41 = vector.broadcast %40 : f32 to vector<32x128xf32>
    %42 = arith.mulf %41, %20 : vector<32x128xf32>
    %c4 = arith.constant 4 : index
    %43 = memref.load %arg1[%c4] : memref<60xf32, #tpu.memory_space<smem>>
    %44 = vector.broadcast %43 : f32 to vector<32x128xf32>
    %45 = arith.mulf %44, %22 : vector<32x128xf32>
    %c5 = arith.constant 5 : index
    %46 = memref.load %arg1[%c5] : memref<60xf32, #tpu.memory_space<smem>>
    %47 = vector.broadcast %46 : f32 to vector<32x128xf32>
    %48 = arith.mulf %47, %24 : vector<32x128xf32>
    %c6 = arith.constant 6 : index
    %49 = memref.load %arg1[%c6] : memref<60xf32, #tpu.memory_space<smem>>
    %50 = vector.broadcast %49 : f32 to vector<32x128xf32>
    %51 = arith.mulf %50, %26 : vector<32x128xf32>
    %c7_30 = arith.constant 7 : index
    %52 = memref.load %arg1[%c7_30] : memref<60xf32, #tpu.memory_space<smem>>
    %53 = vector.broadcast %52 : f32 to vector<32x128xf32>
    %54 = arith.mulf %53, %28 : vector<32x128xf32>
    %c8_31 = arith.constant 8 : index
    %55 = memref.load %arg1[%c8_31] : memref<60xf32, #tpu.memory_space<smem>>
    %56 = vector.broadcast %55 : f32 to vector<32x128xf32>
    %57 = arith.mulf %56, %30 : vector<32x128xf32>
    %58 = arith.addf %33, %36 : vector<32x128xf32>
    %59 = arith.addf %39, %42 : vector<32x128xf32>
    %60 = arith.addf %45, %48 : vector<32x128xf32>
    %61 = arith.addf %51, %54 : vector<32x128xf32>
    %62 = arith.addf %58, %59 : vector<32x128xf32>
    %63 = arith.addf %60, %61 : vector<32x128xf32>
    %64 = arith.addf %62, %63 : vector<32x128xf32>
    %65 = arith.addf %64, %57 : vector<32x128xf32>
    %c18 = arith.constant 18 : index
    %66 = memref.load %arg1[%c18] : memref<60xf32, #tpu.memory_space<smem>>
    %67 = vector.broadcast %66 : f32 to vector<32x128xf32>
    %68 = arith.addf %65, %67 : vector<32x128xf32>
    %cst_32 = arith.constant 5.000000e-01 : f32
    %69 = vector.broadcast %cst_32 : f32 to vector<32x128xf32>
    %70 = arith.mulf %68, %69 : vector<32x128xf32>
    %cst_33 = arith.constant 0.707106769 : f32
    %71 = vector.broadcast %cst_33 : f32 to vector<32x128xf32>
    %72 = arith.mulf %68, %71 : vector<32x128xf32>
    %73 = math.erf %72 : vector<32x128xf32>
    %cst_34 = arith.constant 1.000000e+00 : f32
    %74 = vector.broadcast %cst_34 : f32 to vector<32x128xf32>
    %75 = arith.addf %73, %74 : vector<32x128xf32>
    %76 = arith.mulf %70, %75 : vector<32x128xf32>
    %cst_35 = arith.constant 0.000000e+00 : f32
    %77 = vector.broadcast %cst_35 : f32 to vector<32x128xf32>
    %78 = arith.select %12, %76, %77 : vector<32x128xi1>, vector<32x128xf32>
    %c1_36 = arith.constant 1 : index
    %c8_37 = arith.constant 8 : index
    %c128_38 = arith.constant 128 : index
    %79 = vector.load %arg3[%c1_36, %c8_37, %c128_38] : memref<3x48x384xf32, #tpu.memory_space<vmem>>, vector<1x32x128xf32>
    %80 = vector.shape_cast %79 : vector<1x32x128xf32> to vector<32x128xf32>
    %81 = vector.shape_cast %78 : vector<32x128xf32> to vector<1x32x128xf32>
    tpu.vector_store %arg3[%c1_36, %c8_37, %c128_38], %81 {strides = array<i32>} : memref<3x48x384xf32, #tpu.memory_space<vmem>>, vector<1x32x128xf32>,
    %c9_39 = arith.constant 9 : index
    %82 = memref.load %arg1[%c9_39] : memref<60xf32, #tpu.memory_space<smem>>
    %83 = vector.broadcast %82 : f32 to vector<32x128xf32>
    %84 = arith.mulf %83, %14 : vector<32x128xf32>
    %c10 = arith.constant 10 : index
    %85 = memref.load %arg1[%c10] : memref<60xf32, #tpu.memory_space<smem>>
    %86 = vector.broadcast %85 : f32 to vector<32x128xf32>
    %87 = arith.mulf %86, %16 : vector<32x128xf32>
    %c11 = arith.constant 11 : index
    %88 = memref.load %arg1[%c11] : memref<60xf32, #tpu.memory_space<smem>>
    %89 = vector.broadcast %88 : f32 to vector<32x128xf32>
    %90 = arith.mulf %89, %18 : vector<32x128xf32>
    %c12 = arith.constant 12 : index
    %91 = memref.load %arg1[%c12] : memref<60xf32, #tpu.memory_space<smem>>
    %92 = vector.broadcast %91 : f32 to vector<32x128xf32>
    %93 = arith.mulf %92, %20 : vector<32x128xf32>
    %c13 = arith.constant 13 : index
    %94 = memref.load %arg1[%c13] : memref<60xf32, #tpu.memory_space<smem>>
    %95 = vector.broadcast %94 : f32 to vector<32x128xf32>
    %96 = arith.mulf %95, %22 : vector<32x128xf32>
    %c14 = arith.constant 14 : index
    %97 = memref.load %arg1[%c14] : memref<60xf32, #tpu.memory_space<smem>>
    %98 = vector.broadcast %97 : f32 to vector<32x128xf32>
    %99 = arith.mulf %98, %24 : vector<32x128xf32>
    %c15 = arith.constant 15 : index
    %100 = memref.load %arg1[%c15] : memref<60xf32, #tpu.memory_space<smem>>
    %101 = vector.broadcast %100 : f32 to vector<32x128xf32>
    %102 = arith.mulf %101, %26 : vector<32x128xf32>
    %c16 = arith.constant 16 : index
    %103 = memref.load %arg1[%c16] : memref<60xf32, #tpu.memory_space<smem>>
    %104 = vector.broadcast %103 : f32 to vector<32x128xf32>
    %105 = arith.mulf %104, %28 : vector<32x128xf32>
    %c17 = arith.constant 17 : index
    %106 = memref.load %arg1[%c17] : memref<60xf32, #tpu.memory_space<smem>>
    %107 = vector.broadcast %106 : f32 to vector<32x128xf32>
    %108 = arith.mulf %107, %30 : vector<32x128xf32>
    %109 = arith.addf %84, %87 : vector<32x128xf32>
    %110 = arith.addf %90, %93 : vector<32x128xf32>
    %111 = arith.addf %96, %99 : vector<32x128xf32>
    %112 = arith.addf %102, %105 : vector<32x128xf32>
    %113 = arith.addf %109, %110 : vector<32x128xf32>
    %114 = arith.addf %111, %112 : vector<32x128xf32>
    %115 = arith.addf %113, %114 : vector<32x128xf32>
    %116 = arith.addf %115, %108 : vector<32x128xf32>
    %c19 = arith.constant 19 : index
    %117 = memref.load %arg1[%c19] : memref<60xf32, #tpu.memory_space<smem>>
    %118 = vector.broadcast %117 : f32 to vector<32x128xf32>
    %119 = arith.addf %116, %118 : vector<32x128xf32>
    %cst_40 = arith.constant 5.000000e-01 : f32
    %120 = vector.broadcast %cst_40 : f32 to vector<32x128xf32>
    %121 = arith.mulf %119, %120 : vector<32x128xf32>
    %cst_41 = arith.constant 0.707106769 : f32
    %122 = vector.broadcast %cst_41 : f32 to vector<32x128xf32>
    %123 = arith.mulf %119, %122 : vector<32x128xf32>
    %124 = math.erf %123 : vector<32x128xf32>
    %cst_42 = arith.constant 1.000000e+00 : f32
    %125 = vector.broadcast %cst_42 : f32 to vector<32x128xf32>
    %126 = arith.addf %124, %125 : vector<32x128xf32>
    %127 = arith.mulf %121, %126 : vector<32x128xf32>
    %cst_43 = arith.constant 0.000000e+00 : f32
    %128 = vector.broadcast %cst_43 : f32 to vector<32x128xf32>
    %129 = arith.select %12, %127, %128 : vector<32x128xi1>, vector<32x128xf32>
    %c2_44 = arith.constant 2 : index
    %c8_45 = arith.constant 8 : index
    %c128_46 = arith.constant 128 : index
    %130 = vector.load %arg3[%c2_44, %c8_45, %c128_46] : memref<3x48x384xf32, #tpu.memory_space<vmem>>, vector<1x32x128xf32>
    %131 = vector.shape_cast %130 : vector<1x32x128xf32> to vector<32x128xf32>
    %132 = vector.shape_cast %129 : vector<32x128xf32> to vector<1x32x128xf32>
    tpu.vector_store %arg3[%c2_44, %c8_45, %c128_46], %132 {strides = array<i32>} : memref<3x48x384xf32, #tpu.memory_space<vmem>>, vector<1x32x128xf32>,
    %c1_47 = arith.constant 1 : index
    %c7_48 = arith.constant 7 : index
    %c127_49 = arith.constant 127 : index
    %133 = vector.load %arg3[%c1_47, %c7_48, %c127_49] : memref<3x48x384xf32, #tpu.memory_space<vmem>>, vector<1x32x128xf32>
    %134 = vector.shape_cast %133 : vector<1x32x128xf32> to vector<32x128xf32>
    %c1_50 = arith.constant 1 : index
    %c7_51 = arith.constant 7 : index
    %c128_52 = arith.constant 128 : index
    %135 = vector.load %arg3[%c1_50, %c7_51, %c128_52] : memref<3x48x384xf32, #tpu.memory_space<vmem>>, vector<1x32x128xf32>
    %136 = vector.shape_cast %135 : vector<1x32x128xf32> to vector<32x128xf32>
    %c1_53 = arith.constant 1 : index
    %c7_54 = arith.constant 7 : index
    %c129_55 = arith.constant 129 : index
    %137 = vector.load %arg3[%c1_53, %c7_54, %c129_55] : memref<3x48x384xf32, #tpu.memory_space<vmem>>, vector<1x32x128xf32>
    %138 = vector.shape_cast %137 : vector<1x32x128xf32> to vector<32x128xf32>
    %c1_56 = arith.constant 1 : index
    %c8_57 = arith.constant 8 : index
    %c127_58 = arith.constant 127 : index
    %139 = vector.load %arg3[%c1_56, %c8_57, %c127_58] : memref<3x48x384xf32, #tpu.memory_space<vmem>>, vector<1x32x128xf32>
    %140 = vector.shape_cast %139 : vector<1x32x128xf32> to vector<32x128xf32>
    %c1_59 = arith.constant 1 : index
    %c8_60 = arith.constant 8 : index
    %c128_61 = arith.constant 128 : index
    %141 = vector.load %arg3[%c1_59, %c8_60, %c128_61] : memref<3x48x384xf32, #tpu.memory_space<vmem>>, vector<1x32x128xf32>
    %142 = vector.shape_cast %141 : vector<1x32x128xf32> to vector<32x128xf32>
    %c1_62 = arith.constant 1 : index
    %c8_63 = arith.constant 8 : index
    %c129_64 = arith.constant 129 : index
    %143 = vector.load %arg3[%c1_62, %c8_63, %c129_64] : memref<3x48x384xf32, #tpu.memory_space<vmem>>, vector<1x32x128xf32>
    %144 = vector.shape_cast %143 : vector<1x32x128xf32> to vector<32x128xf32>
    %c1_65 = arith.constant 1 : index
    %c9_66 = arith.constant 9 : index
    %c127_67 = arith.constant 127 : index
    %145 = vector.load %arg3[%c1_65, %c9_66, %c127_67] : memref<3x48x384xf32, #tpu.memory_space<vmem>>, vector<1x32x128xf32>
    %146 = vector.shape_cast %145 : vector<1x32x128xf32> to vector<32x128xf32>
    %c1_68 = arith.constant 1 : index
    %c9_69 = arith.constant 9 : index
    %c128_70 = arith.constant 128 : index
    %147 = vector.load %arg3[%c1_68, %c9_69, %c128_70] : memref<3x48x384xf32, #tpu.memory_space<vmem>>, vector<1x32x128xf32>
    %148 = vector.shape_cast %147 : vector<1x32x128xf32> to vector<32x128xf32>
    %c1_71 = arith.constant 1 : index
    %c9_72 = arith.constant 9 : index
    %c129_73 = arith.constant 129 : index
    %149 = vector.load %arg3[%c1_71, %c9_72, %c129_73] : memref<3x48x384xf32, #tpu.memory_space<vmem>>, vector<1x32x128xf32>
    %150 = vector.shape_cast %149 : vector<1x32x128xf32> to vector<32x128xf32>
    %c20 = arith.constant 20 : index
    %151 = memref.load %arg1[%c20] : memref<60xf32, #tpu.memory_space<smem>>
    %152 = vector.broadcast %151 : f32 to vector<32x128xf32>
    %153 = arith.mulf %152, %134 : vector<32x128xf32>
    %c21 = arith.constant 21 : index
    %154 = memref.load %arg1[%c21] : memref<60xf32, #tpu.memory_space<smem>>
    %155 = vector.broadcast %154 : f32 to vector<32x128xf32>
    %156 = arith.mulf %155, %136 : vector<32x128xf32>
    %c22 = arith.constant 22 : index
    %157 = memref.load %arg1[%c22] : memref<60xf32, #tpu.memory_space<smem>>
    %158 = vector.broadcast %157 : f32 to vector<32x128xf32>
    %159 = arith.mulf %158, %138 : vector<32x128xf32>
    %c23 = arith.constant 23 : index
    %160 = memref.load %arg1[%c23] : memref<60xf32, #tpu.memory_space<smem>>
    %161 = vector.broadcast %160 : f32 to vector<32x128xf32>
    %162 = arith.mulf %161, %140 : vector<32x128xf32>
    %c24 = arith.constant 24 : index
    %163 = memref.load %arg1[%c24] : memref<60xf32, #tpu.memory_space<smem>>
    %164 = vector.broadcast %163 : f32 to vector<32x128xf32>
    %165 = arith.mulf %164, %142 : vector<32x128xf32>
    %c25 = arith.constant 25 : index
    %166 = memref.load %arg1[%c25] : memref<60xf32, #tpu.memory_space<smem>>
    %167 = vector.broadcast %166 : f32 to vector<32x128xf32>
    %168 = arith.mulf %167, %144 : vector<32x128xf32>
    %c26 = arith.constant 26 : index
    %169 = memref.load %arg1[%c26] : memref<60xf32, #tpu.memory_space<smem>>
    %170 = vector.broadcast %169 : f32 to vector<32x128xf32>
    %171 = arith.mulf %170, %146 : vector<32x128xf32>
    %c27 = arith.constant 27 : index
    %172 = memref.load %arg1[%c27] : memref<60xf32, #tpu.memory_space<smem>>
    %173 = vector.broadcast %172 : f32 to vector<32x128xf32>
    %174 = arith.mulf %173, %148 : vector<32x128xf32>
    %c28 = arith.constant 28 : index
    %175 = memref.load %arg1[%c28] : memref<60xf32, #tpu.memory_space<smem>>
    %176 = vector.broadcast %175 : f32 to vector<32x128xf32>
    %177 = arith.mulf %176, %150 : vector<32x128xf32>
    %178 = arith.addf %153, %156 : vector<32x128xf32>
    %179 = arith.addf %159, %162 : vector<32x128xf32>
    %180 = arith.addf %165, %168 : vector<32x128xf32>
    %181 = arith.addf %171, %174 : vector<32x128xf32>
    %182 = arith.addf %178, %179 : vector<32x128xf32>
    %183 = arith.addf %180, %181 : vector<32x128xf32>
    %184 = arith.addf %182, %183 : vector<32x128xf32>
    %185 = arith.addf %184, %177 : vector<32x128xf32>
    %c56 = arith.constant 56 : index
    %186 = memref.load %arg1[%c56] : memref<60xf32, #tpu.memory_space<smem>>
    %187 = vector.broadcast %186 : f32 to vector<32x128xf32>
    %188 = arith.addf %185, %187 : vector<32x128xf32>
    %c0_74 = arith.constant 0 : index
    %c0_75 = arith.constant 0 : index
    %c0_76 = arith.constant 0 : index
    %189 = vector.load %arg2[%c0_74, %c0_75, %c0_76] : memref<4x32x128xf32, #tpu.memory_space<vmem>>, vector<1x32x128xf32>
    %190 = vector.shape_cast %189 : vector<1x32x128xf32> to vector<32x128xf32>
    %191 = vector.shape_cast %188 : vector<32x128xf32> to vector<1x32x128xf32>
    tpu.vector_store %arg2[%c0_74, %c0_75, %c0_76], %191 {strides = array<i32>} : memref<4x32x128xf32, #tpu.memory_space<vmem>>, vector<1x32x128xf32>,
    %c29 = arith.constant 29 : index
    %192 = memref.load %arg1[%c29] : memref<60xf32, #tpu.memory_space<smem>>
    %193 = vector.broadcast %192 : f32 to vector<32x128xf32>
    %194 = arith.mulf %193, %134 : vector<32x128xf32>
    %c30 = arith.constant 30 : index
    %195 = memref.load %arg1[%c30] : memref<60xf32, #tpu.memory_space<smem>>
    %196 = vector.broadcast %195 : f32 to vector<32x128xf32>
    %197 = arith.mulf %196, %136 : vector<32x128xf32>
    %c31 = arith.constant 31 : index
    %198 = memref.load %arg1[%c31] : memref<60xf32, #tpu.memory_space<smem>>
    %199 = vector.broadcast %198 : f32 to vector<32x128xf32>
    %200 = arith.mulf %199, %138 : vector<32x128xf32>
    %c32 = arith.constant 32 : index
    %201 = memref.load %arg1[%c32] : memref<60xf32, #tpu.memory_space<smem>>
    %202 = vector.broadcast %201 : f32 to vector<32x128xf32>
    %203 = arith.mulf %202, %140 : vector<32x128xf32>
    %c33 = arith.constant 33 : index
    %204 = memref.load %arg1[%c33] : memref<60xf32, #tpu.memory_space<smem>>
    %205 = vector.broadcast %204 : f32 to vector<32x128xf32>
    %206 = arith.mulf %205, %142 : vector<32x128xf32>
    %c34 = arith.constant 34 : index
    %207 = memref.load %arg1[%c34] : memref<60xf32, #tpu.memory_space<smem>>
    %208 = vector.broadcast %207 : f32 to vector<32x128xf32>
    %209 = arith.mulf %208, %144 : vector<32x128xf32>
    %c35 = arith.constant 35 : index
    %210 = memref.load %arg1[%c35] : memref<60xf32, #tpu.memory_space<smem>>
    %211 = vector.broadcast %210 : f32 to vector<32x128xf32>
    %212 = arith.mulf %211, %146 : vector<32x128xf32>
    %c36 = arith.constant 36 : index
    %213 = memref.load %arg1[%c36] : memref<60xf32, #tpu.memory_space<smem>>
    %214 = vector.broadcast %213 : f32 to vector<32x128xf32>
    %215 = arith.mulf %214, %148 : vector<32x128xf32>
    %c37 = arith.constant 37 : index
    %216 = memref.load %arg1[%c37] : memref<60xf32, #tpu.memory_space<smem>>
    %217 = vector.broadcast %216 : f32 to vector<32x128xf32>
    %218 = arith.mulf %217, %150 : vector<32x128xf32>
    %219 = arith.addf %194, %197 : vector<32x128xf32>
    %220 = arith.addf %200, %203 : vector<32x128xf32>
    %221 = arith.addf %206, %209 : vector<32x128xf32>
    %222 = arith.addf %212, %215 : vector<32x128xf32>
    %223 = arith.addf %219, %220 : vector<32x128xf32>
    %224 = arith.addf %221, %222 : vector<32x128xf32>
    %225 = arith.addf %223, %224 : vector<32x128xf32>
    %226 = arith.addf %225, %218 : vector<32x128xf32>
    %c57 = arith.constant 57 : index
    %227 = memref.load %arg1[%c57] : memref<60xf32, #tpu.memory_space<smem>>
    %228 = vector.broadcast %227 : f32 to vector<32x128xf32>
    %229 = arith.addf %226, %228 : vector<32x128xf32>
    %c1_77 = arith.constant 1 : index
    %c0_78 = arith.constant 0 : index
    %c0_79 = arith.constant 0 : index
    %230 = vector.load %arg2[%c1_77, %c0_78, %c0_79] : memref<4x32x128xf32, #tpu.memory_space<vmem>>, vector<1x32x128xf32>
    %231 = vector.shape_cast %230 : vector<1x32x128xf32> to vector<32x128xf32>
    %232 = vector.shape_cast %229 : vector<32x128xf32> to vector<1x32x128xf32>
    tpu.vector_store %arg2[%c1_77, %c0_78, %c0_79], %232 {strides = array<i32>} : memref<4x32x128xf32, #tpu.memory_space<vmem>>, vector<1x32x128xf32>,
    %c2_80 = arith.constant 2 : index
    %c7_81 = arith.constant 7 : index
    %c127_82 = arith.constant 127 : index
    %233 = vector.load %arg3[%c2_80, %c7_81, %c127_82] : memref<3x48x384xf32, #tpu.memory_space<vmem>>, vector<1x32x128xf32>
    %234 = vector.shape_cast %233 : vector<1x32x128xf32> to vector<32x128xf32>
    %c2_83 = arith.constant 2 : index
    %c7_84 = arith.constant 7 : index
    %c128_85 = arith.constant 128 : index
    %235 = vector.load %arg3[%c2_83, %c7_84, %c128_85] : memref<3x48x384xf32, #tpu.memory_space<vmem>>, vector<1x32x128xf32>
    %236 = vector.shape_cast %235 : vector<1x32x128xf32> to vector<32x128xf32>
    %c2_86 = arith.constant 2 : index
    %c7_87 = arith.constant 7 : index
    %c129_88 = arith.constant 129 : index
    %237 = vector.load %arg3[%c2_86, %c7_87, %c129_88] : memref<3x48x384xf32, #tpu.memory_space<vmem>>, vector<1x32x128xf32>
    %238 = vector.shape_cast %237 : vector<1x32x128xf32> to vector<32x128xf32>
    %c2_89 = arith.constant 2 : index
    %c8_90 = arith.constant 8 : index
    %c127_91 = arith.constant 127 : index
    %239 = vector.load %arg3[%c2_89, %c8_90, %c127_91] : memref<3x48x384xf32, #tpu.memory_space<vmem>>, vector<1x32x128xf32>
    %240 = vector.shape_cast %239 : vector<1x32x128xf32> to vector<32x128xf32>
    %c2_92 = arith.constant 2 : index
    %c8_93 = arith.constant 8 : index
    %c128_94 = arith.constant 128 : index
    %241 = vector.load %arg3[%c2_92, %c8_93, %c128_94] : memref<3x48x384xf32, #tpu.memory_space<vmem>>, vector<1x32x128xf32>
    %242 = vector.shape_cast %241 : vector<1x32x128xf32> to vector<32x128xf32>
    %c2_95 = arith.constant 2 : index
    %c8_96 = arith.constant 8 : index
    %c129_97 = arith.constant 129 : index
    %243 = vector.load %arg3[%c2_95, %c8_96, %c129_97] : memref<3x48x384xf32, #tpu.memory_space<vmem>>, vector<1x32x128xf32>
    %244 = vector.shape_cast %243 : vector<1x32x128xf32> to vector<32x128xf32>
    %c2_98 = arith.constant 2 : index
    %c9_99 = arith.constant 9 : index
    %c127_100 = arith.constant 127 : index
    %245 = vector.load %arg3[%c2_98, %c9_99, %c127_100] : memref<3x48x384xf32, #tpu.memory_space<vmem>>, vector<1x32x128xf32>
    %246 = vector.shape_cast %245 : vector<1x32x128xf32> to vector<32x128xf32>
    %c2_101 = arith.constant 2 : index
    %c9_102 = arith.constant 9 : index
    %c128_103 = arith.constant 128 : index
    %247 = vector.load %arg3[%c2_101, %c9_102, %c128_103] : memref<3x48x384xf32, #tpu.memory_space<vmem>>, vector<1x32x128xf32>
    %248 = vector.shape_cast %247 : vector<1x32x128xf32> to vector<32x128xf32>
    %c2_104 = arith.constant 2 : index
    %c9_105 = arith.constant 9 : index
    %c129_106 = arith.constant 129 : index
    %249 = vector.load %arg3[%c2_104, %c9_105, %c129_106] : memref<3x48x384xf32, #tpu.memory_space<vmem>>, vector<1x32x128xf32>
    %250 = vector.shape_cast %249 : vector<1x32x128xf32> to vector<32x128xf32>
    %c38 = arith.constant 38 : index
    %251 = memref.load %arg1[%c38] : memref<60xf32, #tpu.memory_space<smem>>
    %252 = vector.broadcast %251 : f32 to vector<32x128xf32>
    %253 = arith.mulf %252, %234 : vector<32x128xf32>
    %c39 = arith.constant 39 : index
    %254 = memref.load %arg1[%c39] : memref<60xf32, #tpu.memory_space<smem>>
    %255 = vector.broadcast %254 : f32 to vector<32x128xf32>
    %256 = arith.mulf %255, %236 : vector<32x128xf32>
    %c40 = arith.constant 40 : index
    %257 = memref.load %arg1[%c40] : memref<60xf32, #tpu.memory_space<smem>>
    %258 = vector.broadcast %257 : f32 to vector<32x128xf32>
    %259 = arith.mulf %258, %238 : vector<32x128xf32>
    %c41 = arith.constant 41 : index
    %260 = memref.load %arg1[%c41] : memref<60xf32, #tpu.memory_space<smem>>
    %261 = vector.broadcast %260 : f32 to vector<32x128xf32>
    %262 = arith.mulf %261, %240 : vector<32x128xf32>
    %c42 = arith.constant 42 : index
    %263 = memref.load %arg1[%c42] : memref<60xf32, #tpu.memory_space<smem>>
    %264 = vector.broadcast %263 : f32 to vector<32x128xf32>
    %265 = arith.mulf %264, %242 : vector<32x128xf32>
    %c43 = arith.constant 43 : index
    %266 = memref.load %arg1[%c43] : memref<60xf32, #tpu.memory_space<smem>>
    %267 = vector.broadcast %266 : f32 to vector<32x128xf32>
    %268 = arith.mulf %267, %244 : vector<32x128xf32>
    %c44 = arith.constant 44 : index
    %269 = memref.load %arg1[%c44] : memref<60xf32, #tpu.memory_space<smem>>
    %270 = vector.broadcast %269 : f32 to vector<32x128xf32>
    %271 = arith.mulf %270, %246 : vector<32x128xf32>
    %c45 = arith.constant 45 : index
    %272 = memref.load %arg1[%c45] : memref<60xf32, #tpu.memory_space<smem>>
    %273 = vector.broadcast %272 : f32 to vector<32x128xf32>
    %274 = arith.mulf %273, %248 : vector<32x128xf32>
    %c46 = arith.constant 46 : index
    %275 = memref.load %arg1[%c46] : memref<60xf32, #tpu.memory_space<smem>>
    %276 = vector.broadcast %275 : f32 to vector<32x128xf32>
    %277 = arith.mulf %276, %250 : vector<32x128xf32>
    %278 = arith.addf %253, %256 : vector<32x128xf32>
    %279 = arith.addf %259, %262 : vector<32x128xf32>
    %280 = arith.addf %265, %268 : vector<32x128xf32>
    %281 = arith.addf %271, %274 : vector<32x128xf32>
    %282 = arith.addf %278, %279 : vector<32x128xf32>
    %283 = arith.addf %280, %281 : vector<32x128xf32>
    %284 = arith.addf %282, %283 : vector<32x128xf32>
    %285 = arith.addf %284, %277 : vector<32x128xf32>
    %c58 = arith.constant 58 : index
    %286 = memref.load %arg1[%c58] : memref<60xf32, #tpu.memory_space<smem>>
    %287 = vector.broadcast %286 : f32 to vector<32x128xf32>
    %288 = arith.addf %285, %287 : vector<32x128xf32>
    %c2_107 = arith.constant 2 : index
    %c0_108 = arith.constant 0 : index
    %c0_109 = arith.constant 0 : index
    %289 = vector.load %arg2[%c2_107, %c0_108, %c0_109] : memref<4x32x128xf32, #tpu.memory_space<vmem>>, vector<1x32x128xf32>
    %290 = vector.shape_cast %289 : vector<1x32x128xf32> to vector<32x128xf32>
    %291 = vector.shape_cast %288 : vector<32x128xf32> to vector<1x32x128xf32>
    tpu.vector_store %arg2[%c2_107, %c0_108, %c0_109], %291 {strides = array<i32>} : memref<4x32x128xf32, #tpu.memory_space<vmem>>, vector<1x32x128xf32>,
    %c47 = arith.constant 47 : index
    %292 = memref.load %arg1[%c47] : memref<60xf32, #tpu.memory_space<smem>>
    %293 = vector.broadcast %292 : f32 to vector<32x128xf32>
    %294 = arith.mulf %293, %234 : vector<32x128xf32>
    %c48 = arith.constant 48 : index
    %295 = memref.load %arg1[%c48] : memref<60xf32, #tpu.memory_space<smem>>
    %296 = vector.broadcast %295 : f32 to vector<32x128xf32>
    %297 = arith.mulf %296, %236 : vector<32x128xf32>
    %c49 = arith.constant 49 : index
    %298 = memref.load %arg1[%c49] : memref<60xf32, #tpu.memory_space<smem>>
    %299 = vector.broadcast %298 : f32 to vector<32x128xf32>
    %300 = arith.mulf %299, %238 : vector<32x128xf32>
    %c50 = arith.constant 50 : index
    %301 = memref.load %arg1[%c50] : memref<60xf32, #tpu.memory_space<smem>>
    %302 = vector.broadcast %301 : f32 to vector<32x128xf32>
    %303 = arith.mulf %302, %240 : vector<32x128xf32>
    %c51 = arith.constant 51 : index
    %304 = memref.load %arg1[%c51] : memref<60xf32, #tpu.memory_space<smem>>
    %305 = vector.broadcast %304 : f32 to vector<32x128xf32>
    %306 = arith.mulf %305, %242 : vector<32x128xf32>
    %c52 = arith.constant 52 : index
    %307 = memref.load %arg1[%c52] : memref<60xf32, #tpu.memory_space<smem>>
    %308 = vector.broadcast %307 : f32 to vector<32x128xf32>
    %309 = arith.mulf %308, %244 : vector<32x128xf32>
    %c53 = arith.constant 53 : index
    %310 = memref.load %arg1[%c53] : memref<60xf32, #tpu.memory_space<smem>>
    %311 = vector.broadcast %310 : f32 to vector<32x128xf32>
    %312 = arith.mulf %311, %246 : vector<32x128xf32>
    %c54 = arith.constant 54 : index
    %313 = memref.load %arg1[%c54] : memref<60xf32, #tpu.memory_space<smem>>
    %314 = vector.broadcast %313 : f32 to vector<32x128xf32>
    %315 = arith.mulf %314, %248 : vector<32x128xf32>
    %c55 = arith.constant 55 : index
    %316 = memref.load %arg1[%c55] : memref<60xf32, #tpu.memory_space<smem>>
    %317 = vector.broadcast %316 : f32 to vector<32x128xf32>
    %318 = arith.mulf %317, %250 : vector<32x128xf32>
    %319 = arith.addf %294, %297 : vector<32x128xf32>
    %320 = arith.addf %300, %303 : vector<32x128xf32>
    %321 = arith.addf %306, %309 : vector<32x128xf32>
    %322 = arith.addf %312, %315 : vector<32x128xf32>
    %323 = arith.addf %319, %320 : vector<32x128xf32>
    %324 = arith.addf %321, %322 : vector<32x128xf32>
    %325 = arith.addf %323, %324 : vector<32x128xf32>
    %326 = arith.addf %325, %318 : vector<32x128xf32>
    %c59 = arith.constant 59 : index
    %327 = memref.load %arg1[%c59] : memref<60xf32, #tpu.memory_space<smem>>
    %328 = vector.broadcast %327 : f32 to vector<32x128xf32>
    %329 = arith.addf %326, %328 : vector<32x128xf32>
    %c3_110 = arith.constant 3 : index
    %c0_111 = arith.constant 0 : index
    %c0_112 = arith.constant 0 : index
    %330 = vector.load %arg2[%c3_110, %c0_111, %c0_112] : memref<4x32x128xf32, #tpu.memory_space<vmem>>, vector<1x32x128xf32>
    %331 = vector.shape_cast %330 : vector<1x32x128xf32> to vector<32x128xf32>
    %332 = vector.shape_cast %329 : vector<32x128xf32> to vector<1x32x128xf32>
    tpu.vector_store %arg2[%c3_110, %c0_111, %c0_112], %332 {strides = array<i32>} : memref<4x32x128xf32, #tpu.memory_space<vmem>>, vector<1x32x128xf32>,
    return
  }
}

</mosaic_0001>

<bundles_post_ra>
// kernel: model_forward.1
= control target key start
LH: loop header
LB: loop body
LE: loop exit
PB: predicated region body
PF: predicated region fallthrough
CT: control target
= control target key end

     0   :  { %7 = vsyncpa [#allocation4], 0  ;;  %s6730_s0 = inlined_call_operand.vmem [shape: f32[28,28], index: 0, kind: input, shape index: {}]   ;;  %s6731_s1 = inlined_call_operand.vmem [shape: f32[60], index: 1, kind: input, shape index: {}]   ;;  %s6732_s2 = inlined_call_operand.vmem [shape: f32[4,32,128], index: 2, kind: output, shape index: {}]  }
   0x1   :  { %s16_s11 = sshll.u32 %s6731_s1, 4  ;;  %s17_s11 = int_to_ptr.vmem [resolvable:$true] %s16_s11 }
   0x2   :  { %s3640_s12 = scalar_lea.vmem %s17_s11, 16  ;;  %p3645_p1 = scmp.lt.s32.totalorder %s17_s11, %s17_s11 }
   0x3   :  { %p3641_p0 = scmp.ne.s32.totalorder %s17_s11, %s3640_s12  ;;  %p3646_p2 = scmp.lt.s32.totalorder %s3640_s12, %s3640_s12 }
   0x5   :  { %p3647_p3 = por %p3646_p2, %p3645_p1 }
   0x7   :  { %p3648_p4 = pnand %p3647_p3, %p3641_p0 }
   0x9   :  { %3651 = shalt.err (!%p3648_p4)
}
   0xa   :  { %s3654_s13 = smov [#allocation3]  }
   0xb   :  { %19 = dma.vmem_to_smem %s17_s11, 16, %s3654_s13, [#allocation4]  }
   0xc   :  { %3652 = dma.done.wait [#allocation4], 16  }
   0xd   :  { %3653 = vsyncadd [#allocation4], 4294967280 }
   0xe   :  { %23 = sfence }
   0xf   :  { %s3678_s14 = sld [smem:[#allocation3 + $0x1]]  ;;  %v79_v0 = vld [vmem:[%s6730_s0 + $0x8] sm:$0xff]  ;;  %vm82_vm0 = vcmask 228352   ;;  %v3655_v1 = vmov 0.0   ;;  %v78_v2 = vld [vmem:[%s6730_s0] sm:$0xff]  ;;  %v80_v3 = vld [vmem:[%s6730_s0 + $0x10] sm:$0xff] }
  0x10   :  { %25 = vst [vmem:[#allocation2 + $0x8] sm:$0xff] %v3655_v1  ;;  %24 = vst [vmem:[#allocation2] sm:$0xff] %v3655_v1  ;;  %v81_v4 = vld [vmem:[%s6730_s0 + $0x18] sm:$0xf]  ;;  %vm86_vm1 = vcmask 224256   ;;  %s3493_s22 = sld [smem:[#allocation3 + $0x3]] }
  0x11   :  { %26 = vst [vmem:[#allocation2 + $0x10] sm:$0xff] %v3655_v1  ;;  %27 = vst [vmem:[#allocation2 + $0x18] sm:$0xff] %v3655_v1  ;;  %s3656_s0 = smov 127   ;;  %vm254_vm2 = vcmask 1046528   ;;  %s3657_s23 = smov 2   ;;  %vm541_vm3 = vcmask 1045504  }
  0x12   :  { %28 = vst [vmem:[#allocation2 + $0x20] sm:$0xff] %v3655_v1  ;;  %29 = vst [vmem:[#allocation2 + $0x28] sm:$0xff] %v3655_v1  ;;  %s3495_s24 = sld [smem:[#allocation3 + $0x5]]  ;;  %s3497_s25 = sld [smem:[#allocation3 + $0x7]]  ;;  %vm289_vm4 = vcmask 15360   ;;  %vm339_vm5 = vcmask 1039360  }
  0x13   :  { %31 = vst [vmem:[#allocation2 + $0x38] sm:$0xff] %v3655_v1  ;;  %34 = vst [vmem:[#allocation2 + $0x50] sm:$0xff] %v3655_v1  ;;  %s3498_s26 = sld [smem:[#allocation3 + $0x8]]  ;;  %s3503_s27 = sld [smem:[#allocation3 + $0xc]]  ;;  %vm482_vm6 = vcmask 7168   ;;  %vm412_vm7 = vcmask 1031168  }
  0x14   :  { %36 = vst [vmem:[#allocation2 + $0x60] sm:$0xff] %v3655_v1  ;;  %37 = vst [vmem:[#allocation2 + $0x68] sm:$0xff] %v3655_v1  ;;  %s3658_s28 = smov 126   ;;  %s3501_s29 = sld [smem:[#allocation3 + $0xa]]  ;;  %vm677_vm8 = vcmask 1040384  }
  0x15   :  { %38 = vst [vmem:[#allocation2 + $0x70] sm:$0xff] %v3655_v1  ;;  %39 = vst [vmem:[#allocation2 + $0x78] sm:$0xff] %v3655_v1  ;;  %v141_v5 = vstv %s3678_s14  ;;  %s3492_s30 = sld [smem:[#allocation3 + $0x2]]  ;;  %s3496_s3 = sld [smem:[#allocation3 + $0x6]] }
  0x16   :  { %40 = vst [vmem:[#allocation2 + $0x80] sm:$0xff] %v3655_v1  ;;  %41 = vst [vmem:[#allocation2 + $0x88] sm:$0xff] %v3655_v1  ;;  %v160_v11 = vstv %s3493_s22  ;;  %s3659_s4 = smov 1   ;;  %s3505_s5 = sld [smem:[#allocation3 + $0xe]] }
  0x17   :  { %42 = vst [vmem:[#allocation2 + $0x90] sm:$0xff] %v3655_v1  ;;  %43 = vst [vmem:[#allocation2 + $0x98] sm:$0xff] %v3655_v1  ;;  %v3696_v6 = vld [vmem:[#allocation2 + $0x8] sm:$0x80]  ;;  %v161_v16 = vmul.f32 0.0, %v160_v11  ;;  %s3507_s6 = sld [smem:[#allocation3 + $0x10]] }
  0x18   :  { %44 = vst [vmem:[#allocation2 + $0xa0] sm:$0xff] %v3655_v1  ;;  %45 = vst [vmem:[#allocation2 + $0xa8] sm:$0xff] %v3655_v1  ;;  %v142_v7 = vmul.f32 %v141_v5, %v3696_v6  ;;  %v176_v31 = vstv %s3495_s24  ;;  %v198_v38 = vstv %s3497_s25  ;;  %s3502_s7 = sld [smem:[#allocation3 + $0xb]]  ;;  %s3506_s8 = sld [smem:[#allocation3 + $0xf]] }
  0x19   :  { %47 = vst [vmem:[#allocation2 + $0xb8] sm:$0xff] %v3655_v1  ;;  %54 = vst [vmem:[#allocation2 + $0xf0] sm:$0xff] %v3655_v1  ;;  %v255_v19 = vrot.slane %v161_v16, 1  ;;  %v178_v33 = vmul.f32 0.0, %v176_v31  ;;  %v3753_v42 = vld [vmem:[#allocation2 + $0x28] sm:$0xfe]  ;;  %v205_v44 = vstv %s3498_s26  ;;  %v761_v50 = vstv %s3503_s27 }
  0x1a   :  { %56 = vst [vmem:[#allocation2 + $0x100] sm:$0xff] %v3655_v1  ;;  %57 = vst [vmem:[#allocation2 + $0x108] sm:$0xff] %v3655_v1  ;;  %221 = vrot.lane.b32.xlu0 %v142_v7, %s3656_s0  ;;  %v207_v46 = vmul.f32 %v205_v44, %v3753_v42  ;;  %v209_v49 = vmul.f32 0.0, %v205_v44  ;;  %s3508_s9 = sld [smem:[#allocation3 + $0x11]]  ;;  %s3494_s10 = sld [smem:[#allocation3 + $0x4]] }
  0x1b   :  { %58 = vst [vmem:[#allocation2 + $0x110] sm:$0xff] %v3655_v1  ;;  %59 = vst [vmem:[#allocation2 + $0x118] sm:$0xff] %v3655_v1  ;;  %s3513_s11 = sld [smem:[#allocation3 + $0x17]]  ;;  %s3511_s12 = sld [smem:[#allocation3 + $0x15]] }
  0x1c   :  { %60 = vst [vmem:[#allocation2 + $0x120] sm:$0xff] %v3655_v1  ;;  %61 = vst [vmem:[#allocation2 + $0x128] sm:$0xff] %v3655_v1  ;;  %v543_v53 = vrot.slane %v207_v46, 2  ;;  %v546_v56 = vrot.slane %v209_v49, 2  ;;  %s3504_s13 = sld [smem:[#allocation3 + $0xd]]  ;;  %s3515_s14 = sld [smem:[#allocation3 + $0x19]] }
  0x1d   :  { %62 = vst [vmem:[#allocation2 + $0x130] sm:$0xff] %v3655_v1  ;;  %63 = vst [vmem:[#allocation2 + $0x138] sm:$0xff] %v3655_v1  ;;  %v3755_v43 = vld [vmem:[#allocation2 + $0x80] sm:$0x1]  ;;  %s3518_s15 = sld [smem:[#allocation3 + $0x1c]]  ;;  %s3517_s16 = sld [smem:[#allocation3 + $0x1b]] }
  0x1e   :  { %65 = vst [vmem:[#allocation2 + $0x148] sm:$0xff] %v3655_v1  ;;  %72 = vst [vmem:[#allocation2 + $0x180] sm:$0xff] %v3655_v1  ;;  %v203_v47 = vmul.f32 %v198_v38, %v3755_v43  ;;  %v547_v62 = vsel %vm541_vm3, %v543_v53, %v546_v56  ;;  %v214_v7 = vmul.f32 %v205_v44, %v3755_v43  ;;  %s3521_s1 = sld [smem:[#allocation3 + $0x1e]]  ;;  %s3525_s17 = sld [smem:[#allocation3 + $0x22]] }
  0x1f   :  { %74 = vst [vmem:[#allocation2 + $0x190] sm:$0xff] %v3655_v1  ;;  %75 = vst [vmem:[#allocation2 + $0x198] sm:$0xff] %v3655_v1  ;;  %s3523_s18 = sld [smem:[#allocation3 + $0x20]]  ;;  %s3528_s19 = sld [smem:[#allocation3 + $0x25]] }
  0x20   :  { %76 = vst [vmem:[#allocation2 + $0x1a0] sm:$0xff] %v3655_v1  ;;  %77 = vst [vmem:[#allocation2 + $0x1a8] sm:$0xff] %v3655_v1  ;;  %s3527_s20 = sld [smem:[#allocation3 + $0x24]]  ;;  %s3536_s21 = sld [smem:[#allocation3 + $0x27]] }
  0x21   :  { %84 = vst.msk [vmem:[#allocation2 + $0x38] sm:$0xff] %vm82_vm0, %v79_v0  ;;  %83 = vst.msk [vmem:[#allocation2 + $0x20] sm:$0xff] %vm82_vm0, %v78_v2  ;;  %v3785_v2 = vld [vmem:[#allocation2 + $0x88] sm:$0x1]  ;;  %s3538_s22 = sld [smem:[#allocation3 + $0x29]]  ;;  %s3540_s24 = sld [smem:[#allocation3 + $0x2b]] }
  0x22   :  { %85 = vst.msk [vmem:[#allocation2 + $0x50] sm:$0xff] %vm82_vm0, %v80_v3  ;;  %v215_v3 = vmul.f32 %v205_v44, %v3785_v2  ;;  %s3557_s25 = sld [smem:[#allocation3 + $0x36]]  ;;  %s3542_s26 = sld [smem:[#allocation3 + $0x2d]] }
  0x23   :  { %87 = vst.msk [vmem:[#allocation2 + $0x68] sm:$0xf] %vm86_vm1, %v81_v4  ;;  %s3555_s27 = sld [smem:[#allocation3 + $0x34]] }
  0x28   :  { %v3699_v8 = vld [vmem:[#allocation2 + $0x38] sm:$0xff]  ;;  %v3701_v9 = vld [vmem:[#allocation2 + $0x20] sm:$0xff] }
  0x29   :  { %v3703_v10 = vld [vmem:[#allocation2 + $0x50] sm:$0xff]  ;;  %v144_v12 = vmul.f32 %v141_v5, %v3699_v8  ;;  %v143_v13 = vmul.f32 %v141_v5, %v3701_v9  ;;  %v162_v18 = vmul.f32 %v160_v11, %v3701_v9  ;;  %v164_v20 = vmul.f32 %v160_v11, %v3699_v8  ;;  %v3744_v37 = vld [vmem:[#allocation2 + $0x20] sm:$0xfe] }
  0x2a   :  { %v145_v14 = vmul.f32 %v141_v5, %v3703_v10  ;;  %v3710_v15 = vld [vmem:[#allocation2 + $0x68] sm:$0x7f]  ;;  %v166_v23 = vmul.f32 %v160_v11, %v3703_v10  ;;  %v177_v32 = vmul.f32 %v176_v31, %v3701_v9  ;;  %v179_v34 = vmul.f32 %v176_v31, %v3699_v8 }
  0x2b   :  { %225 = vrot.lane.b32.xlu1 %v144_v12, %s3656_s0  ;;  %223 = vrot.lane.b32.xlu0 %v143_v13, %s3656_s0  ;;  %v146_v17 = vmul.f32 %v141_v5, %v3710_v15  ;;  %v256_v21 = vrot.slane %v162_v18, 1  ;;  %v259_v22 = vrot.slane %v164_v20, 1  ;;  %v3720_v24 = vld [vmem:[#allocation2 + $0x68] sm:$0xff]  ;;  %v181_v35 = vmul.f32 %v176_v31, %v3703_v10 }
  0x2c   :  { %v263_v26 = vrot.slane %v166_v23, 1  ;;  %v168_v27 = vmul.f32 %v160_v11, %v3720_v24  ;;  %v183_v36 = vmul.f32 %v176_v31, %v3720_v24  ;;  %v199_v39 = vmul.f32 %v198_v38, %v3744_v37 }
  0x2d   :  { %v260_v25 = vsel %vm254_vm2, %v256_v21, %v259_v22  ;;  %v200_v40 = vmul.f32 %v198_v38, %v3699_v8  ;;  %v201_v41 = vmul.f32 %v198_v38, %v3703_v10  ;;  %v202_v45 = vmul.f32 %v198_v38, %v3720_v24 }
  0x2e   :  { %v264_v28 = vsel %vm254_vm2, %v259_v22, %v263_v26  ;;  %v267_v29 = vrot.slane %v168_v27, 1  ;;  %v206_v48 = vmul.f32 %v205_v44, %v3744_v37  ;;  %v208_v51 = vmul.f32 %v205_v44, %v3699_v8 }
  0x2f   :  { %227 = vrot.lane.b32.xlu1 %v145_v14, %s3656_s0  ;;  %229 = vrot.lane.b32.xlu0 %v146_v17, %s3656_s0  ;;  %v3765_v52 = vmul.f32 %v761_v50, %v3703_v10  ;;  %v3769_v54 = vmul.f32 %v761_v50, %v3720_v24  ;;  %v210_v58 = vmul.f32 %v205_v44, %v3703_v10  ;;  %v558_v11 = vrot.slane %v215_v3, 2 }
  0x30   :  { %v268_v30 = vsel %vm254_vm2, %v263_v26, %v267_v29  ;;  %v542_v55 = vrot.slane %v206_v48, 2  ;;  %v544_v57 = vrot.slane %v208_v51, 2  ;;  %v212_v1 = vmul.f32 %v205_v44, %v3720_v24 }
  0x31   :  { %v863_v59 = vrot.slane %v3765_v52, 1  ;;  %v867_v60 = vrot.slane %v3769_v54, 1  ;;  %v548_v0 = vrot.slane %v210_v58, 2  ;;  %v556_v13 = vrot.slane %v214_v7, 2 }
  0x32   :  { %v545_v63 = vsel %vm541_vm3, %v542_v55, %v544_v57  ;;  %v552_v5 = vrot.slane %v212_v1, 2  ;;  %v559_v14 = vsel %vm541_vm3, %v546_v56, %v558_v11  ;;  %v742_v17 = vstv %s3501_s29  ;;  %s128_s29 = sld [smem:[#allocation3]] }
  0x33   :  { %269 = vrot.lane.b32.xlu1 %v255_v19, %s3657_s23  ;;  %271 = vrot.lane.b32.xlu0 %v256_v21, %s3657_s23  ;;  %v3779_v61 = vsel %vm254_vm2, %v863_v59, %v867_v60  ;;  %v549_v4 = vsel %vm541_vm3, %v544_v57, %v548_v0  ;;  %v744_v18 = vmul.f32 %v742_v17, %v3701_v9  ;;  %v762_v21 = vmul.f32 0.0, %v761_v50 }
  0x34   :  { %v553_v12 = vsel %vm541_vm3, %v548_v0, %v552_v5  ;;  %v557_v16 = vsel %vm541_vm3, %v552_v5, %v556_v13  ;;  %v746_v20 = vmul.f32 %v742_v17, %v3703_v10  ;;  %v745_v22 = vmul.f32 %v742_v17, %v3699_v8 }
  0x35   :  { %v3808_v23 = vrot.slane %v762_v21, 1  ;;  %v763_v26 = vmul.f32 %v761_v50, %v3701_v9  ;;  %v765_v27 = vmul.f32 %v761_v50, %v3699_v8  ;;  %v3838_v38 = vstv %s3492_s30  ;;  %s3500_s30 = sld [smem:[#allocation3 + $0x9]] }
  0x36   :  { %v149_v44 = vmul.f32 %v3838_v38, %v3696_v6 }
  0x37   :  { %273 = vrot.lane.b32.xlu1 %v255_v19, %s3657_s23  ;;  %275 = vrot.lane.b32.xlu0 %v260_v25, %s3657_s23  ;;  %v747_v25 = vmul.f32 %v742_v17, %v3710_v15 }
  0x3b   :  { %277 = vrot.lane.b32.xlu1 %v255_v19, %s3657_s23  ;;  %279 = vrot.lane.b32.xlu0 %v264_v28, %s3657_s23  ;;  %v856_v28 = vrot.slane %v763_v26, 1 }
  0x3f   :  { %281 = vrot.lane.b32.xlu1 %v255_v19, %s3657_s23  ;;  %283 = vrot.lane.b32.xlu0 %v268_v30, %s3657_s23 }
  0x43   :  { %285 = vrot.lane.b32.xlu1 %v255_v19, %s3657_s23  ;;  %287 = vrot.lane.b32.xlu0 %v267_v29, %s3657_s23  ;;  %v743_v19 = vmul.f32 %v742_v17, %v3696_v6  ;;  %v859_v29 = vrot.slane %v765_v27, 1  ;;  %v186_v17 = vstv %s3496_s3  ;;  %s3553_s3 = sld [smem:[#allocation3 + $0x32]] }
  0x44   :  { %v189_v27 = vmul.f32 0.0, %v186_v17 }
  0x45   :  { %v860_v30 = vsel %vm254_vm2, %v856_v28, %v859_v29  ;;  %v864_v31 = vsel %vm254_vm2, %v859_v29, %v863_v59  ;;  %v157_v59 = vmul.f32 %v3838_v38, %v3710_v15 }
  0x47   :  { %323 = vrot.lane.b32.xlu1 %v177_v32, %s3656_s0  ;;  %325 = vrot.lane.b32.xlu0 %v178_v33, %s3656_s0 }
  0x4b   :  { %327 = vrot.lane.b32.xlu1 %v179_v34, %s3656_s0  ;;  %329 = vrot.lane.b32.xlu0 %v178_v33, %s3656_s0 }
  0x4f   :  { %331 = vrot.lane.b32.xlu1 %v181_v35, %s3656_s0  ;;  %333 = vrot.lane.b32.xlu0 %v178_v33, %s3656_s0 }
  0x53   :  { %335 = vrot.lane.b32.xlu1 %v183_v36, %s3656_s0  ;;  %337 = vrot.lane.b32.xlu0 %v178_v33, %s3656_s0  ;;  %v3836_v36 = vld [vmem:[#allocation2 + $0x10] sm:$0x80] }
  0x57   :  { %357 = vrot.lane.b32.xlu1 %v199_v39, %s3656_s0  ;;  %359 = vrot.lane.b32.xlu0 %v200_v40, %s3656_s0 }
  0x5b   :  { %361 = vrot.lane.b32.xlu1 %v201_v41, %s3656_s0  ;;  %363 = vrot.lane.b32.xlu0 %v202_v45, %s3656_s0  ;;  %v150_v41 = vmul.f32 %v3838_v38, %v3836_v36 }
  0x5f   :  { %365 = vrot.lane.b32.xlu1 %v203_v47, %s3656_s0  ;;  %562 = vrot.lane.b32.xlu0 %v543_v53, %s3658_s28 }
  0x63   :  { %560 = vrot.lane.b32.xlu1 %v542_v55, %s3658_s28  ;;  %566 = vrot.lane.b32.xlu0 %v547_v62, %s3658_s28  ;;  %v3859_v55 = vld [vmem:[#allocation2 + $0x70] sm:$0x7f] }
  0x64   :  { %v158_v58 = vmul.f32 %v3838_v38, %v3859_v55 }
  0x67   :  { %564 = vrot.lane.b32.xlu1 %v545_v63, %s3658_s28  ;;  %570 = vrot.lane.b32.xlu0 %v546_v56, %s3658_s28  ;;  %v152_v63 = vmul.f32 0.0, %v3838_v38 }
  0x6b   :  { %568 = vrot.lane.b32.xlu1 %v549_v4, %s3658_s28  ;;  %574 = vrot.lane.b32.xlu0 %v546_v56, %s3658_s28 }
  0x6f   :  { %572 = vrot.lane.b32.xlu1 %v553_v12, %s3658_s28  ;;  %578 = vrot.lane.b32.xlu0 %v559_v14, %s3658_s28 }
  0x73   :  { %576 = vrot.lane.b32.xlu1 %v557_v16, %s3658_s28  ;;  %824 = vrot.lane.b32.xlu0 %v744_v18, %s3656_s0  ;;  %v3885_v16 = vld [vmem:[#allocation2 + $0x18] sm:$0xfe] }
  0x74   :  { %v187_v21 = vmul.f32 %v186_v17, %v3885_v16 }
  0x77   :  { %822 = vrot.lane.b32.xlu1 %v743_v19, %s3656_s0  ;;  %828 = vrot.lane.b32.xlu0 %v746_v20, %s3656_s0 }
  0x7b   :  { %826 = vrot.lane.b32.xlu1 %v745_v22, %s3656_s0  ;;  %869 = vrot.lane.b32.xlu0 %v3808_v23, %s3657_s23  ;;  %v188_v22 = vmul.f32 %v186_v17, %v3744_v37 }
  0x7f   :  { %830 = vrot.lane.b32.xlu1 %v747_v25, %s3656_s0  ;;  %873 = vrot.lane.b32.xlu0 %v3808_v23, %s3657_s23 }
  0x83   :  { %871 = vrot.lane.b32.xlu1 %v856_v28, %s3657_s23  ;;  %877 = vrot.lane.b32.xlu0 %v3808_v23, %s3657_s23  ;;  %v190_v28 = vmul.f32 %v186_v17, %v3699_v8 }
  0x87   :  { %875 = vrot.lane.b32.xlu1 %v860_v30, %s3657_s23  ;;  %881 = vrot.lane.b32.xlu0 %v3808_v23, %s3657_s23 }
  0x8b   :  { %879 = vrot.lane.b32.xlu1 %v864_v31, %s3657_s23  ;;  %v192_v31 = vmul.f32 %v186_v17, %v3703_v10 }
  0x8c   :  { %v3828_v32 = vpop.permute.xlu0 %221 }
  0x9d   :  { %v3830_v33 = vpop.permute.xlu1 %225  ;;  %v3832_v34 = vpop.permute.xlu0 %223 }
  0xa1   :  { %v3834_v35 = vpop.permute.xlu1 %227  ;;  %v3840_v39 = vpop.permute.xlu0 %229 }
  0xa5   :  { %v270_v40 = vpop.permute.xlu1 %269  ;;  %v272_v45 = vpop.permute.xlu0 %271 }
  0xa6   :  { %v290_v46 = vsel %vm289_vm4, %v270_v40, %v272_v45  ;;  %v306_v47 = vadd.f32 %v272_v45, %v150_v41  ;;  %v194_v41 = vmul.f32 %v186_v17, %v3720_v24 }
  0xa7   :  { %v305_v49 = vadd.f32 %v290_v46, %v149_v44 }
  0xa8   :  { %394 = vrot.lane.b32.xlu1 %v306_v47, %s3658_s28 }
  0xa9   :  { %v3847_v48 = vpop.permute.xlu1 %273  ;;  %392 = vrot.lane.b32.xlu0 %v305_v49, %s3658_s28  ;;  %v3851_v50 = vpop.permute.xlu0 %275 }
  0xaa   :  { %v308_v7 = vadd.f32 %v3851_v50, %v152_v63 }
  0xad   :  { %v3853_v51 = vpop.permute.xlu1 %277  ;;  %v3855_v52 = vpop.permute.xlu0 %279 }
  0xae   :  { %v310_v13 = vadd.f32 %v3855_v52, %v152_v63 }
  0xb1   :  { %v3857_v53 = vpop.permute.xlu1 %281  ;;  %v3861_v56 = vpop.permute.xlu0 %283 }
  0xb2   :  { %v312_v19 = vadd.f32 %v3861_v56, %v152_v63 }
  0xb5   :  { %v286_v57 = vpop.permute.xlu1 %285  ;;  %v288_v62 = vpop.permute.xlu0 %287 }
  0xb6   :  { %v294_v0 = vsel %vm289_vm4, %v286_v57, %v288_v62  ;;  %v314_v1 = vadd.f32 %v288_v62, %v158_v58  ;;  %v3900_v57 = vld [vmem:[#allocation2 + $0x78] sm:$0x1] }
  0xb7   :  { %v313_v4 = vadd.f32 %v294_v0, %v157_v59 }
  0xb8   :  { %410 = vrot.lane.b32.xlu1 %v314_v1, %s3658_s28 }
  0xb9   :  { %v3869_v3 = vpop.permute.xlu1 %323  ;;  %408 = vrot.lane.b32.xlu0 %v313_v4, %s3658_s28  ;;  %v3873_v5 = vpop.permute.xlu0 %325 }
  0xbc   :  { %398 = vrot.lane.b32.xlu1 %v308_v7, %s3658_s28  ;;  %v195_v7 = vmul.f32 %v186_v17, %v3900_v57 }
  0xbd   :  { %v3876_v11 = vpop.permute.xlu1 %327  ;;  %v3879_v12 = vpop.permute.xlu0 %329 }
  0xc0   :  { %402 = vrot.lane.b32.xlu1 %v310_v13, %s3658_s28  ;;  %v196_v13 = vmul.f32 %v186_v17, %v3755_v43 }
  0xc1   :  { %v3882_v14 = vpop.permute.xlu1 %331  ;;  %v3887_v18 = vpop.permute.xlu0 %333 }
  0xc4   :  { %406 = vrot.lane.b32.xlu1 %v312_v19, %s3658_s28 }
  0xc5   :  { %v3890_v20 = vpop.permute.xlu1 %335  ;;  %v3895_v25 = vpop.permute.xlu0 %337 }
  0xc9   :  { %v358_v26 = vpop.permute.xlu1 %357  ;;  %v360_v40 = vpop.permute.xlu0 %359 }
  0xca   :  { %v372_v29 = vadd.f32 %v358_v26, %v187_v21  ;;  %v373_v30 = vadd.f32 %v358_v26, %v188_v22  ;;  %v374_v46 = vadd.f32 %v360_v40, %v189_v27  ;;  %v375_v47 = vadd.f32 %v360_v40, %v190_v28 }
  0xcc   :  { %v448_v44 = vrot.slane %v372_v29, 1  ;;  %v451_v45 = vrot.slane %v373_v30, 1  ;;  %v449_v62 = vrot.slane %v374_v46, 1  ;;  %v452_v63 = vrot.slane %v375_v47, 1 }
  0xcd   :  { %v362_v49 = vpop.permute.xlu1 %361  ;;  %v364_v4 = vpop.permute.xlu0 %363 }
  0xce   :  { %v376_v58 = vadd.f32 %v362_v49, %v189_v27  ;;  %v377_v59 = vadd.f32 %v362_v49, %v192_v31  ;;  %v378_v19 = vadd.f32 %v364_v4, %v189_v27  ;;  %v379_v21 = vadd.f32 %v364_v4, %v194_v41 }
  0xcf   :  { %v453_v22 = vsel %vm254_vm2, %v451_v45, %v452_v63  ;;  %v450_v26 = vsel %vm254_vm2, %v448_v44, %v449_v62  ;;  %v291_v4 = vsel %vm289_vm4, %v3847_v48, %v3851_v50  ;;  %v292_v48 = vsel %vm289_vm4, %v3853_v51, %v3855_v52 }
  0xd0   :  { %v454_v0 = vrot.slane %v376_v58, 1  ;;  %v456_v1 = vrot.slane %v377_v59, 1  ;;  %468 = vrot.lane.b32.xlu1 %v453_v22, %s3659_s4  ;;  %466 = vrot.lane.b32.xlu0 %v450_v26, %s3659_s4  ;;  %v458_v40 = vrot.slane %v378_v19, 1  ;;  %v460_v46 = vrot.slane %v379_v21, 1 }
  0xd1   :  { %v366_v28 = vpop.permute.xlu1 %365  ;;  %v3908_v31 = vpop.permute.xlu0 %562  ;;  %v153_v19 = vmul.f32 %v3838_v38, %v3699_v8  ;;  %v777_v22 = vstv %s3505_s5  ;;  %s4393_s5 = sld [smem:[#allocation3 + $0x12]] }
  0xd2   :  { %v380_v29 = vadd.f32 %v366_v28, %v195_v7  ;;  %v381_v30 = vadd.f32 %v366_v28, %v196_v13  ;;  %6847 = vst [vmem:[#allocation6_spill] sm:$0xff] %v3908_v31  ;;  %v457_v17 = vsel %vm254_vm2, %v452_v63, %v456_v1  ;;  %v455_v27 = vsel %vm254_vm2, %v449_v62, %v454_v0 }
  0xd3   :  { %v461_v49 = vsel %vm254_vm2, %v456_v1, %v460_v46  ;;  %v459_v58 = vsel %vm254_vm2, %v454_v0, %v458_v40  ;;  %v151_v62 = vmul.f32 %v3838_v38, %v3701_v9  ;;  %v309_v26 = vadd.f32 %v292_v48, %v153_v19 }
  0xd4   :  { %472 = vrot.lane.b32.xlu1 %v457_v17, %s3659_s4  ;;  %470 = vrot.lane.b32.xlu0 %v455_v27, %s3659_s4  ;;  %v462_v45 = vrot.slane %v380_v29, 1  ;;  %v464_v47 = vrot.slane %v381_v30, 1  ;;  %v155_v28 = vmul.f32 %v3838_v38, %v3703_v10  ;;  %v293_v30 = vsel %vm289_vm4, %v3857_v53, %v3861_v56 }
  0xd5   :  { %v3912_v41 = vpop.permute.xlu1 %560  ;;  %v3916_v44 = vpop.permute.xlu0 %566  ;;  %v307_v13 = vadd.f32 %v291_v4, %v151_v62  ;;  %v778_v54 = vmul.f32 %v777_v22, %v3701_v9  ;;  %v780_v56 = vmul.f32 %v777_v22, %v3699_v8  ;;  %v799_v17 = vstv %s3507_s6  ;;  %s4481_s6 = sld [smem:[#allocation3 + $0x13]] }
  0xd6   :  { %6848 = vst [vmem:[#allocation7_spill] sm:$0xff] %v3912_v41  ;;  %6849 = vst [vmem:[#allocation8_spill] sm:$0xff] %v3916_v44  ;;  %v465_v1 = vsel %vm254_vm2, %v460_v46, %v464_v47  ;;  %v463_v0 = vsel %vm254_vm2, %v458_v40, %v462_v45  ;;  %v311_v51 = vadd.f32 %v293_v30, %v155_v28 }
  0xd7   :  { %v782_v47 = vmul.f32 %v777_v22, %v3703_v10  ;;  %v784_v62 = vmul.f32 %v777_v22, %v3720_v24  ;;  %v800_v48 = vmul.f32 %v799_v17, %v3744_v37 }
  0xd8   :  { %476 = vrot.lane.b32.xlu1 %v461_v49, %s3659_s4  ;;  %474 = vrot.lane.b32.xlu0 %v459_v58, %s3659_s4  ;;  %v3985_v49 = vstv %s3502_s7  ;;  %v803_v58 = vmul.f32 %v799_v17, %v3720_v24  ;;  %s3543_s7 = sld [smem:[#allocation3 + $0x2e]] }
  0xd9   :  { %v3920_v59 = vpop.permute.xlu1 %564  ;;  %v3926_v63 = vpop.permute.xlu0 %570  ;;  %v750_v4 = vmul.f32 %v3985_v49, %v3696_v6 }
  0xda   :  { %6850 = vst [vmem:[#allocation9_spill] sm:$0xff] %v3920_v59  ;;  %6851 = vst [vmem:[#allocation10_spill] sm:$0xff] %v3926_v63 }
  0xdc   :  { %480 = vrot.lane.b32.xlu1 %v465_v1, %s3659_s4  ;;  %478 = vrot.lane.b32.xlu0 %v463_v0, %s3659_s4 }
  0xdd   :  { %v3933_v7 = vpop.permute.xlu1 %568  ;;  %v3939_v21 = vpop.permute.xlu0 %574 }
  0xde   :  { %6852 = vst [vmem:[#allocation11_spill] sm:$0xff] %v3933_v7  ;;  %6853 = vst [vmem:[#allocation12_spill] sm:$0xff] %v3939_v21 }
  0xe0   :  { %883 = vrot.lane.b32.xlu1 %v3779_v61, %s3657_s23  ;;  %396 = vrot.lane.b32.xlu0 %v307_v13, %s3658_s28  ;;  %v779_v61 = vmul.f32 0.0, %v777_v22 }
  0xe1   :  { %v3944_v50 = vpop.permute.xlu1 %572  ;;  %v3951_v29 = vpop.permute.xlu0 %578 }
  0xe2   :  { %6854 = vst [vmem:[#allocation13_spill] sm:$0xff] %v3944_v50  ;;  %6855 = vst [vmem:[#allocation14_spill] sm:$0xff] %v3951_v29 }
  0xe4   :  { %887 = vrot.lane.b32.xlu1 %v867_v60, %s3657_s23  ;;  %400 = vrot.lane.b32.xlu0 %v309_v26, %s3658_s28  ;;  %v752_v26 = vmul.f32 %v3985_v49, %v3701_v9 }
  0xe5   :  { %v3956_v40 = vpop.permute.xlu1 %576  ;;  %v3962_v52 = vpop.permute.xlu0 %824 }
  0xe6   :  { %6856 = vst [vmem:[#allocation15_spill] sm:$0xff] %v3956_v40  ;;  %6857 = vst [vmem:[#allocation16_spill] sm:$0xff] %v3962_v52 }
  0xe8   :  { %924 = vrot.lane.b32.xlu1 %v779_v61, %s3656_s0  ;;  %404 = vrot.lane.b32.xlu0 %v311_v51, %s3658_s28  ;;  %v754_v51 = vmul.f32 %v3985_v49, %v3699_v8 }
  0xe9   :  { %v3964_v46 = vpop.permute.xlu1 %822  ;;  %v3974_v60 = vpop.permute.xlu0 %828 }
  0xea   :  { %6858 = vst [vmem:[#allocation17_spill] sm:$0xff] %v3964_v46  ;;  %6860 = vst [vmem:[#allocation19_spill] sm:$0xff] %v3974_v60 }
  0xec   :  { %928 = vrot.lane.b32.xlu1 %v779_v61, %s3656_s0  ;;  %885 = vrot.lane.b32.xlu0 %v3808_v23, %s3657_s23  ;;  %v801_v23 = vmul.f32 %v799_v17, %v3699_v8 }
  0xed   :  { %v3968_v38 = vpop.permute.xlu1 %826  ;;  %v870_v27 = vpop.permute.xlu0 %869 }
  0xee   :  { %6859 = vst [vmem:[#allocation18_spill] sm:$0xff] %v3968_v38 }
  0xf0   :  { %932 = vrot.lane.b32.xlu1 %v779_v61, %s3656_s0  ;;  %922 = vrot.lane.b32.xlu0 %v778_v54, %s3656_s0 }
  0xf1   :  { %v3976_v53 = vpop.permute.xlu1 %830  ;;  %v874_v0 = vpop.permute.xlu0 %873 }
  0xf2   :  { %6861 = vst [vmem:[#allocation20_spill] sm:$0xff] %v3976_v53 }
  0xf4   :  { %936 = vrot.lane.b32.xlu1 %v779_v61, %s3656_s0  ;;  %926 = vrot.lane.b32.xlu0 %v780_v56, %s3656_s0  ;;  %v802_v61 = vmul.f32 %v799_v17, %v3703_v10  ;;  %v751_v56 = vmul.f32 %v3985_v49, %v3836_v36 }
  0xf5   :  { %v872_v45 = vpop.permute.xlu1 %871  ;;  %v878_v30 = vpop.permute.xlu0 %877 }
  0xf6   :  { %v889_v13 = vsel %vm289_vm4, %v870_v27, %v872_v45 }
  0xf7   :  { %v904_v19 = vadd.f32 %v889_v13, %v750_v4 }
  0xf8   :  { %957 = vrot.lane.b32.xlu1 %v801_v23, %s3656_s0  ;;  %930 = vrot.lane.b32.xlu0 %v782_v47, %s3656_s0  ;;  %v804_v23 = vmul.f32 %v799_v17, %v3755_v43  ;;  %v905_v47 = vadd.f32 %v872_v45, %v751_v56  ;;  %v756_v56 = vmul.f32 %v3985_v49, %v3703_v10 }
  0xf9   :  { %v876_v1 = vpop.permute.xlu1 %875  ;;  %v882_v45 = vpop.permute.xlu0 %881 }
  0xfa   :  { %v890_v28 = vsel %vm289_vm4, %v874_v0, %v876_v1 }
  0xfb   :  { %v906_v6 = vadd.f32 %v890_v28, %v752_v26 }
  0xfc   :  { %961 = vrot.lane.b32.xlu1 %v803_v58, %s3656_s0  ;;  %934 = vrot.lane.b32.xlu0 %v784_v62, %s3656_s0  ;;  %v753_v58 = vmul.f32 0.0, %v3985_v49 }
  0xfd   :  { %v880_v22 = vpop.permute.xlu1 %879 }
  0xfe   :  { %v891_v54 = vsel %vm289_vm4, %v878_v30, %v880_v22  ;;  %v907_v62 = vadd.f32 %v876_v1, %v753_v58  ;;  %v909_v4 = vadd.f32 %v880_v22, %v753_v58 }
  0xff   :  { %v908_v27 = vadd.f32 %v891_v54, %v754_v51 }
 0x100   :  { %955 = vrot.lane.b32.xlu0 %v800_v48, %s3656_s0  ;;  %990 = vrot.lane.b32.xlu1 %v904_v19, %s3658_s28 }
 0x104   :  { %959 = vrot.lane.b32.xlu0 %v802_v61, %s3656_s0  ;;  %994 = vrot.lane.b32.xlu1 %v906_v6, %s3658_s28 }
 0x108   :  { %963 = vrot.lane.b32.xlu0 %v804_v23, %s3656_s0  ;;  %998 = vrot.lane.b32.xlu1 %v908_v27, %s3658_s28 }
 0x10c   :  { %992 = vrot.lane.b32.xlu0 %v905_v47, %s3658_s28 }
 0x110   :  { %996 = vrot.lane.b32.xlu0 %v907_v62, %s3658_s28 }
 0x114   :  { %1000 = vrot.lane.b32.xlu0 %v909_v4, %s3658_s28  ;;  %v759_v4 = vmul.f32 %v3985_v49, %v3859_v55 }
 0x11a   :  { %v4017_v36 = vpop.permute.xlu1 %394 }
 0x11b   :  { %v4025_v19 = vpop.permute.xlu0 %392 }
 0x12a   :  { %v4019_v0 = vpop.permute.xlu1 %410 }
 0x12b   :  { %6862 = vst [vmem:[#allocation21_spill] sm:$0xff] %v4019_v0  ;;  %v4027_v48 = vpop.permute.xlu0 %408 }
 0x12c   :  { %6865 = vst [vmem:[#allocation24_spill] sm:$0xff] %v4027_v48 }
 0x12e   :  { %v4021_v17 = vpop.permute.xlu1 %398 }
 0x12f   :  { %6863 = vst [vmem:[#allocation22_spill] sm:$0xff] %v4021_v17 }
 0x132   :  { %v4023_v13 = vpop.permute.xlu1 %402 }
 0x133   :  { %6864 = vst [vmem:[#allocation23_spill] sm:$0xff] %v4023_v13 }
 0x136   :  { %v4029_v1 = vpop.permute.xlu1 %406 }
 0x137   :  { %6866 = vst [vmem:[#allocation25_spill] sm:$0xff] %v4029_v1 }
 0x142   :  { %v4031_v26 = vpop.permute.xlu1 %468  ;;  %v4033_v28 = vpop.permute.xlu0 %466 }
 0x146   :  { %v4035_v22 = vpop.permute.xlu1 %472  ;;  %v4037_v30 = vpop.permute.xlu0 %470 }
 0x14a   :  { %v4039_v6 = vpop.permute.xlu1 %476  ;;  %v4041_v61 = vpop.permute.xlu0 %474 }
 0x14e   :  { %v4043_v51 = vpop.permute.xlu1 %480  ;;  %v4045_v54 = vpop.permute.xlu0 %478 }
 0x152   :  { %v884_v27 = vpop.permute.xlu1 %883  ;;  %v4049_v23 = vpop.permute.xlu0 %396 }
 0x153   :  { %6867 = vst [vmem:[#allocation26_spill] sm:$0xff] %v4049_v23  ;;  %v892_v47 = vsel %vm289_vm4, %v882_v45, %v884_v27  ;;  %v911_v62 = vadd.f32 %v884_v27, %v753_v58  ;;  %v758_v58 = vmul.f32 %v3985_v49, %v3710_v15 }
 0x154   :  { %v910_v1 = vadd.f32 %v892_v47, %v756_v56 }
 0x155   :  { %1004 = vrot.lane.b32.xlu0 %v911_v62, %s3658_s28 }
 0x156   :  { %v888_v17 = vpop.permute.xlu1 %887  ;;  %1002 = vrot.lane.b32.xlu1 %v910_v1, %s3658_s28  ;;  %v4056_v53 = vpop.permute.xlu0 %400 }
 0x157   :  { %6868 = vst [vmem:[#allocation27_spill] sm:$0xff] %v4056_v53  ;;  %v913_v48 = vadd.f32 %v888_v17, %v759_v4  ;;  %v787_v4 = vstv %s3506_s8  ;;  %s3558_s8 = sld [smem:[#allocation3 + $0x37]] }
 0x158   :  { %v791_v15 = vmul.f32 %v787_v4, %v3699_v8  ;;  %v790_v49 = vmul.f32 0.0, %v787_v4  ;;  %v795_v53 = vmul.f32 %v787_v4, %v3720_v24  ;;  %v793_v40 = vmul.f32 %v787_v4, %v3703_v10 }
 0x159   :  { %1008 = vrot.lane.b32.xlu0 %v913_v48, %s3658_s28 }
 0x15a   :  { %v4059_v0 = vpop.permute.xlu1 %924  ;;  %v4061_v23 = vpop.permute.xlu0 %404 }
 0x15b   :  { %6869 = vst [vmem:[#allocation28_spill] sm:$0xff] %v4061_v23 }
 0x15e   :  { %v4065_v45 = vpop.permute.xlu1 %928  ;;  %v886_v55 = vpop.permute.xlu0 %885 }
 0x15f   :  { %v893_v56 = vsel %vm289_vm4, %v886_v55, %v888_v17  ;;  %v788_v55 = vmul.f32 %v787_v4, %v3885_v16 }
 0x160   :  { %v912_v27 = vadd.f32 %v893_v56, %v758_v58  ;;  %v789_v56 = vmul.f32 %v787_v4, %v3744_v37 }
 0x162   :  { %v4068_v1 = vpop.permute.xlu1 %932  ;;  %1006 = vrot.lane.b32.xlu1 %v912_v27, %s3658_s28  ;;  %v4071_v47 = vpop.permute.xlu0 %922 }
 0x166   :  { %v4073_v48 = vpop.permute.xlu0 %926  ;;  %v4075_v62 = vpop.permute.xlu1 %936 }
 0x16a   :  { %v4077_v23 = vpop.permute.xlu0 %930  ;;  %v958_v38 = vpop.permute.xlu1 %957 }
 0x16b   :  { %v973_v58 = vadd.f32 %v958_v38, %v791_v15  ;;  %v972_v27 = vadd.f32 %v958_v38, %v790_v49  ;;  %v797_v15 = vmul.f32 %v787_v4, %v3755_v43 }
 0x16d   :  { %v1049_v60 = vrot.slane %v973_v58, 1  ;;  %v1046_v29 = vrot.slane %v972_v27, 1  ;;  %v796_v58 = vmul.f32 %v787_v4, %v3900_v57 }
 0x16e   :  { %v4080_v17 = vpop.permute.xlu0 %934  ;;  %v962_v7 = vpop.permute.xlu1 %961 }
 0x16f   :  { %v977_v16 = vadd.f32 %v962_v7, %v795_v53  ;;  %v976_v31 = vadd.f32 %v962_v7, %v790_v49 }
 0x171   :  { %v1055_v41 = vrot.slane %v976_v31, 1 }
 0x172   :  { %v956_v13 = vpop.permute.xlu0 %955 }
 0x173   :  { %v970_v46 = vadd.f32 %v956_v13, %v788_v55  ;;  %v971_v52 = vadd.f32 %v956_v13, %v789_v56 }
 0x175   :  { %v1045_v50 = vrot.slane %v970_v46, 1  ;;  %v1048_v21 = vrot.slane %v971_v52, 1  ;;  %v1057_v46 = vrot.slane %v977_v16, 1 }
 0x176   :  { %v960_v63 = vpop.permute.xlu0 %959 }
 0x177   :  { %v974_v59 = vadd.f32 %v960_v63, %v790_v49  ;;  %v975_v44 = vadd.f32 %v960_v63, %v793_v40  ;;  %v1050_v38 = vsel %vm254_vm2, %v1048_v21, %v1049_v60  ;;  %v1047_v13 = vsel %vm254_vm2, %v1045_v50, %v1046_v29 }
 0x178   :  { %1065 = vrot.lane.b32.xlu0 %v1050_v38, %s3659_s4  ;;  %1063 = vrot.lane.b32.xlu1 %v1047_v13, %s3659_s4  ;;  %v806_v21 = vstv %s3508_s9  ;;  %s3516_s9 = sld [smem:[#allocation3 + $0x1a]] }
 0x179   :  { %v1051_v55 = vrot.slane %v974_v59, 1  ;;  %v1053_v56 = vrot.slane %v975_v44, 1  ;;  %v807_v40 = vmul.f32 %v806_v21, %v3744_v37  ;;  %v808_v31 = vmul.f32 %v806_v21, %v3753_v42 }
 0x17a   :  { %v964_v52 = vpop.permute.xlu0 %963  ;;  %v811_v37 = vmul.f32 %v806_v21, %v3703_v10 }
 0x17b   :  { %v979_v27 = vadd.f32 %v964_v52, %v797_v15  ;;  %v1054_v53 = vsel %vm254_vm2, %v1049_v60, %v1053_v56  ;;  %v978_v63 = vadd.f32 %v964_v52, %v796_v58  ;;  %v1052_v7 = vsel %vm254_vm2, %v1046_v29, %v1051_v55 }
 0x17c   :  { %1069 = vrot.lane.b32.xlu0 %v1054_v53, %s3659_s4  ;;  %1067 = vrot.lane.b32.xlu1 %v1052_v7, %s3659_s4  ;;  %v1058_v57 = vsel %vm254_vm2, %v1053_v56, %v1057_v46  ;;  %v1056_v59 = vsel %vm254_vm2, %v1051_v55, %v1055_v41  ;;  %v809_v60 = vmul.f32 %v806_v21, %v3699_v8  ;;  %v810_v29 = vmul.f32 0.0, %v806_v21 }
 0x17d   :  { %v1061_v50 = vrot.slane %v979_v27, 1  ;;  %v1059_v44 = vrot.slane %v978_v63, 1  ;;  %v1137_v15 = vrot.slane %v807_v40, 2  ;;  %v1138_v16 = vrot.slane %v808_v31, 2  ;;  %v4134_v40 = vld [vmem:[#allocation2 + $0x8] sm:$0xff] }
 0x17e   :  { %v1139_v38 = vrot.slane %v809_v60, 2  ;;  %v1141_v13 = vrot.slane %v810_v29, 2  ;;  %v1143_v58 = vrot.slane %v811_v37, 2  ;;  %v813_v55 = vmul.f32 %v806_v21, %v3720_v24  ;;  %v4198_v37 = vpop.permute.xlu0 %992 }
 0x17f   :  { %v1062_v4 = vsel %vm254_vm2, %v1057_v46, %v1061_v50  ;;  %v1060_v49 = vsel %vm254_vm2, %v1055_v41, %v1059_v44  ;;  %v815_v46 = vmul.f32 %v806_v21, %v3755_v43  ;;  %v816_v27 = vmul.f32 %v806_v21, %v3785_v2  ;;  %v4129_v21 = vld [vmem:[#allocation2 + $0x98] sm:$0x80] }
 0x180   :  { %1073 = vrot.lane.b32.xlu0 %v1058_v57, %s3659_s4  ;;  %1071 = vrot.lane.b32.xlu1 %v1056_v59, %s3659_s4  ;;  %v1140_v42 = vsel %vm541_vm3, %v1137_v15, %v1139_v38  ;;  %v1142_v41 = vsel %vm541_vm3, %v1138_v16, %v1141_v13  ;;  %v1144_v56 = vsel %vm541_vm3, %v1139_v38, %v1143_v58  ;;  %v1147_v52 = vrot.slane %v813_v55, 2 }
 0x181   :  { %v170_v53 = vstv %s3494_s10  ;;  %v1151_v7 = vrot.slane %v815_v46, 2  ;;  %v1153_v50 = vrot.slane %v816_v27, 2  ;;  %v4121_v57 = vstv %s3513_s11  ;;  %s3526_s10 = sld [smem:[#allocation3 + $0x23]]  ;;  %s3541_s11 = sld [smem:[#allocation3 + $0x2c]] }
 0x182   :  { %v1148_v63 = vsel %vm541_vm3, %v1143_v58, %v1147_v52  ;;  %6870 = vst [vmem:[#allocation29_spill] sm:$0xff] %v4121_v57  ;;  %v171_v44 = vmul.f32 %v170_v53, %v3701_v9  ;;  %v340_v43 = vsel %vm339_vm5, %v3869_v3, %v3873_v5  ;;  %v4131_v59 = vstv %s3511_s12  ;;  %s3556_s12 = sld [smem:[#allocation3 + $0x35]] }
 0x183   :  { %v1152_v2 = vsel %vm541_vm3, %v1147_v52, %v1151_v7  ;;  %6871 = vst [vmem:[#allocation30_spill] sm:$0xff] %v4131_v59  ;;  %v1380_v9 = vmul.f32 %v4134_v40, %v4121_v57  ;;  %v1154_v31 = vsel %vm541_vm3, %v1141_v13, %v1153_v50  ;;  %v483_v60 = vsel %vm482_vm6, %v4033_v28, %v4031_v26  ;;  %v6907_v57 = vld [vmem:[#allocation19_spill] sm:$0xff] }
 0x184   :  { %1077 = vrot.lane.b32.xlu0 %v1062_v4, %s3659_s4  ;;  %1075 = vrot.lane.b32.xlu1 %v1060_v49, %s3659_s4  ;;  %v348_v3 = vadd.f32 %v340_v43, %v171_v44  ;;  %v174_v5 = vmul.f32 %v170_v53, %v3720_v24  ;;  %v1361_v29 = vmul.f32 %v4131_v59, %v4129_v21  ;;  %v771_v46 = vstv %s3504_s13  ;;  %v6908_v59 = vld [vmem:[#allocation23_spill] sm:$0xff]  ;;  %s3512_s13 = sld [smem:[#allocation3 + $0x16]] }
 0x185   :  { %v173_v4 = vmul.f32 %v170_v53, %v3703_v10  ;;  %v343_v49 = vsel %vm339_vm5, %v3890_v20, %v3895_v25  ;;  %v342_v26 = vsel %vm339_vm5, %v3882_v14, %v3887_v18  ;;  %v486_v10 = vsel %vm482_vm6, %v4045_v54, %v4043_v51 }
 0x186   :  { %v4156_v28 = vadd.f32 %v483_v60, %v348_v3  ;;  %v341_v20 = vsel %vm339_vm5, %v3876_v11, %v3879_v12  ;;  %v351_v25 = vadd.f32 %v343_v49, %v174_v5  ;;  %v485_v38 = vsel %vm482_vm6, %v4041_v61, %v4039_v6 }
 0x187   :  { %v350_v14 = vadd.f32 %v342_v26, %v173_v4  ;;  %v484_v18 = vsel %vm482_vm6, %v4037_v30, %v4035_v22  ;;  %v938_v50 = vsel %vm339_vm5, %v4071_v47, %v4059_v0  ;;  %v939_v60 = vsel %vm339_vm5, %v4073_v48, %v4065_v45  ;;  %v4239_v48 = vld [vmem:[#allocation2 + $0x50] sm:$0xff] }
 0x188   :  { %1155 = vrot.lane.b32.xlu0 %v1137_v15, %s3658_s28  ;;  %1157 = vrot.lane.b32.xlu1 %v1138_v16, %s3658_s28  ;;  %v4151_v15 = vrot.slane %v1380_v9, 1  ;;  %v172_v16 = vmul.f32 %v170_v53, %v3699_v8  ;;  %v499_v8 = vrot.slane %v4156_v28, 1  ;;  %v4175_v51 = vadd.f32 %v486_v10, %v351_v25  ;;  %v4216_v53 = vld [vmem:[#allocation2 + $0x20] sm:$0xff] }
 0x189   :  { %v4177_v12 = vadd.f32 %v485_v38, %v350_v14  ;;  %v775_v10 = vmul.f32 %v771_v46, %v3720_v24  ;;  %v4234_v38 = vstv %s3515_s14  ;;  %v941_v45 = vsel %vm339_vm5, %v4080_v17, %v4075_v62  ;;  %s3537_s14 = sld [smem:[#allocation3 + $0x28]] }
 0x18a   :  { %v349_v11 = vadd.f32 %v341_v20, %v172_v16  ;;  %v504_v61 = vrot.slane %v4175_v51, 1  ;;  %6872 = vst [vmem:[#allocation31_spill] sm:$0xff] %v4234_v38  ;;  %v774_v14 = vmul.f32 %v4239_v48, %v771_v46 }
 0x18b   :  { %v502_v54 = vrot.slane %v4177_v12, 1 }
 0x18c   :  { %1159 = vrot.lane.b32.xlu0 %v1140_v42, %s3658_s28  ;;  %1161 = vrot.lane.b32.xlu1 %v1142_v41, %s3658_s28  ;;  %v4182_v6 = vadd.f32 %v484_v18, %v349_v11  ;;  %v4202_v42 = vpop.permute.xlu0 %996  ;;  %v940_v11 = vsel %vm339_vm5, %v4077_v23, %v4068_v1 }
 0x18e   :  { %v500_v22 = vrot.slane %v4182_v6, 1  ;;  %v1397_v6 = vmul.f32 %v4134_v40, %v4234_v38 }
 0x190   :  { %1163 = vrot.lane.b32.xlu0 %v1144_v56, %s3658_s28  ;;  %1165 = vrot.lane.b32.xlu1 %v1141_v13, %s3658_s28  ;;  %v503_v30 = vsel %vm254_vm2, %v500_v22, %v502_v54  ;;  %v4206_v55 = vpop.permute.xlu0 %1000  ;;  %v501_v1 = vsel %vm254_vm2, %v499_v8, %v500_v22 }
 0x194   :  { %1167 = vrot.lane.b32.xlu0 %v1148_v63, %s3658_s28  ;;  %1169 = vrot.lane.b32.xlu1 %v1141_v13, %s3658_s28  ;;  %v4200_v13 = vpop.permute.xlu1 %990  ;;  %v772_v63 = vmul.f32 %v4216_v53, %v771_v46 }
 0x196   :  { %v946_v43 = vadd.f32 %v938_v50, %v772_v63  ;;  %v948_v50 = vadd.f32 %v940_v11, %v774_v14 }
 0x198   :  { %1171 = vrot.lane.b32.xlu0 %v1152_v2, %s3658_s28  ;;  %1173 = vrot.lane.b32.xlu1 %v1154_v31, %s3658_s28  ;;  %v4204_v58 = vpop.permute.xlu1 %994  ;;  %v4224_v2 = vld [vmem:[#allocation2 + $0x38] sm:$0xff] }
 0x199   :  { %v773_v9 = vmul.f32 %v4224_v2, %v771_v46 }
 0x19b   :  { %v947_v4 = vadd.f32 %v939_v60, %v773_v9  ;;  %v505_v60 = vsel %vm254_vm2, %v502_v54, %v504_v61  ;;  %v4277_v54 = vstv %s3517_s16  ;;  %s3552_s16 = sld [smem:[#allocation3 + $0x31]] }
 0x19c   :  { %1440 = vrot.lane.b32.xlu0 %v1361_v29, %s3656_s0  ;;  %1487 = vrot.lane.b32.xlu1 %v4151_v15, %s3657_s23  ;;  %v4208_v41 = vpop.permute.xlu1 %998  ;;  %6874 = vst [vmem:[#allocation33_spill] sm:$0xff] %v4277_v54 }
 0x1a0   :  { %506 = vrot.lane.b32.xlu0 %v499_v8, %s3656_s0  ;;  %1491 = vrot.lane.b32.xlu1 %v4151_v15, %s3657_s23 }
 0x1a4   :  { %514 = vrot.lane.b32.xlu0 %v504_v61, %s3656_s0  ;;  %1495 = vrot.lane.b32.xlu1 %v4151_v15, %s3657_s23  ;;  %v1344_v61 = vld [vmem:[#allocation2 + $0x110] sm:$0x1] }
 0x1a8   :  { %510 = vrot.lane.b32.xlu0 %v503_v30, %s3656_s0  ;;  %v949_v30 = vadd.f32 %v941_v45, %v775_v10  ;;  %v4306_v45 = vstv %s3528_s19  ;;  %s3554_s19 = sld [smem:[#allocation3 + $0x33]] }
 0x1a9   :  { %6878 = vst [vmem:[#allocation37_spill] sm:$0xff] %v4306_v45 }
 0x1c7   :  { %v4210_v56 = vpop.permute.xlu0 %1004 }
 0x1c8   :  { %v4212_v52 = vpop.permute.xlu1 %1002 }
 0x1cb   :  { %v4214_v27 = vpop.permute.xlu0 %1008 }
 0x1d4   :  { %v4219_v7 = vpop.permute.xlu1 %1006 }
 0x1ea   :  { %v1066_v44 = vpop.permute.xlu0 %1065  ;;  %v1064_v31 = vpop.permute.xlu1 %1063 }
 0x1eb   :  { %v1079_v3 = vsel %vm482_vm6, %v1064_v31, %v1066_v44  ;;  %v4260_v31 = vstv %s3518_s15  ;;  %s3551_s15 = sld [smem:[#allocation3 + $0x30]] }
 0x1ec   :  { %v1087_v5 = vadd.f32 %v1079_v3, %v946_v43  ;;  %6873 = vst [vmem:[#allocation32_spill] sm:$0xff] %v4260_v31  ;;  %v1345_v3 = vld [vmem:[#allocation2 + $0xb8] sm:$0xfe]  ;;  %v1428_v8 = vmul.f32 %v4134_v40, %v4260_v31 }
 0x1ed   :  { %v1426_v28 = vmul.f32 %v4260_v31, %v1345_v3  ;;  %v1954_v14 = vmul.f32 %v4306_v45, %v1345_v3 }
 0x1ee   :  { %v1070_v29 = vpop.permute.xlu0 %1069  ;;  %v1095_v49 = vrot.slane %v1087_v5, 1  ;;  %v1068_v26 = vpop.permute.xlu1 %1067  ;;  %v1759_v12 = vrot.slane %v1428_v8, 2  ;;  %v4345_v8 = vstv %s3557_s25  ;;  %s6367_s25 = sld [smem:[#allocation3 + $0x3a]] }
 0x1ef   :  { %v1080_v0 = vsel %vm482_vm6, %v1068_v26, %v1070_v29  ;;  %v1756_v51 = vrot.slane %v1426_v28, 2  ;;  %v1422_v29 = vmul.f32 %v4277_v54, %v1344_v61  ;;  %v2284_v11 = vrot.slane %v1954_v14, 2  ;;  %6883 = vst [vmem:[#allocation42_spill] sm:$0xff] %v4345_v8 }
 0x1f0   :  { %v1088_v47 = vadd.f32 %v1080_v0, %v947_v4  ;;  %1102 = vrot.lane.b32.xlu1 %v1095_v49, %s3656_s0  ;;  %v4284_v4 = vstv %s3521_s1  ;;  %v129_v14 = vstv %s128_s29  ;;  %s3514_s1 = sld [smem:[#allocation3 + $0x18]] }
 0x1f1   :  { %v1760_v5 = vsel %vm541_vm3, %v1756_v51, %v1759_v12  ;;  %6875 = vst [vmem:[#allocation34_spill] sm:$0xff] %v4284_v4  ;;  %v1889_v0 = vmul.f32 %v4284_v4, %v4129_v21 }
 0x1f2   :  { %v1074_v16 = vpop.permute.xlu0 %1073  ;;  %v1096_v20 = vrot.slane %v1088_v47, 1  ;;  %v1072_v25 = vpop.permute.xlu1 %1071  ;;  %v4291_v47 = vstv %s3525_s17  ;;  %s3524_s17 = sld [smem:[#allocation3 + $0x21]] }
 0x1f3   :  { %v1081_v62 = vsel %vm482_vm6, %v1072_v25, %v1074_v16  ;;  %6876 = vst [vmem:[#allocation35_spill] sm:$0xff] %v4291_v47  ;;  %v1925_v10 = vmul.f32 %v4134_v40, %v4291_v47 }
 0x1f4   :  { %v1097_v18 = vsel %vm254_vm2, %v1095_v49, %v1096_v20  ;;  %v1089_v44 = vadd.f32 %v1081_v62, %v948_v50  ;;  %v1346_v49 = vld [vmem:[#allocation2 + $0x118] sm:$0x1]  ;;  %v4325_v50 = vstv %s3536_s21  ;;  %s3520_s21 = sld [smem:[#allocation3 + $0x1d]] }
 0x1f5   :  { %1104 = vrot.lane.b32.xlu0 %v1097_v18, %s3656_s0  ;;  %v1434_v26 = vmul.f32 %v4260_v31, %v1346_v49  ;;  %v1956_v18 = vmul.f32 %v4134_v40, %v4306_v45  ;;  %6880 = vst [vmem:[#allocation39_spill] sm:$0xff] %v4325_v50 }
 0x1f6   :  { %v1078_v24 = vpop.permute.xlu0 %1077  ;;  %v1076_v63 = vpop.permute.xlu1 %1075  ;;  %v1098_v23 = vrot.slane %v1089_v44, 1 }
 0x1f7   :  { %v1082_v17 = vsel %vm482_vm6, %v1076_v63, %v1078_v24  ;;  %v1771_v16 = vrot.slane %v1434_v26, 2  ;;  %v2287_v24 = vrot.slane %v1956_v18, 2  ;;  %v1962_v63 = vmul.f32 %v4306_v45, %v1346_v49  ;;  %v104_v18 = vld [vmem:[#allocation2] sm:$0x80] }
 0x1f8   :  { %v1090_v46 = vadd.f32 %v1082_v17, %v949_v30  ;;  %v1099_v22 = vsel %vm254_vm2, %v1096_v20, %v1098_v23  ;;  %v4319_v30 = vstv %s3527_s20  ;;  %v2405_v17 = vld [vmem:[#allocation2 + $0x128] sm:$0x80]  ;;  %s3519_s20 = sld [smem:[#allocation3 + $0x38]] }
 0x1f9   :  { %1542 = vrot.lane.b32.xlu0 %v1397_v6, %s3656_s0  ;;  %v1772_v21 = vsel %vm541_vm3, %v1759_v12, %v1771_v16  ;;  %6879 = vst [vmem:[#allocation38_spill] sm:$0xff] %v4319_v30  ;;  %v1950_v62 = vmul.f32 %v4319_v30, %v1344_v61  ;;  %v2299_v44 = vrot.slane %v1962_v63, 2 }
 0x1fa   :  { %v1100_v43 = vrot.slane %v1090_v46, 1  ;;  %v4328_v46 = vpop.permute.xlu0 %1155  ;;  %v4343_v28 = vpop.permute.xlu1 %1157 }
 0x1fc   :  { %1110 = vrot.lane.b32.xlu1 %v1100_v43, %s3656_s0  ;;  %v1101_v9 = vsel %vm254_vm2, %v1098_v23, %v1100_v43  ;;  %v4330_v43 = vstv %s3538_s22  ;;  %v2442_v23 = vmul.f32 %v4325_v50, %v2405_v17  ;;  %s3535_s22 = sld [smem:[#allocation3 + $0x26]] }
 0x1fd   :  { %1546 = vrot.lane.b32.xlu0 %v1397_v6, %s3656_s0  ;;  %6881 = vst [vmem:[#allocation40_spill] sm:$0xff] %v4330_v43 }
 0x200   :  { %508 = vrot.lane.b32.xlu1 %v501_v1, %s3656_s0  ;;  %v4334_v1 = vstv %s3540_s24  ;;  %s3529_s24 = sld [smem:[#allocation3 + $0x39]] }
 0x201   :  { %1108 = vrot.lane.b32.xlu0 %v1101_v9, %s3656_s0  ;;  %6882 = vst [vmem:[#allocation41_spill] sm:$0xff] %v4334_v1  ;;  %v2461_v9 = vmul.f32 %v4134_v40, %v4330_v43  ;;  %v2478_v3 = vmul.f32 %v4134_v40, %v4334_v1  ;;  %v4400_v1 = vstv %s3553_s3 }
 0x202   :  { %6890 = vst [vmem:[#allocation49_spill] sm:$0xff] %v4400_v1 }
 0x204   :  { %512 = vrot.lane.b32.xlu1 %v505_v60, %s3656_s0  ;;  %v2300_v60 = vsel %vm541_vm3, %v2287_v24, %v2299_v44  ;;  %v3615_v44 = vld [vmem:[#allocation2 + $0x8] sm:$0x80] }
 0x205   :  { %1550 = vrot.lane.b32.xlu0 %v1397_v6, %s3656_s0 }
 0x208   :  { %1106 = vrot.lane.b32.xlu1 %v1099_v22, %s3656_s0  ;;  %v4347_v22 = vpop.permute.xlu0 %1159 }
 0x209   :  { %1554 = vrot.lane.b32.xlu0 %v1397_v6, %s3656_s0  ;;  %v2288_v6 = vsel %vm541_vm3, %v2284_v11, %v2287_v24 }
 0x20c   :  { %1499 = vrot.lane.b32.xlu1 %v4151_v15, %s3657_s23 }
 0x20d   :  { %1775 = vrot.lane.b32.xlu0 %v1756_v51, %s3658_s28  ;;  %v2554_v51 = vrot.slane %v2461_v9, 1 }
 0x210   :  { %1503 = vrot.lane.b32.xlu1 %v4151_v15, %s3657_s23  ;;  %v4294_v15 = vstv %s3523_s18  ;;  %s3539_s18 = sld [smem:[#allocation3 + $0x2a]] }
 0x211   :  { %1779 = vrot.lane.b32.xlu0 %v1760_v5, %s3658_s28  ;;  %6877 = vst [vmem:[#allocation36_spill] sm:$0xff] %v4294_v15  ;;  %v1908_v20 = vmul.f32 %v4134_v40, %v4294_v15  ;;  %v4352_v5 = vpop.permute.xlu1 %1161 }
 0x213   :  { %v2001_v25 = vrot.slane %v1908_v20, 1 }
 0x214   :  { %1581 = vrot.lane.b32.xlu1 %v1422_v29, %s3656_s0  ;;  %v4355_v29 = vpop.permute.xlu0 %1163 }
 0x215   :  { %1783 = vrot.lane.b32.xlu0 %v1759_v12, %s3658_s28  ;;  %v4360_v49 = vpop.permute.xlu1 %1165 }
 0x218   :  { %1968 = vrot.lane.b32.xlu1 %v1889_v0, %s3656_s0  ;;  %v4362_v26 = vpop.permute.xlu0 %1167 }
 0x219   :  { %1787 = vrot.lane.b32.xlu0 %v1759_v12, %s3658_s28  ;;  %v2425_v12 = vld [vmem:[#allocation2 + $0x1a0] sm:$0x1]  ;;  %v4366_v0 = vpop.permute.xlu1 %1169 }
 0x21a   :  { %v3032_v61 = vmul.f32 %v4345_v8, %v2425_v12 }
 0x21c   :  { %2070 = vrot.lane.b32.xlu1 %v1925_v10, %s3656_s0  ;;  %v4369_v16 = vpop.permute.xlu0 %1171 }
 0x21d   :  { %1791 = vrot.lane.b32.xlu0 %v1772_v21, %s3658_s28  ;;  %6884 = vst [vmem:[#allocation43_spill] sm:$0xff] %v4369_v16  ;;  %v4376_v21 = vstv %s3555_s27  ;;  %v6913_v16 = vld [vmem:[#allocation20_spill] sm:$0xff] }
 0x21e   :  { %6886 = vst [vmem:[#allocation45_spill] sm:$0xff] %v4376_v21 }
 0x220   :  { %2074 = vrot.lane.b32.xlu1 %v1925_v10, %s3656_s0 }
 0x221   :  { %2015 = vrot.lane.b32.xlu0 %v2001_v25, %s3657_s23 }
 0x224   :  { %2078 = vrot.lane.b32.xlu1 %v1925_v10, %s3656_s0 }
 0x225   :  { %2019 = vrot.lane.b32.xlu0 %v2001_v25, %s3657_s23 }
 0x228   :  { %2082 = vrot.lane.b32.xlu1 %v1925_v10, %s3656_s0  ;;  %v4371_v10 = vstv %s3542_s26  ;;  %s6391_s26 = sld [smem:[#allocation3 + $0x3b]] }
 0x229   :  { %2023 = vrot.lane.b32.xlu0 %v2001_v25, %s3657_s23  ;;  %6885 = vst [vmem:[#allocation44_spill] sm:$0xff] %v4371_v10  ;;  %v2503_v20 = vmul.f32 %v4371_v10, %v2425_v12  ;;  %v133_v12 = vmul.f32 %v4216_v53, %v129_v14  ;;  %v413_v10 = vsel %vm412_vm7, %v4025_v19, %v4017_v36 }
 0x22c   :  { %2303 = vrot.lane.b32.xlu1 %v2284_v11, %s3658_s28  ;;  %v4380_v11 = vpop.permute.xlu0 %1440 }
 0x22d   :  { %2027 = vrot.lane.b32.xlu0 %v2001_v25, %s3657_s23  ;;  %6888 = vst [vmem:[#allocation47_spill] sm:$0xff] %v4380_v11  ;;  %v3616_v11 = vld [vmem:[#allocation2 + $0x68] sm:$0x7f] }
 0x230   :  { %2307 = vrot.lane.b32.xlu1 %v2288_v6, %s3658_s28  ;;  %v130_v6 = vmul.f32 %v129_v14, %v104_v18  ;;  %v507_v17 = vpop.permute.xlu0 %506 }
 0x231   :  { %2031 = vrot.lane.b32.xlu0 %v2001_v25, %s3657_s23  ;;  %v4378_v25 = vpop.permute.xlu1 %1173 }
 0x232   :  { %6887 = vst [vmem:[#allocation46_spill] sm:$0xff] %v4378_v25  ;;  %v236_v9 = vadd.f32 %v3828_v32, %v130_v6  ;;  %v6914_v25 = vld [vmem:[#allocation22_spill] sm:$0xff] }
 0x234   :  { %2311 = vrot.lane.b32.xlu1 %v2287_v24, %s3658_s28  ;;  %v4409_v54 = vpop.permute.xlu0 %514 }
 0x235   :  { %2109 = vrot.lane.b32.xlu0 %v1950_v62, %s3656_s0  ;;  %v4385_v63 = vpop.permute.xlu1 %1487  ;;  %v112_v62 = vld [vmem:[#allocation2 + $0x60] sm:$0x7f] }
 0x236   :  { %6889 = vst [vmem:[#allocation48_spill] sm:$0xff] %v4385_v63  ;;  %v139_v63 = vmul.f32 %v3616_v11, %v129_v14 }
 0x238   :  { %2315 = vrot.lane.b32.xlu1 %v2287_v24, %s3658_s28  ;;  %v3007_v24 = vmul.f32 %v4134_v40, %v4376_v21  ;;  %v428_v21 = vadd.f32 %v4025_v19, %v236_v9  ;;  %v511_v15 = vpop.permute.xlu0 %510 }
 0x239   :  { %2521 = vrot.lane.b32.xlu0 %v2442_v23, %s3656_s0  ;;  %v131_v23 = vmul.f32 %v3615_v44, %v129_v14  ;;  %v4405_v4 = vpop.permute.xlu1 %1491 }
 0x23a   :  { %6891 = vst [vmem:[#allocation50_spill] sm:$0xff] %v4405_v4  ;;  %v6895_v4 = vld [vmem:[#allocation9_spill] sm:$0xff] }
 0x23b   :  { %v237_v50 = vadd.f32 %v3828_v32, %v131_v23  ;;  %v245_v23 = vadd.f32 %v3840_v39, %v139_v63 }
 0x23c   :  { %2319 = vrot.lane.b32.xlu1 %v2300_v60, %s3658_s28  ;;  %v730_v60 = vstv %s3500_s30 }
 0x23d   :  { %2623 = vrot.lane.b32.xlu0 %v2478_v3, %s3656_s0  ;;  %v731_v6 = vmul.f32 %v730_v60, %v104_v18  ;;  %v732_v8 = vmul.f32 %v3615_v44, %v730_v60  ;;  %v735_v30 = vmul.f32 %v4134_v40, %v730_v60  ;;  %v736_v47 = vmul.f32 %v4224_v2, %v730_v60 }
 0x23e   :  { %v734_v9 = vmul.f32 %v4216_v53, %v730_v60  ;;  %v739_v43 = vmul.f32 %v730_v60, %v112_v62  ;;  %v740_v18 = vmul.f32 %v3616_v11, %v730_v60  ;;  %v738_v44 = vmul.f32 %v4239_v48, %v730_v60 }
 0x23f   :  { %v429_v19 = vadd.f32 %v413_v10, %v237_v50  ;;  %v239_v53 = vadd.f32 %v3832_v34, %v133_v12  ;;  %v6893_v10 = vld [vmem:[#allocation6_spill] sm:$0xff]  ;;  %v4435_v12 = vstv %s4393_s5  ;;  %v843_v31 = vadd.f32 %v6907_v57, %v735_v30 }
 0x240   :  { %2568 = vrot.lane.b32.xlu1 %v2554_v51, %s3657_s23 }
 0x241   :  { %3191 = vrot.lane.b32.xlu0 %v3032_v61, %s3656_s0  ;;  %v137_v61 = vmul.f32 %v4239_v48, %v129_v14  ;;  %v522_v60 = vadd.f32 %v507_v17, %v429_v19  ;;  %v6904_v19 = vld [vmem:[#allocation16_spill] sm:$0xff] }
 0x243   :  { %v243_v48 = vadd.f32 %v3834_v35, %v137_v61  ;;  %v6899_v61 = vld [vmem:[#allocation12_spill] sm:$0xff] }
 0x244   :  { %2572 = vrot.lane.b32.xlu1 %v2554_v51, %s3657_s23 }
 0x245   :  { %2627 = vrot.lane.b32.xlu0 %v2478_v3, %s3656_s0 }
 0x248   :  { %2576 = vrot.lane.b32.xlu1 %v2554_v51, %s3657_s23 }
 0x249   :  { %2631 = vrot.lane.b32.xlu0 %v2478_v3, %s3656_s0 }
 0x24c   :  { %2580 = vrot.lane.b32.xlu1 %v2554_v51, %s3657_s23 }
 0x24d   :  { %2635 = vrot.lane.b32.xlu0 %v2478_v3, %s3656_s0  ;;  %v134_v3 = vmul.f32 %v4134_v40, %v129_v14 }
 0x24f   :  { %v240_v36 = vadd.f32 %v3830_v33, %v134_v3  ;;  %v242_v11 = vadd.f32 %v3834_v35, %v134_v3 }
 0x250   :  { %2584 = vrot.lane.b32.xlu1 %v2554_v51, %s3657_s23  ;;  %v135_v51 = vmul.f32 %v4224_v2, %v129_v14  ;;  %v2990_v2 = vmul.f32 %v4134_v40, %v4400_v1  ;;  %v6894_v40 = vld [vmem:[#allocation8_spill] sm:$0xff] }
 0x251   :  { %v4429_v1 = vsel %vm412_vm7, %v6895_v4, %v6894_v40 }
 0x252   :  { %v241_v32 = vadd.f32 %v3830_v33, %v135_v51  ;;  %v6892_v33 = vld [vmem:[#allocation7_spill] sm:$0xff]  ;;  %v4451_v40 = vrot.slane %v2990_v2, 1  ;;  %v6910_v2 = vld [vmem:[#allocation18_spill] sm:$0xff] }
 0x253   :  { %v580_v51 = vsel %vm412_vm7, %v6892_v33, %v6893_v10  ;;  %6896 = vst [vmem:[#allocation7_spill] sm:$0xff] %v4429_v1  ;;  %v4448_v10 = vpop.permute.xlu1 %1495  ;;  %v841_v1 = vadd.f32 %v6910_v2, %v735_v30  ;;  %v842_v4 = vadd.f32 %v6910_v2, %v736_v47 }
 0x254   :  { %2662 = vrot.lane.b32.xlu1 %v2503_v20, %s3656_s0  ;;  %v138_v20 = vmul.f32 %v129_v14, %v112_v62  ;;  %v521_v14 = vadd.f32 %v507_v17, %v428_v21  ;;  %v238_v21 = vadd.f32 %v3832_v34, %v134_v3  ;;  %v6897_v34 = vld [vmem:[#allocation10_spill] sm:$0xff]  ;;  %v6898_v3 = vld [vmem:[#allocation11_spill] sm:$0xff]  ;;  %6905 = vst [vmem:[#allocation8_spill] sm:$0xff] %v4448_v10 }
 0x255   :  { %v582_v35 = vsel %vm412_vm7, %v6898_v3, %v6897_v34  ;;  %v6902_v17 = vld [vmem:[#allocation14_spill] sm:$0xff]  ;;  %v6906_v34 = vld [vmem:[#allocation17_spill] sm:$0xff]  ;;  %v596_v10 = vadd.f32 %v580_v51, %v522_v60 }
 0x256   :  { %v244_v62 = vadd.f32 %v3840_v39, %v138_v20  ;;  %v595_v50 = vadd.f32 %v6892_v33, %v521_v14  ;;  %v6900_v39 = vld [vmem:[#allocation13_spill] sm:$0xff]  ;;  %v6903_v20 = vld [vmem:[#allocation15_spill] sm:$0xff]  ;;  %v839_v33 = vadd.f32 %v6904_v19, %v735_v30  ;;  %v837_v45 = vadd.f32 %v6906_v34, %v731_v6 }
 0x257   :  { %v4440_v63 = vsel %vm412_vm7, %v6900_v39, %v6899_v61  ;;  %v4445_v14 = vsel %vm412_vm7, %v6903_v20, %v6902_v17  ;;  %v838_v38 = vadd.f32 %v6906_v34, %v732_v8  ;;  %v840_v61 = vadd.f32 %v6904_v19, %v734_v9  ;;  %v6909_v17 = vld [vmem:[#allocation27_spill] sm:$0xff]  ;;  %v6911_v8 = vld [vmem:[#allocation21_spill] sm:$0xff]  ;;  %v6912_v34 = vld [vmem:[#allocation24_spill] sm:$0xff] }
 0x258   :  { %3152 = vrot.lane.b32.xlu1 %v3007_v24, %s3656_s0  ;;  %6901 = vst [vmem:[#allocation6_spill] sm:$0xff] %v4440_v63  ;;  %v415_v63 = vsel %vm412_vm7, %v6909_v17, %v6908_v59  ;;  %v432_v39 = vadd.f32 %v6909_v17, %v240_v36  ;;  %v844_v6 = vadd.f32 %v6907_v57, %v738_v44  ;;  %v6915_v36 = vld [vmem:[#allocation26_spill] sm:$0xff]  ;;  %v6916_v57 = vld [vmem:[#allocation25_spill] sm:$0xff]  ;;  %v6917_v44 = vld [vmem:[#allocation28_spill] sm:$0xff] }
 0x259   :  { %v417_v9 = vsel %vm412_vm7, %v6912_v34, %v6911_v8  ;;  %v436_v19 = vadd.f32 %v6912_v34, %v244_v62  ;;  %v845_v59 = vadd.f32 %v6913_v16, %v739_v43  ;;  %v414_v60 = vsel %vm412_vm7, %v6915_v36, %v6914_v25 }
 0x25a   :  { %v433_v30 = vadd.f32 %v415_v63, %v241_v32  ;;  %v416_v51 = vsel %vm412_vm7, %v6917_v44, %v6916_v57  ;;  %v846_v43 = vadd.f32 %v6913_v16, %v740_v18  ;;  %v437_v62 = vadd.f32 %v417_v9, %v245_v23 }
 0x25b   :  { %v529_v17 = vadd.f32 %v4409_v54, %v436_v19  ;;  %v4485_v2 = vadd.f32 %v4435_v12, %v596_v10  ;;  %v430_v32 = vadd.f32 %v6915_v36, %v238_v21  ;;  %v431_v63 = vadd.f32 %v414_v60, %v239_v53 }
 0x25c   :  { %3156 = vrot.lane.b32.xlu1 %v3007_v24, %s3656_s0  ;;  %v434_v8 = vadd.f32 %v6917_v44, %v242_v11  ;;  %v526_v34 = vadd.f32 %v511_v15, %v433_v30  ;;  %v435_v57 = vadd.f32 %v416_v51, %v243_v48  ;;  %v1010_v19 = vsel %vm412_vm7, %v4200_v13, %v4198_v37 }
 0x25d   :  { %v1011_v16 = vsel %vm412_vm7, %v4204_v58, %v4202_v42  ;;  %v1025_v21 = vadd.f32 %v4200_v13, %v837_v45  ;;  %v1027_v53 = vadd.f32 %v4204_v58, %v839_v33  ;;  %v603_v11 = vadd.f32 %v6903_v20, %v529_v17 }
 0x25e   :  { %v4506_v37 = vadd.f32 %v4208_v41, %v841_v1  ;;  %v1013_v42 = vsel %vm412_vm7, %v4212_v52, %v4210_v56  ;;  %v628_v48 = vmul.f32 0.70710677, %v4485_v2  ;;  %v1026_v58 = vadd.f32 %v1010_v19, %v838_v38 }
 0x25f   :  { %v1028_v45 = vadd.f32 %v1011_v16, %v840_v61  ;;  %v600_v23 = vadd.f32 %v582_v35, %v526_v34  ;;  %v4522_v1 = vadd.f32 %v4212_v52, %v843_v31  ;;  %v530_v56 = vadd.f32 %v4409_v54, %v437_v62  ;;  %v6923_v62 = vld [vmem:[#allocation7_spill] sm:$0xff] }
 0x260   :  { %3160 = vrot.lane.b32.xlu1 %v3007_v24, %s3656_s0  ;;  %v1032_v38 = vadd.f32 %v1013_v42, %v844_v6  ;;  %v4531_v33 = vadd.f32 %v4219_v7, %v845_v59  ;;  %v1175_v52 = vsel %vm412_vm7, %v4328_v46, %v4343_v28  ;;  %v1176_v31 = vsel %vm412_vm7, %v4347_v22, %v4352_v5 }
 0x261   :  { %v604_v9 = vadd.f32 %v4445_v14, %v530_v56  ;;  %v1177_v36 = vsel %vm412_vm7, %v4355_v29, %v4360_v49  ;;  %v4558_v28 = vsel %vm412_vm7, %v4362_v26, %v4366_v0  ;;  %v6920_v14 = vld [vmem:[#allocation43_spill] sm:$0xff] }
 0x264   :  { %3164 = vrot.lane.b32.xlu1 %v3007_v24, %s3656_s0  ;;  %v4462_v24 = vadd.f32 %v4435_v12, %v595_v50  ;;  %v525_v50 = vadd.f32 %v511_v15, %v432_v39  ;;  %v1103_v39 = vpop.permute.xlu1 %1102  ;;  %v1012_v15 = vsel %vm412_vm7, %v4208_v41, %v4206_v55  ;;  %v1014_v55 = vsel %vm412_vm7, %v4219_v7, %v4214_v27 }
 0x265   :  { %v4519_v41 = vadd.f32 %v1012_v15, %v842_v4  ;;  %v4534_v27 = vadd.f32 %v4435_v12, %v603_v11  ;;  %v4537_v4 = vstv %s4481_s6  ;;  %v4539_v35 = vadd.f32 %v1014_v55, %v846_v43  ;;  %v6922_v43 = vld [vmem:[#allocation9_spill] sm:$0xff]  ;;  %v6925_v11 = vld [vmem:[#allocation6_spill] sm:$0xff] }
 0x266   :  { %v627_v25 = vmul.f32 0.70710677, %v4462_v24  ;;  %v599_v18 = vadd.f32 %v6898_v3, %v525_v50  ;;  %v4548_v7 = vadd.f32 %v4435_v12, %v600_v23  ;;  %v617_v5 = vmul.f32 0.5, %v4462_v24  ;;  %v6919_v50 = vld [vmem:[#allocation46_spill] sm:$0xff] }
 0x267   :  { %v1105_v47 = vpop.permute.xlu0 %1104  ;;  %v635_v60 = vmul.f32 0.70710677, %v4534_v27  ;;  %v4567_v30 = vsel %vm412_vm7, %v6920_v14, %v6919_v50  ;;  %v1117_v49 = vadd.f32 %v1103_v39, %v1025_v21  ;;  %v1118_v17 = vadd.f32 %v1103_v39, %v1026_v58 }
 0x268   :  { %3097 = vrot.lane.b32.xlu1 %v4451_v40, %s3657_s23  ;;  %3571 = verf.f32 %v627_v25  ;;  %v4526_v20 = vadd.f32 %v4435_v12, %v599_v18  ;;  %v1120_v10 = vadd.f32 %v1105_v47, %v1028_v45  ;;  %v1119_v44 = vadd.f32 %v1105_v47, %v1027_v53  ;;  %v6924_v53 = vld [vmem:[#allocation13_spill] sm:$0xff] }
 0x269   :  { %3573 = verf.f32 %v628_v48  ;;  %v4575_v18 = vadd.f32 %v4435_v12, %v604_v9  ;;  %v618_v55 = vmul.f32 0.5, %v4485_v2 }
 0x26a   :  { %v631_v59 = vmul.f32 0.70710677, %v4526_v20  ;;  %v1193_v24 = vadd.f32 %v1176_v31, %v1120_v10  ;;  %v1192_v21 = vadd.f32 %v4347_v22, %v1119_v44 }
 0x26b   :  { %v4517_v3 = vpop.permute.xlu0 %1542  ;;  %v636_v10 = vmul.f32 0.70710677, %v4575_v18 }
 0x26c   :  { %3101 = vrot.lane.b32.xlu1 %v4451_v40, %s3657_s23  ;;  %6918 = vst [vmem:[#allocation10_spill] sm:$0xff] %v4517_v3  ;;  %3575 = verf.f32 %v631_v59  ;;  %v4591_v23 = vadd.f32 %v4537_v4, %v1193_v24  ;;  %v4602_v2 = vadd.f32 %v4537_v4, %v1192_v21  ;;  %v621_v24 = vmul.f32 0.5, %v4526_v20 }
 0x26d   :  { %3577 = verf.f32 %v635_v60 }
 0x26e   :  { %v4512_v13 = vpop.permute.xlu1 %1110 }
 0x26f   :  { %v4569_v51 = vpop.permute.xlu0 %1546 }
 0x270   :  { %3105 = vrot.lane.b32.xlu1 %v4451_v40, %s3657_s23  ;;  %6921 = vst [vmem:[#allocation11_spill] sm:$0xff] %v4569_v51  ;;  %v6981_v51 = vld [vmem:[#allocation49_spill] sm:$0xff] }
 0x272   :  { %v509_v54 = vpop.permute.xlu1 %508  ;;  %v3572_v16 = vpop.eup %3571 }
 0x273   :  { %v523_v61 = vadd.f32 %v509_v54, %v430_v32  ;;  %v524_v6 = vadd.f32 %v509_v54, %v431_v63  ;;  %v632_v63 = vmul.f32 0.70710677, %v4548_v7  ;;  %v1109_v56 = vpop.permute.xlu0 %1108  ;;  %v647_v22 = vadd.f32 1.0, %v3572_v16  ;;  %v3574_v31 = vpop.eup %3573 }
 0x274   :  { %3109 = vrot.lane.b32.xlu1 %v4451_v40, %s3657_s23  ;;  %v1124_v59 = vadd.f32 %v1109_v56, %v1032_v38  ;;  %v622_v16 = vmul.f32 0.5, %v4548_v7 }
 0x275   :  { %v597_v0 = vadd.f32 %v6922_v43, %v523_v61  ;;  %v598_v25 = vadd.f32 %v6923_v62, %v524_v6  ;;  %3579 = verf.f32 %v632_v63  ;;  %v4618_v43 = vmul.f32 %v647_v22, %v617_v5 }
 0x276   :  { %v513_v32 = vpop.permute.xlu1 %512  ;;  %v1197_v5 = vadd.f32 %v4558_v28, %v1124_v59 }
 0x277   :  { %v527_v34 = vadd.f32 %v513_v32, %v434_v8  ;;  %v528_v19 = vadd.f32 %v513_v32, %v435_v57  ;;  %v4578_v47 = vadd.f32 %v4435_v12, %v597_v0  ;;  %v4581_v39 = vadd.f32 %v4435_v12, %v598_v25 }
 0x278   :  { %v1190_v8 = vadd.f32 %v4328_v46, %v1117_v49  ;;  %v1191_v57 = vadd.f32 %v1175_v52, %v1118_v17  ;;  %v648_v17 = vadd.f32 1.0, %v3574_v31  ;;  %v1224_v0 = vmul.f32 0.70710677, %v4602_v2 }
 0x279   :  { %v601_v15 = vadd.f32 %v6924_v53, %v527_v34  ;;  %v602_v42 = vadd.f32 %v6925_v11, %v528_v19  ;;  %v629_v48 = vmul.f32 0.70710677, %v4578_v47  ;;  %v630_v58 = vmul.f32 0.70710677, %v4581_v39 }
 0x27a   :  { %v1107_v45 = vpop.permute.xlu1 %1106  ;;  %v4606_v6 = vadd.f32 %v4537_v4, %v1190_v8  ;;  %v4609_v9 = vadd.f32 %v4537_v4, %v1191_v57  ;;  %v658_v21 = vmul.f32 %v648_v17, %v618_v55  ;;  %v678_v28 = vrot.slane %v4618_v43, 7 }
 0x27b   :  { %3581 = verf.f32 %v629_v48  ;;  %v4594_v54 = vadd.f32 %v4435_v12, %v601_v15  ;;  %v4597_v46 = vadd.f32 %v4435_v12, %v602_v42  ;;  %v1121_v52 = vadd.f32 %v1107_v45, %v4506_v37 }
 0x27c   :  { %3583 = verf.f32 %v630_v58  ;;  %v1122_v61 = vadd.f32 %v1107_v45, %v4519_v41  ;;  %v1123_v37 = vadd.f32 %v1109_v56, %v4522_v1  ;;  %v1225_v41 = vmul.f32 0.70710677, %v4591_v23  ;;  %v3576_v1 = vpop.eup %3575 }
 0x27d   :  { %v633_v12 = vmul.f32 0.70710677, %v4594_v54  ;;  %v634_v50 = vmul.f32 0.70710677, %v4597_v46  ;;  %v1194_v44 = vadd.f32 %v4355_v29, %v1121_v52  ;;  %v1223_v25 = vmul.f32 0.70710677, %v4609_v9  ;;  %v4635_v63 = vpop.eup %3577 }
 0x27e   :  { %v4612_v60 = vpop.permute.xlu1 %1499  ;;  %v1195_v49 = vadd.f32 %v1177_v36, %v1122_v61  ;;  %v1125_v29 = vadd.f32 %v4512_v13, %v4531_v33  ;;  %v1126_v36 = vadd.f32 %v4512_v13, %v4539_v35  ;;  %v1222_v34 = vmul.f32 0.70710677, %v4606_v6 }
 0x27f   :  { %6926 = vst [vmem:[#allocation12_spill] sm:$0xff] %v4612_v60  ;;  %3585 = verf.f32 %v633_v12  ;;  %v4622_v38 = vadd.f32 %v4537_v4, %v1194_v44  ;;  %v1196_v19 = vadd.f32 %v4362_v26, %v1123_v37  ;;  %v3580_v13 = vpop.eup %3579  ;;  %v651_v53 = vadd.f32 1.0, %v3576_v1 }
 0x280   :  { %3587 = verf.f32 %v634_v50  ;;  %v4625_v62 = vadd.f32 %v4537_v4, %v1195_v49  ;;  %v1198_v20 = vadd.f32 %v6920_v14, %v1125_v29  ;;  %v1199_v26 = vadd.f32 %v4567_v30, %v1126_v36 }
 0x281   :  { %3589 = verf.f32 %v636_v10  ;;  %v1226_v35 = vmul.f32 0.70710677, %v4622_v38  ;;  %v4647_v7 = vadd.f32 %v4537_v4, %v1197_v5  ;;  %v619_v8 = vmul.f32 0.5, %v4578_v47 }
 0x282   :  { %v4633_v32 = vpop.permute.xlu1 %1503  ;;  %3591 = verf.f32 %v1225_v41  ;;  %v1227_v33 = vmul.f32 0.70710677, %v4625_v62  ;;  %v4653_v57 = vadd.f32 %v4537_v4, %v1196_v19  ;;  %v620_v58 = vmul.f32 0.5, %v4581_v39  ;;  %v4677_v19 = vpop.permute.xlu0 %1550 }
 0x283   :  { %3593 = verf.f32 %v1224_v0  ;;  %v652_v14 = vadd.f32 1.0, %v3580_v13  ;;  %v681_v30 = vrot.slane %v658_v21, 7  ;;  %v661_v56 = vmul.f32 %v651_v53, %v621_v24  ;;  %6929 = vst [vmem:[#allocation16_spill] sm:$0xff] %v4677_v19 }
 0x284   :  { %3595 = verf.f32 %v1223_v25  ;;  %v4657_v31 = vadd.f32 %v4537_v4, %v1198_v20  ;;  %v4660_v52 = vadd.f32 %v4537_v4, %v1199_v26  ;;  %v1229_v47 = vmul.f32 0.70710677, %v4647_v7 }
 0x285   :  { %v3582_v15 = vpop.eup %3581  ;;  %3597 = verf.f32 %v1222_v34  ;;  %v1228_v59 = vmul.f32 0.70710677, %v4653_v57  ;;  %v623_v12 = vmul.f32 0.5, %v4594_v54  ;;  %v624_v44 = vmul.f32 0.5, %v4597_v46 }
 0x286   :  { %v4649_v11 = vpop.permute.xlu1 %1581  ;;  %v3584_v42 = vpop.eup %3583  ;;  %v649_v48 = vadd.f32 1.0, %v3582_v15  ;;  %3599 = verf.f32 %v1227_v33  ;;  %v662_v41 = vmul.f32 %v652_v14, %v622_v16  ;;  %v1231_v25 = vmul.f32 0.70710677, %v4660_v52 }
 0x287   :  { %v650_v45 = vadd.f32 1.0, %v3584_v42  ;;  %3601 = verf.f32 %v1226_v35  ;;  %v1230_v46 = vmul.f32 0.70710677, %v4657_v31  ;;  %v684_v24 = vrot.slane %v661_v56, 7 }
 0x288   :  { %v659_v55 = vmul.f32 %v649_v48, %v619_v8  ;;  %3603 = verf.f32 %v1229_v47  ;;  %v655_v34 = vadd.f32 1.0, %v4635_v63  ;;  %v625_v33 = vmul.f32 0.5, %v4534_v27 }
 0x289   :  { %v3586_v22 = vpop.eup %3585  ;;  %v660_v10 = vmul.f32 %v650_v45, %v620_v58  ;;  %3605 = verf.f32 %v1228_v59  ;;  %v686_v21 = vrot.slane %v662_v41, 7  ;;  %v1215_v58 = vmul.f32 0.5, %v4591_v23 }
 0x28a   :  { %v4663_v61 = vpop.permute.xlu1 %1968  ;;  %v3588_v39 = vpop.eup %3587  ;;  %v679_v37 = vrot.slane %v659_v55, 7  ;;  %v653_v50 = vadd.f32 1.0, %v3586_v22  ;;  %3607 = verf.f32 %v1231_v25  ;;  %v1214_v14 = vmul.f32 0.5, %v4602_v2 }
 0x28b   :  { %6927 = vst [vmem:[#allocation14_spill] sm:$0xff] %v4663_v61  ;;  %v682_v49 = vrot.slane %v660_v10, 7  ;;  %v654_v17 = vadd.f32 1.0, %v3588_v39  ;;  %v3590_v43 = vpop.eup %3589  ;;  %3609 = verf.f32 %v1230_v46  ;;  %v1213_v56 = vmul.f32 0.5, %v4609_v9  ;;  %v4691_v39 = vpop.permute.xlu0 %1554 }
 0x28c   :  { %v680_v4 = vsel %vm677_vm8, %v678_v28, %v679_v37  ;;  %v663_v0 = vmul.f32 %v653_v50, %v623_v12  ;;  %v3592_v1 = vpop.eup %3591  ;;  %v656_v13 = vadd.f32 1.0, %v3590_v43  ;;  %v626_v28 = vmul.f32 0.5, %v4575_v18  ;;  %6931 = vst [vmem:[#allocation19_spill] sm:$0xff] %v4691_v39  ;;  %v6980_v39 = vld [vmem:[#allocation34_spill] sm:$0xff] }
 0x28d   :  { %v683_v29 = vsel %vm677_vm8, %v681_v30, %v682_v49  ;;  %696 = vrot.lane.b32.xlu1 %v680_v4, %s3659_s4  ;;  %v664_v54 = vmul.f32 %v654_v17, %v624_v44  ;;  %v3594_v5 = vpop.eup %3593  ;;  %v685_v53 = vsel %vm677_vm8, %v679_v37, %v684_v24  ;;  %v1245_v20 = vadd.f32 1.0, %v3592_v1 }
 0x28e   :  { %v4672_v36 = vpop.permute.xlu1 %2070  ;;  %698 = vrot.lane.b32.xlu0 %v683_v29, %s3659_s4  ;;  %v3596_v16 = vpop.eup %3595  ;;  %v688_v15 = vrot.slane %v663_v0, 7  ;;  %v687_v42 = vsel %vm677_vm8, %v682_v49, %v686_v21  ;;  %v1244_v8 = vadd.f32 1.0, %v3594_v5  ;;  %v665_v18 = vmul.f32 %v655_v34, %v625_v33 }
 0x28f   :  { %6928 = vst [vmem:[#allocation15_spill] sm:$0xff] %v4672_v36  ;;  %v3598_v35 = vpop.eup %3597  ;;  %v690_v63 = vrot.slane %v664_v54, 7  ;;  %v1243_v45 = vadd.f32 1.0, %v3596_v16  ;;  %v666_v30 = vmul.f32 %v656_v13, %v626_v28  ;;  %v1255_v47 = vmul.f32 %v1245_v20, %v1215_v58 }
 0x290   :  { %v3600_v26 = vpop.eup %3599  ;;  %v1242_v55 = vadd.f32 1.0, %v3598_v35  ;;  %v689_v22 = vsel %vm677_vm8, %v684_v24, %v688_v15  ;;  %v1212_v59 = vmul.f32 0.5, %v4606_v6  ;;  %v1254_v12 = vmul.f32 %v1244_v8, %v1214_v14 }
 0x291   :  { %700 = vrot.lane.b32.xlu1 %v685_v53, %s3659_s4  ;;  %v3602_v27 = vpop.eup %3601  ;;  %v1247_v10 = vadd.f32 1.0, %v3600_v26  ;;  %v691_v23 = vsel %vm677_vm8, %v686_v21, %v690_v63  ;;  %v1217_v2 = vmul.f32 0.5, %v4625_v62  ;;  %v692_v9 = vrot.slane %v665_v18, 7 }
 0x292   :  { %v4684_v48 = vpop.permute.xlu1 %2074  ;;  %702 = vrot.lane.b32.xlu0 %v687_v42, %s3659_s4  ;;  %v1246_v37 = vadd.f32 1.0, %v3602_v27  ;;  %v1253_v44 = vmul.f32 %v1243_v45, %v1213_v56  ;;  %v3604_v49 = vpop.eup %3603  ;;  %v1216_v41 = vmul.f32 0.5, %v4622_v38  ;;  %v694_v17 = vrot.slane %v666_v30, 7 }
 0x293   :  { %6930 = vst [vmem:[#allocation17_spill] sm:$0xff] %v4684_v48  ;;  %v1252_v43 = vmul.f32 %v1242_v55, %v1212_v59  ;;  %v3606_v6 = vpop.eup %3605  ;;  %v693_v4 = vsel %vm677_vm8, %v688_v15, %v692_v9  ;;  %v1276_v0 = vrot.slane %v1255_v47, 7  ;;  %v1257_v1 = vmul.f32 %v1247_v10, %v1217_v2  ;;  %v4707_v38 = vpop.permute.xlu0 %1775 }
 0x294   :  { %v695_v25 = vsel %vm677_vm8, %v690_v63, %v694_v17  ;;  %v1273_v29 = vrot.slane %v1254_v12, 7  ;;  %v1256_v62 = vmul.f32 %v1246_v37, %v1216_v41  ;;  %v1275_v5 = vrot.slane %v1253_v44, 7  ;;  %6934 = vst [vmem:[#allocation18_spill] sm:$0xff] %v4707_v38  ;;  %v3608_v24 = vpop.eup %3607 }
 0x295   :  { %704 = vrot.lane.b32.xlu1 %v689_v22, %s3659_s4  ;;  %v1249_v46 = vadd.f32 1.0, %v3604_v49  ;;  %v1272_v34 = vrot.slane %v1252_v43, 7  ;;  %v1248_v16 = vadd.f32 1.0, %v3606_v6  ;;  %v3610_v33 = vpop.eup %3609  ;;  %v1219_v21 = vmul.f32 0.5, %v4647_v7 }
 0x296   :  { %v4696_v50 = vpop.permute.xlu1 %2078  ;;  %706 = vrot.lane.b32.xlu0 %v691_v23, %s3659_s4  ;;  %v1277_v13 = vsel %vm677_vm8, %v1275_v5, %v1276_v0  ;;  %v1280_v35 = vrot.slane %v1257_v1, 7  ;;  %v1218_v28 = vmul.f32 0.5, %v4653_v57  ;;  %v1278_v15 = vrot.slane %v1256_v62, 7 }
 0x297   :  { %6932 = vst [vmem:[#allocation23_spill] sm:$0xff] %v4696_v50  ;;  %v1274_v53 = vsel %vm677_vm8, %v1272_v34, %v1273_v29  ;;  %v1259_v26 = vmul.f32 %v1249_v46, %v1219_v21  ;;  %v1251_v42 = vadd.f32 1.0, %v3608_v24  ;;  %v1250_v8 = vadd.f32 1.0, %v3610_v33  ;;  %v4719_v58 = vpop.permute.xlu0 %1779 }
 0x298   :  { %v1258_v63 = vmul.f32 %v1248_v16, %v1218_v28  ;;  %v1221_v7 = vmul.f32 0.5, %v4660_v52  ;;  %v1281_v27 = vsel %vm677_vm8, %v1276_v0, %v1280_v35  ;;  %6936 = vst [vmem:[#allocation24_spill] sm:$0xff] %v4719_v58  ;;  %v1220_v57 = vmul.f32 0.5, %v4657_v31 }
 0x299   :  { %708 = vrot.lane.b32.xlu1 %v693_v4, %s3659_s4  ;;  %v1279_v18 = vsel %vm677_vm8, %v1273_v29, %v1278_v15  ;;  %v1284_v14 = vrot.slane %v1259_v26, 7  ;;  %v88_v26 = vlaneseq }
 0x29a   :  { %v4704_v54 = vpop.permute.xlu1 %2082  ;;  %710 = vrot.lane.b32.xlu0 %v695_v25, %s3659_s4  ;;  %v1261_v30 = vmul.f32 %v1251_v42, %v1221_v7  ;;  %v1282_v55 = vrot.slane %v1258_v63, 7  ;;  %v1260_v56 = vmul.f32 %v1250_v8, %v1220_v57 }
 0x29b   :  { %6933 = vst [vmem:[#allocation27_spill] sm:$0xff] %v4704_v54  ;;  %v1285_v52 = vsel %vm677_vm8, %v1280_v35, %v1284_v14  ;;  %v4733_v10 = vpop.permute.xlu0 %1783  ;;  %v4801_v8 = vand.u32 127, %v88_v26  ;;  %v89_v57 = vshrl.u32 %v88_v26, 7 }
 0x29c   :  { %v1283_v22 = vsel %vm677_vm8, %v1278_v15, %v1282_v55  ;;  %v1288_v31 = vrot.slane %v1261_v30, 7  ;;  %6939 = vst [vmem:[#allocation26_spill] sm:$0xff] %v4733_v10  ;;  %v1286_v59 = vrot.slane %v1260_v56, 7 }
 0x29d   :  { %1292 = vrot.lane.b32.xlu1 %v1277_v13, %s3659_s4  ;;  %vm99_vm9 = vcmp.lt.s32.totalorder %v4801_v8, 28 }
 0x29e   :  { %v4714_v20 = vpop.permute.xlu1 %2303  ;;  %1290 = vrot.lane.b32.xlu0 %v1274_v53, %s3659_s4  ;;  %v1289_v23 = vsel %vm677_vm8, %v1284_v14, %v1288_v31  ;;  %v1287_v12 = vsel %vm677_vm8, %v1282_v55, %v1286_v59  ;;  %v6968_v55 = vld [vmem:[#allocation30_spill] sm:$0xff] }
 0x29f   :  { %6935 = vst [vmem:[#allocation21_spill] sm:$0xff] %v4714_v20  ;;  %v4741_v2 = vpop.permute.xlu0 %1787 }
 0x2a0   :  { %6941 = vst [vmem:[#allocation28_spill] sm:$0xff] %v4741_v2 }
 0x2a1   :  { %1296 = vrot.lane.b32.xlu1 %v1281_v27, %s3659_s4 }
 0x2a2   :  { %v4724_v45 = vpop.permute.xlu1 %2307  ;;  %1294 = vrot.lane.b32.xlu0 %v1279_v18, %s3659_s4 }
 0x2a3   :  { %6937 = vst [vmem:[#allocation20_spill] sm:$0xff] %v4724_v45  ;;  %v4749_v49 = vpop.permute.xlu0 %1791 }
 0x2a4   :  { %6944 = vst [vmem:[#allocation9_spill] sm:$0xff] %v4749_v49 }
 0x2a5   :  { %1300 = vrot.lane.b32.xlu1 %v1285_v52, %s3659_s4 }
 0x2a6   :  { %v4730_v47 = vpop.permute.xlu1 %2311  ;;  %1298 = vrot.lane.b32.xlu0 %v1283_v22, %s3659_s4  ;;  %v92_v22 = vadd.s32 24, %v89_v57  ;;  %v6969_v57 = vld [vmem:[#allocation36_spill] sm:$0xff] }
 0x2a7   :  { %6938 = vst [vmem:[#allocation22_spill] sm:$0xff] %v4730_v47  ;;  %v4753_v17 = vpop.permute.xlu0 %2015 }
 0x2a8   :  { %vm98_vm10 = vcmp.lt.s32.totalorder %v92_v22, 28 }
 0x2a9   :  { %1304 = vrot.lane.b32.xlu1 %v1289_v23, %s3659_s4  ;;  %vm4834_vm11 = vmand %vm98_vm10, %vm99_vm9 }
 0x2aa   :  { %v4738_v37 = vpop.permute.xlu1 %2315  ;;  %1302 = vrot.lane.b32.xlu0 %v1287_v12, %s3659_s4 }
 0x2ab   :  { %6940 = vst [vmem:[#allocation25_spill] sm:$0xff] %v4738_v37  ;;  %v4759_v4 = vpop.permute.xlu0 %2019 }
 0x2ac   :  { %6948 = vst [vmem:[#allocation51_spill] sm:$0xff] %v4759_v4 }
 0x2ad   :  { %3113 = vrot.lane.b32.xlu1 %v4451_v40, %s3657_s23 }
 0x2ae   :  { %v4743_v9 = vpop.permute.xlu1 %2319 }
 0x2af   :  { %6942 = vst [vmem:[#allocation46_spill] sm:$0xff] %v4743_v9  ;;  %v4763_v1 = vpop.permute.xlu0 %2023 }
 0x2b0   :  { %6950 = vst [vmem:[#allocation53_spill] sm:$0xff] %v4763_v1 }
 0x2b2   :  { %v4747_v44 = vpop.permute.xlu1 %2568 }
 0x2b3   :  { %6943 = vst [vmem:[#allocation43_spill] sm:$0xff] %v4747_v44  ;;  %v4767_v40 = vpop.permute.xlu0 %2027 }
 0x2b4   :  { %6952 = vst [vmem:[#allocation55_spill] sm:$0xff] %v4767_v40 }
 0x2b6   :  { %v4751_v41 = vpop.permute.xlu1 %2572 }
 0x2b7   :  { %6945 = vst [vmem:[#allocation7_spill] sm:$0xff] %v4751_v41  ;;  %v4771_v62 = vpop.permute.xlu0 %2031  ;;  %v6988_v41 = vld [vmem:[#allocation39_spill] sm:$0xff] }
 0x2ba   :  { %v4755_v43 = vpop.permute.xlu1 %2576 }
 0x2bb   :  { %6946 = vst [vmem:[#allocation13_spill] sm:$0xff] %v4755_v43  ;;  %v4775_v46 = vpop.permute.xlu0 %2109 }
 0x2bc   :  { %6955 = vst [vmem:[#allocation58_spill] sm:$0xff] %v4775_v46 }
 0x2be   :  { %v4757_v6 = vpop.permute.xlu1 %2580 }
 0x2bf   :  { %6947 = vst [vmem:[#allocation6_spill] sm:$0xff] %v4757_v6  ;;  %v4779_v34 = vpop.permute.xlu0 %2521 }
 0x2c0   :  { %6957 = vst [vmem:[#allocation60_spill] sm:$0xff] %v4779_v34 }
 0x2c2   :  { %v4761_v0 = vpop.permute.xlu1 %2584 }
 0x2c3   :  { %6949 = vst [vmem:[#allocation52_spill] sm:$0xff] %v4761_v0  ;;  %v4783_v33 = vpop.permute.xlu0 %2623 }
 0x2c4   :  { %6959 = vst [vmem:[#allocation62_spill] sm:$0xff] %v4783_v33 }
 0x2c6   :  { %v4765_v25 = vpop.permute.xlu1 %2662 }
 0x2c7   :  { %6951 = vst [vmem:[#allocation54_spill] sm:$0xff] %v4765_v25  ;;  %v4787_v13 = vpop.permute.xlu0 %3191 }
 0x2c8   :  { %6961 = vst [vmem:[#allocation64_spill] sm:$0xff] %v4787_v13  ;;  %v6983_v13 = vld [vmem:[#allocation35_spill] sm:$0xff] }
 0x2ca   :  { %v4769_v29 = vpop.permute.xlu1 %3152 }
 0x2cb   :  { %6953 = vst [vmem:[#allocation56_spill] sm:$0xff] %v4769_v29  ;;  %v4791_v28 = vpop.permute.xlu0 %2627 }
 0x2cc   :  { %6963 = vst [vmem:[#allocation66_spill] sm:$0xff] %v4791_v28  ;;  %v6976_v28 = vld [vmem:[#allocation37_spill] sm:$0xff] }
 0x2ce   :  { %v4773_v5 = vpop.permute.xlu1 %3156 }
 0x2cf   :  { %6954 = vst [vmem:[#allocation57_spill] sm:$0xff] %v4773_v5  ;;  %v4795_v15 = vpop.permute.xlu0 %2631 }
 0x2d0   :  { %6965 = vst [vmem:[#allocation68_spill] sm:$0xff] %v4795_v15 }
 0x2d2   :  { %v4777_v24 = vpop.permute.xlu1 %3160 }
 0x2d3   :  { %6956 = vst [vmem:[#allocation59_spill] sm:$0xff] %v4777_v24  ;;  %v4799_v63 = vpop.permute.xlu0 %2635 }
 0x2d4   :  { %6967 = vst [vmem:[#allocation70_spill] sm:$0xff] %v4799_v63 }
 0x2d6   :  { %v4781_v16 = vpop.permute.xlu1 %3164 }
 0x2d7   :  { %6958 = vst [vmem:[#allocation61_spill] sm:$0xff] %v4781_v16 }
 0x2da   :  { %v4785_v21 = vpop.permute.xlu1 %3097 }
 0x2db   :  { %6960 = vst [vmem:[#allocation63_spill] sm:$0xff] %v4785_v21 }
 0x2de   :  { %v4789_v35 = vpop.permute.xlu1 %3101 }
 0x2df   :  { %6962 = vst [vmem:[#allocation65_spill] sm:$0xff] %v4789_v35 }
 0x2e2   :  { %v4793_v53 = vpop.permute.xlu1 %3105 }
 0x2e3   :  { %6964 = vst [vmem:[#allocation67_spill] sm:$0xff] %v4793_v53 }
 0x2e6   :  { %v4797_v42 = vpop.permute.xlu1 %3109 }
 0x2e7   :  { %6966 = vst [vmem:[#allocation69_spill] sm:$0xff] %v4797_v42 }
 0x2ff   :  { %v697_v7 = vpop.permute.xlu1 %696 }
 0x300   :  { %v699_v27 = vpop.permute.xlu0 %698 }
 0x301   :  { %v712_v18 = vsel %vm482_vm6, %v697_v7, %v699_v27 }
 0x302   :  { %v4807_v14 = vsel %vm99_vm9, %v712_v18, 0.0 }
 0x303   :  { %725 = vst [vmem:[#allocation2 + $0xb0] sm:$0xff] %v4807_v14  ;;  %v701_v30 = vpop.permute.xlu1 %700  ;;  %v1362_v56 = vmul.f32 %v6968_v55, %v4807_v14  ;;  %v4842_v22 = vmul.f32 %v6969_v57, %v4807_v14 }
 0x304   :  { %v703_v52 = vpop.permute.xlu0 %702 }
 0x305   :  { %v713_v31 = vsel %vm482_vm6, %v701_v30, %v703_v52  ;;  %1442 = vrot.lane.b32.xlu1 %v1362_v56, %s3656_s0  ;;  %v6979_v30 = vld [vmem:[#allocation40_spill] sm:$0xff] }
 0x306   :  { %v4816_v59 = vsel %vm99_vm9, %v713_v31, 0.0 }
 0x307   :  { %726 = vst [vmem:[#allocation2 + $0xc8] sm:$0xff] %v4816_v59  ;;  %v705_v23 = vpop.permute.xlu1 %704  ;;  %v1363_v12 = vmul.f32 %v6968_v55, %v4816_v59  ;;  %v4829_v18 = vmul.f32 %v6969_v57, %v4816_v59  ;;  %v1955_v48 = vmul.f32 %v6976_v28, %v4816_v59 }
 0x308   :  { %v707_v26 = vpop.permute.xlu0 %706 }
 0x309   :  { %v714_v7 = vsel %vm482_vm6, %v705_v23, %v707_v26  ;;  %1444 = vrot.lane.b32.xlu0 %v1363_v12, %s3656_s0  ;;  %v6972_v23 = vld [vmem:[#allocation32_spill] sm:$0xff]  ;;  %v6973_v26 = vld [vmem:[#allocation29_spill] sm:$0xff]  ;;  %v2005_v58 = vrot.slane %v4829_v18, 1 }
 0x30a   :  { %v4825_v27 = vsel %vm99_vm9, %v714_v7, 0.0  ;;  %v4846_v12 = vmul.f32 %v6972_v23, %v4816_v59  ;;  %v4850_v7 = vmul.f32 %v6973_v26, %v4816_v59  ;;  %v4862_v10 = vmul.f32 %v6973_v26, %v4807_v14  ;;  %v4903_v24 = vld [vmem:[#allocation2 + $0xb0] sm:$0xfe] }
 0x30b   :  { %727 = vst [vmem:[#allocation2 + $0xe0] sm:$0xff] %v4825_v27  ;;  %v709_v56 = vpop.permute.xlu1 %708  ;;  %v1364_v52 = vmul.f32 %v6968_v55, %v4825_v27  ;;  %v1429_v45 = vmul.f32 %v6972_v23, %v4825_v27  ;;  %v4935_v33 = vmul.f32 %v6976_v28, %v4903_v24  ;;  %v1892_v21 = vmul.f32 %v6980_v39, %v4825_v27 }
 0x30c   :  { %v711_v31 = vpop.permute.xlu0 %710  ;;  %v6786_v34 = vrot.slane %v4846_v12, 2 }
 0x30d   :  { %v715_v47 = vsel %vm482_vm6, %v709_v56, %v711_v31  ;;  %1446 = vrot.lane.b32.xlu1 %v1364_v52, %s3656_s0  ;;  %v6974_v56 = vld [vmem:[#allocation31_spill] sm:$0xff]  ;;  %v6785_v52 = vrot.slane %v4842_v22, 1  ;;  %v1761_v61 = vrot.slane %v1429_v45, 2 }
 0x30e   :  { %v4858_v2 = vsel %vm4834_vm11, %v715_v47, 0.0  ;;  %v1396_v31 = vmul.f32 %v6974_v56, %v4807_v14  ;;  %v1477_v47 = vrot.slane %v4850_v7, 1  ;;  %v6787_v7 = vrot.slane %v4862_v10, 1 }
 0x30f   :  { %728 = vst [vmem:[#allocation2 + $0xf8] sm:$0xff] %v4858_v2  ;;  %v1293_v37 = vpop.permute.xlu1 %1292  ;;  %v4875_v18 = vmul.f32 %v6972_v23, %v4858_v2  ;;  %v4880_v49 = vsel %vm254_vm2, %v6785_v52, %v2005_v58  ;;  %v1398_v45 = vmul.f32 %v6974_v56, %v4816_v59  ;;  %v4907_v5 = vmul.f32 %v6969_v57, %v4858_v2 }
 0x310   :  { %v1291_v9 = vpop.permute.xlu0 %1290  ;;  %v1385_v52 = vmul.f32 %v6973_v26, %v4825_v27 }
 0x311   :  { %v1306_v20 = vsel %vm482_vm6, %v1291_v9, %v1293_v37  ;;  %1540 = vrot.lane.b32.xlu1 %v1396_v31, %s3656_s0  ;;  %v4893_v9 = vsel %vm541_vm3, %v6786_v34, %v1761_v61  ;;  %v1913_v34 = vmul.f32 %v6969_v57, %v4825_v27 }
 0x312   :  { %v4884_v38 = vsel %vm99_vm9, %v1306_v20, 0.0  ;;  %v4899_v20 = vsel %vm254_vm2, %v6787_v7, %v1477_v47  ;;  %v1481_v54 = vrot.slane %v1385_v52, 1  ;;  %v6789_v52 = vrot.slane %v4935_v33, 2 }
 0x313   :  { %1319 = vst [vmem:[#allocation2 + $0x140] sm:$0xff] %v4884_v38  ;;  %v1297_v37 = vpop.permute.xlu1 %1296  ;;  %v5016_v3 = vmul.f32 %v6981_v51, %v4884_v38  ;;  %v2443_v40 = vmul.f32 %v6988_v41, %v4884_v38 }
 0x314   :  { %v1295_v31 = vpop.permute.xlu0 %1294  ;;  %v4961_v50 = vsel %vm254_vm2, %v1477_v47, %v1481_v54 }
 0x315   :  { %v1307_v16 = vsel %vm482_vm6, %v1295_v31, %v1297_v37  ;;  %1544 = vrot.lane.b32.xlu1 %v1398_v45, %s3656_s0  ;;  %v4921_v37 = vmul.f32 %v6973_v26, %v4858_v2  ;;  %v6975_v45 = vrot.slane %v4875_v18, 2 }
 0x316   :  { %v4915_v7 = vsel %vm99_vm9, %v1307_v16, 0.0  ;;  %v4917_v29 = vld [vmem:[#allocation2 + $0xf8] sm:$0x7f]  ;;  %v1400_v16 = vmul.f32 %v6974_v56, %v4825_v27 }
 0x317   :  { %v4926_v31 = vsel %vm541_vm3, %v1761_v61, %v6975_v45  ;;  %1320 = vst [vmem:[#allocation2 + $0x158] sm:$0xff] %v4915_v7  ;;  %v1301_v57 = vpop.permute.xlu1 %1300  ;;  %v1365_v63 = vmul.f32 %v6968_v55, %v4917_v29  ;;  %v6788_v61 = vrot.slane %v4907_v5, 1  ;;  %v2009_v45 = vrot.slane %v1913_v34, 1 }
 0x318   :  { %v1299_v15 = vpop.permute.xlu0 %1298  ;;  %v2993_v35 = vmul.f32 %v6981_v51, %v4915_v7 }
 0x319   :  { %v1308_v26 = vsel %vm482_vm6, %v1299_v15, %v1301_v57  ;;  %1448 = vrot.lane.b32.xlu0 %v1365_v63, %s3656_s0  ;;  %1548 = vrot.lane.b32.xlu1 %v1400_v16, %s3656_s0  ;;  %v6977_v63 = vld [vmem:[#allocation33_spill] sm:$0xff]  ;;  %v1402_v16 = vmul.f32 %v6974_v56, %v4858_v2  ;;  %v4955_v8 = vsel %vm254_vm2, %v2005_v58, %v2009_v45  ;;  %v6978_v58 = vrot.slane %v4921_v37, 1 }
 0x31a   :  { %v4943_v55 = vsel %vm99_vm9, %v1308_v26, 0.0  ;;  %v1419_v57 = vmul.f32 %v6977_v63, %v4816_v59  ;;  %v4966_v36 = vsel %vm254_vm2, %v2009_v45, %v6788_v61  ;;  %v1421_v47 = vmul.f32 %v6977_v63, %v4858_v2 }
 0x31b   :  { %1321 = vst [vmem:[#allocation2 + $0x170] sm:$0xff] %v4943_v55  ;;  %v1305_v15 = vpop.permute.xlu1 %1304  ;;  %v1418_v45 = vmul.f32 %v6977_v63, %v4903_v24  ;;  %v3087_v6 = vrot.slane %v2993_v35, 1  ;;  %v1893_v35 = vmul.f32 %v6980_v39, %v4917_v29 }
 0x31c   :  { %v1303_v34 = vpop.permute.xlu0 %1302 }
 0x31d   :  { %v1309_v26 = vsel %vm482_vm6, %v1303_v34, %v1305_v15  ;;  %1575 = vrot.lane.b32.xlu0 %v1419_v57, %s3656_s0  ;;  %1552 = vrot.lane.b32.xlu1 %v1402_v16, %s3656_s0  ;;  %v4975_v15 = vsel %vm254_vm2, %v1481_v54, %v6978_v58  ;;  %v2285_v57 = vrot.slane %v1955_v48, 2  ;;  %v1957_v16 = vmul.f32 %v6976_v28, %v4825_v27 }
 0x31e   :  { %v4970_v56 = vsel %vm4834_vm11, %v1309_v26, 0.0  ;;  %v4997_v26 = vmul.f32 %v6979_v30, %v4884_v38  ;;  %v5001_v58 = vmul.f32 %v6976_v28, %v4858_v2 }
 0x31f   :  { %1322 = vst [vmem:[#allocation2 + $0x188] sm:$0xff] %v4970_v56  ;;  %v4986_v34 = vmul.f32 %v6979_v30, %v4970_v56  ;;  %v4991_v54 = vsel %vm541_vm3, %v6789_v52, %v2285_v57  ;;  %v2289_v48 = vrot.slane %v1957_v16, 2  ;;  %v1890_v52 = vmul.f32 %v6980_v39, %v4807_v14 }
 0x320   :  { %v1420_v16 = vmul.f32 %v6977_v63, %v4825_v27  ;;  %v6791_v63 = vrot.slane %v4997_v26, 1  ;;  %v5054_v43 = vmul.f32 %v6981_v51, %v4970_v56 }
 0x321   :  { %1579 = vrot.lane.b32.xlu0 %v1421_v47, %s3656_s0  ;;  %1573 = vrot.lane.b32.xlu1 %v1418_v45, %s3656_s0  ;;  %v5004_v61 = vsel %vm541_vm3, %v2285_v57, %v2289_v48  ;;  %v6790_v47 = vrot.slane %v5001_v58, 2  ;;  %v2464_v45 = vmul.f32 %v6979_v30, %v4915_v7  ;;  %v2466_v57 = vmul.f32 %v6979_v30, %v4943_v55 }
 0x323   :  { %v5026_v42 = vsel %vm541_vm3, %v2289_v48, %v6790_v47  ;;  %v2558_v53 = vrot.slane %v2464_v45, 1  ;;  %v2562_v19 = vrot.slane %v2466_v57, 1  ;;  %v2995_v48 = vmul.f32 %v6981_v51, %v4943_v55 }
 0x324   :  { %v6982_v57 = vrot.slane %v4986_v34, 1 }
 0x325   :  { %1970 = vrot.lane.b32.xlu0 %v1890_v52, %s3656_s0  ;;  %1577 = vrot.lane.b32.xlu1 %v1420_v16, %s3656_s0  ;;  %v1891_v52 = vmul.f32 %v6980_v39, %v4816_v59  ;;  %v5037_v30 = vsel %vm254_vm2, %v6791_v63, %v2558_v53  ;;  %v6794_v16 = vrot.slane %v5016_v3, 1  ;;  %v5043_v45 = vsel %vm254_vm2, %v2558_v53, %v2562_v19  ;;  %v6984_v39 = vld [vmem:[#allocation38_spill] sm:$0xff] }
 0x326   :  { %v5048_v47 = vsel %vm254_vm2, %v2562_v19, %v6982_v57  ;;  %v3091_v63 = vrot.slane %v2995_v48, 1  ;;  %v1924_v19 = vmul.f32 %v6983_v13, %v4807_v14  ;;  %v1926_v14 = vmul.f32 %v6983_v13, %v4816_v59 }
 0x327   :  { %v5059_v53 = vsel %vm254_vm2, %v6794_v16, %v3087_v6  ;;  %v1947_v48 = vmul.f32 %v6984_v39, %v4816_v59  ;;  %v5084_v57 = vstv %s3543_s7 }
 0x328   :  { %6985 = vst [vmem:[#allocation30_spill] sm:$0xff] %v5084_v57  ;;  %v2510_v16 = vmul.f32 %v5084_v57, %v4943_v55 }
 0x329   :  { %1974 = vrot.lane.b32.xlu0 %v1892_v21, %s3656_s0  ;;  %1972 = vrot.lane.b32.xlu1 %v1891_v52, %s3656_s0  ;;  %v5066_v21 = vsel %vm254_vm2, %v3087_v6, %v3091_v63  ;;  %v6793_v52 = vrot.slane %v5054_v43, 1  ;;  %v5082_v6 = vld [vmem:[#allocation2 + $0x140] sm:$0xfe] }
 0x32a   :  { %v2842_v4 = vrot.slane %v2510_v16, 2 }
 0x32b   :  { %v5074_v51 = vsel %vm254_vm2, %v3091_v63, %v6793_v52  ;;  %v1949_v63 = vmul.f32 %v6984_v39, %v4858_v2  ;;  %v1930_v52 = vmul.f32 %v6983_v13, %v4858_v2 }
 0x32d   :  { %2068 = vrot.lane.b32.xlu0 %v1924_v19, %s3656_s0  ;;  %1976 = vrot.lane.b32.xlu1 %v1893_v35, %s3656_s0  ;;  %v1928_v19 = vmul.f32 %v6983_v13, %v4825_v27  ;;  %v5090_v35 = vstv %s3558_s8  ;;  %v5108_v13 = vmul.f32 %v5084_v57, %v4970_v56 }
 0x32e   :  { %6986 = vst [vmem:[#allocation36_spill] sm:$0xff] %v5090_v35  ;;  %v3039_v25 = vmul.f32 %v5090_v35, %v4943_v55  ;;  %v5123_v46 = vmul.f32 %v5090_v35, %v4970_v56 }
 0x32f   :  { %6989 = vst [vmem:[#allocation29_spill] sm:$0xff] %v5108_v13  ;;  %v6994_v44 = vrot.slane %v5108_v13, 2 }
 0x330   :  { %6991 = vst [vmem:[#allocation37_spill] sm:$0xff] %v5123_v46  ;;  %v3371_v0 = vrot.slane %v3039_v25, 2  ;;  %v6803_v25 = vrot.slane %v5123_v46, 2  ;;  %v5170_v46 = vld [vmem:[#allocation2 + $0x188] sm:$0x7f] }
 0x331   :  { %2072 = vrot.lane.b32.xlu0 %v1926_v14, %s3656_s0  ;;  %2103 = vrot.lane.b32.xlu1 %v1947_v48, %s3656_s0  ;;  %v5098_v14 = vmul.f32 %v5084_v57, %v5082_v6  ;;  %v2508_v48 = vmul.f32 %v5084_v57, %v4915_v7 }
 0x333   :  { %6987 = vst [vmem:[#allocation32_spill] sm:$0xff] %v5098_v14  ;;  %v6801_v60 = vrot.slane %v5098_v14, 2  ;;  %v2838_v1 = vrot.slane %v2508_v48, 2  ;;  %v5540_v14 = vld [vmem:[#allocation2 + $0xa8] sm:$0xfe] }
 0x335   :  { %2076 = vrot.lane.b32.xlu0 %v1928_v19, %s3656_s0  ;;  %2107 = vrot.lane.b32.xlu1 %v1949_v63, %s3656_s0  ;;  %v5112_v19 = vmul.f32 %v5090_v35, %v5082_v6  ;;  %v3037_v63 = vmul.f32 %v5090_v35, %v4915_v7  ;;  %v5130_v16 = vsel %vm541_vm3, %v6801_v60, %v2838_v1 }
 0x336   :  { %6992 = vst [vmem:[#allocation33_spill] sm:$0xff] %v5130_v16  ;;  %v5133_v48 = vsel %vm541_vm3, %v2838_v1, %v2842_v4  ;;  %v2445_v60 = vmul.f32 %v6988_v41, %v4943_v55 }
 0x337   :  { %6990 = vst [vmem:[#allocation31_spill] sm:$0xff] %v5112_v19  ;;  %v3367_v57 = vrot.slane %v3037_v63, 2  ;;  %6993 = vst [vmem:[#allocation40_spill] sm:$0xff] %v5133_v48  ;;  %v5138_v63 = vsel %vm541_vm3, %v2842_v4, %v6994_v44  ;;  %v6996_v35 = vrot.slane %v5112_v19, 2  ;;  %v5158_v44 = vsel %vm541_vm3, %v3371_v0, %v6803_v25 }
 0x338   :  { %6995 = vst [vmem:[#allocation34_spill] sm:$0xff] %v5138_v63  ;;  %6999 = vst [vmem:[#allocation38_spill] sm:$0xff] %v5158_v44  ;;  %v1948_v4 = vmul.f32 %v6984_v39, %v4825_v27 }
 0x339   :  { %2080 = vrot.lane.b32.xlu0 %v1930_v52, %s3656_s0  ;;  %2523 = vrot.lane.b32.xlu1 %v2443_v40, %s3656_s0  ;;  %v5143_v52 = vsel %vm541_vm3, %v6996_v35, %v3367_v57  ;;  %v1946_v40 = vmul.f32 %v6984_v39, %v4903_v24  ;;  %v5150_v1 = vsel %vm541_vm3, %v3367_v57, %v3371_v0  ;;  %v7000_v35 = vld [vmem:[#allocation41_spill] sm:$0xff] }
 0x33a   :  { %6997 = vst [vmem:[#allocation49_spill] sm:$0xff] %v5143_v52  ;;  %6998 = vst [vmem:[#allocation35_spill] sm:$0xff] %v5150_v1  ;;  %v2477_v52 = vmul.f32 %v7000_v35, %v4884_v38  ;;  %v2444_v57 = vmul.f32 %v6988_v41, %v4915_v7  ;;  %v2446_v0 = vmul.f32 %v6988_v41, %v5170_v46 }
 0x33d   :  { %2101 = vrot.lane.b32.xlu0 %v1946_v40, %s3656_s0  ;;  %2527 = vrot.lane.b32.xlu1 %v2445_v60, %s3656_s0  ;;  %v7001_v60 = vld [vmem:[#allocation44_spill] sm:$0xff] }
 0x33e   :  { %v2499_v40 = vmul.f32 %v7001_v60, %v5082_v6  ;;  %v2501_v39 = vmul.f32 %v7001_v60, %v4943_v55  ;;  %v2502_v41 = vmul.f32 %v7001_v60, %v4970_v56 }
 0x341   :  { %2105 = vrot.lane.b32.xlu0 %v1948_v4, %s3656_s0  ;;  %2621 = vrot.lane.b32.xlu1 %v2477_v52, %s3656_s0  ;;  %v2500_v52 = vmul.f32 %v7001_v60, %v4915_v7  ;;  %v7002_v4 = vld [vmem:[#allocation42_spill] sm:$0xff]  ;;  %v2481_v60 = vmul.f32 %v7000_v35, %v4943_v55 }
 0x342   :  { %v3029_v25 = vmul.f32 %v7002_v4, %v4915_v7 }
 0x345   :  { %2525 = vrot.lane.b32.xlu0 %v2444_v57, %s3656_s0  ;;  %2654 = vrot.lane.b32.xlu1 %v2499_v40, %s3656_s0  ;;  %v3031_v57 = vmul.f32 %v7002_v4, %v4970_v56  ;;  %v3028_v40 = vmul.f32 %v7002_v4, %v5082_v6 }
 0x349   :  { %2529 = vrot.lane.b32.xlu0 %v2446_v0, %s3656_s0  ;;  %2658 = vrot.lane.b32.xlu1 %v2501_v39, %s3656_s0  ;;  %v2479_v0 = vmul.f32 %v7000_v35, %v4915_v7  ;;  %v7003_v39 = vld [vmem:[#allocation45_spill] sm:$0xff] }
 0x34d   :  { %2656 = vrot.lane.b32.xlu0 %v2500_v52, %s3656_s0  ;;  %3185 = vrot.lane.b32.xlu1 %v3029_v25, %s3656_s0  ;;  %v3030_v25 = vmul.f32 %v7002_v4, %v4943_v55  ;;  %v3006_v52 = vmul.f32 %v7003_v39, %v4884_v38  ;;  %v3008_v4 = vmul.f32 %v7003_v39, %v4915_v7 }
 0x34e   :  { %v3010_v38 = vmul.f32 %v7003_v39, %v4943_v55 }
 0x351   :  { %2660 = vrot.lane.b32.xlu0 %v2502_v41, %s3656_s0  ;;  %3189 = vrot.lane.b32.xlu1 %v3031_v57, %s3656_s0  ;;  %v2483_v41 = vmul.f32 %v7000_v35, %v4970_v56  ;;  %v1425_v57 = vmul.f32 %v6972_v23, %v4903_v24  ;;  %v7004_v35 = vrot.slane %v4842_v22, 1  ;;  %v5235_v22 = vld [vmem:[#allocation2 + $0x110] sm:$0x1] }
 0x355   :  { %3183 = vrot.lane.b32.xlu0 %v3028_v40, %s3656_s0  ;;  %2625 = vrot.lane.b32.xlu1 %v2479_v0, %s3656_s0  ;;  %v1755_v40 = vrot.slane %v1425_v57, 2  ;;  %v3012_v0 = vmul.f32 %v7003_v39, %v4970_v56  ;;  %v1433_v39 = vmul.f32 %v5235_v22, %v6972_v23  ;;  %v7008_v57 = vrot.slane %v4921_v37, 1 }
 0x356   :  { %v7012_v37 = vrot.slane %v4997_v26, 1 }
 0x359   :  { %3187 = vrot.lane.b32.xlu0 %v3030_v25, %s3656_s0  ;;  %2629 = vrot.lane.b32.xlu1 %v2481_v60, %s3656_s0  ;;  %v7005_v25 = vrot.slane %v4907_v5, 1  ;;  %v7006_v60 = vrot.slane %v4846_v12, 2  ;;  %v1769_v5 = vrot.slane %v1433_v39, 2  ;;  %v7009_v12 = vrot.slane %v4935_v33, 2 }
 0x35a   :  { %v7014_v33 = vrot.slane %v4986_v34, 1 }
 0x35d   :  { %3150 = vrot.lane.b32.xlu0 %v3006_v52, %s3656_s0  ;;  %2633 = vrot.lane.b32.xlu1 %v2483_v41, %s3656_s0  ;;  %v1758_v52 = vsel %vm541_vm3, %v1755_v40, %v7006_v60  ;;  %v7007_v41 = vrot.slane %v4862_v10, 1  ;;  %v5247_v10 = vpop.permute.xlu1 %3113  ;;  %v1961_v60 = vmul.f32 %v5235_v22, %v6976_v28 }
 0x35e   :  { %7010 = vst [vmem:[#allocation39_spill] sm:$0xff] %v5247_v10 }
 0x361   :  { %3154 = vrot.lane.b32.xlu0 %v3008_v4, %s3656_s0  ;;  %1773 = vrot.lane.b32.xlu1 %v1755_v40, %s3658_s28  ;;  %v7011_v4 = vrot.slane %v4875_v18, 2  ;;  %v7016_v18 = vrot.slane %v5016_v3, 1 }
 0x363   :  { %v1770_v23 = vsel %vm541_vm3, %v7011_v4, %v1769_v5  ;;  %v2297_v4 = vrot.slane %v1961_v60, 2 }
 0x365   :  { %3158 = vrot.lane.b32.xlu0 %v3010_v38, %s3656_s0  ;;  %2017 = vrot.lane.b32.xlu1 %v7004_v35, %s3657_s23 }
 0x369   :  { %3162 = vrot.lane.b32.xlu0 %v3012_v0, %s3656_s0  ;;  %2033 = vrot.lane.b32.xlu1 %v7005_v25, %s3657_s23 }
 0x36d   :  { %1489 = vrot.lane.b32.xlu0 %v7007_v41, %s3657_s23  ;;  %1777 = vrot.lane.b32.xlu1 %v1758_v52, %s3658_s28 }
 0x371   :  { %1505 = vrot.lane.b32.xlu0 %v7008_v57, %s3657_s23  ;;  %1781 = vrot.lane.b32.xlu1 %v4893_v9, %s3658_s28 }
 0x375   :  { %2301 = vrot.lane.b32.xlu0 %v7009_v12, %s3658_s28  ;;  %1785 = vrot.lane.b32.xlu1 %v4926_v31, %s3658_s28 }
 0x377   :  { %v5258_v9 = vpop.permute.xlu1 %1442 }
 0x378   :  { %7013 = vst [vmem:[#allocation41_spill] sm:$0xff] %v5258_v9 }
 0x379   :  { %2570 = vrot.lane.b32.xlu0 %v7012_v37, %s3657_s23  ;;  %1789 = vrot.lane.b32.xlu1 %v1770_v23, %s3658_s28 }
 0x37b   :  { %v5278_v34 = vpop.permute.xlu0 %1444 }
 0x37c   :  { %7018 = vst [vmem:[#allocation45_spill] sm:$0xff] %v5278_v34 }
 0x37d   :  { %2586 = vrot.lane.b32.xlu0 %v7014_v33, %s3657_s23  ;;  %2021 = vrot.lane.b32.xlu1 %v4880_v49, %s3657_s23 }
 0x37f   :  { %v5265_v31 = vpop.permute.xlu1 %1446 }
 0x380   :  { %7015 = vst [vmem:[#allocation44_spill] sm:$0xff] %v5265_v31 }
 0x381   :  { %3099 = vrot.lane.b32.xlu0 %v7016_v18, %s3657_s23  ;;  %2025 = vrot.lane.b32.xlu1 %v4955_v8, %s3657_s23 }
 0x383   :  { %v5272_v26 = vpop.permute.xlu1 %1540 }
 0x384   :  { %7017 = vst [vmem:[#allocation42_spill] sm:$0xff] %v5272_v26 }
 0x385   :  { %1493 = vrot.lane.b32.xlu0 %v4899_v20, %s3657_s23  ;;  %2029 = vrot.lane.b32.xlu1 %v4966_v36, %s3657_s23  ;;  %v5294_v36 = vstv %s3516_s9 }
 0x386   :  { %v1409_v38 = vmul.f32 %v5294_v36, %v4816_v59  ;;  %v1413_v52 = vmul.f32 %v5294_v36, %v4858_v2  ;;  %v1411_v41 = vmul.f32 %v5294_v36, %v4825_v27  ;;  %v1406_v26 = vmul.f32 %v5294_v36, %v5540_v14 }
 0x387   :  { %v5280_v49 = vpop.permute.xlu1 %1544 }
 0x388   :  { %7019 = vst [vmem:[#allocation71_spill] sm:$0xff] %v5280_v49 }
 0x389   :  { %1497 = vrot.lane.b32.xlu0 %v4961_v50, %s3657_s23  ;;  %v1407_v50 = vmul.f32 %v5294_v36, %v4903_v24 }
 0x38b   :  { %v5284_v3 = vpop.permute.xlu0 %1448  ;;  %v5286_v40 = vpop.permute.xlu1 %1548 }
 0x38c   :  { %7020 = vst [vmem:[#allocation72_spill] sm:$0xff] %v5284_v3  ;;  %7021 = vst [vmem:[#allocation73_spill] sm:$0xff] %v5286_v40 }
 0x38d   :  { %1501 = vrot.lane.b32.xlu0 %v4975_v15, %s3657_s23 }
 0x38f   :  { %v5290_v8 = vpop.permute.xlu0 %1575  ;;  %v5292_v20 = vpop.permute.xlu1 %1552 }
 0x390   :  { %7022 = vst [vmem:[#allocation74_spill] sm:$0xff] %v5292_v20  ;;  %v1591_v35 = vadd.f32 %v5290_v8, %v1409_v38  ;;  %v7026_v38 = vrot.slane %v5001_v58, 2 }
 0x391   :  { %2305 = vrot.lane.b32.xlu0 %v4991_v54, %s3658_s28 }
 0x392   :  { %v1667_v39 = vrot.slane %v1591_v35, 1 }
 0x393   :  { %v5303_v0 = vpop.permute.xlu0 %1579  ;;  %v5305_v15 = vpop.permute.xlu1 %1573 }
 0x394   :  { %v1589_v25 = vadd.f32 %v5305_v15, %v1407_v50  ;;  %v5317_v57 = vadd.f32 %v5303_v0, %v1413_v52  ;;  %v2298_v50 = vsel %vm541_vm3, %v7026_v38, %v2297_v4 }
 0x395   :  { %2309 = vrot.lane.b32.xlu0 %v5004_v61, %s3658_s28 }
 0x396   :  { %v1666_v54 = vrot.slane %v1589_v25, 1  ;;  %v6804_v37 = vrot.slane %v5317_v57, 1 }
 0x397   :  { %v5319_v5 = vpop.permute.xlu0 %1970  ;;  %v5321_v12 = vpop.permute.xlu1 %1577 }
 0x398   :  { %7023 = vst [vmem:[#allocation75_spill] sm:$0xff] %v5319_v5  ;;  %v1593_v28 = vadd.f32 %v5321_v12, %v1411_v41  ;;  %v5327_v61 = vsel %vm254_vm2, %v1666_v54, %v1667_v39 }
 0x399   :  { %2313 = vrot.lane.b32.xlu0 %v5026_v42, %s3658_s28 }
 0x39a   :  { %v1671_v23 = vrot.slane %v1593_v28, 1 }
 0x39b   :  { %v5330_v33 = vpop.permute.xlu0 %1974  ;;  %v5332_v18 = vpop.permute.xlu1 %1972 }
 0x39c   :  { %7024 = vst [vmem:[#allocation76_spill] sm:$0xff] %v5330_v33  ;;  %7025 = vst [vmem:[#allocation77_spill] sm:$0xff] %v5332_v18  ;;  %v5339_v35 = vsel %vm254_vm2, %v1667_v39, %v1671_v23  ;;  %v5344_v42 = vsel %vm254_vm2, %v1671_v23, %v6804_v37  ;;  %v5364_v39 = vstv %s3526_s10 }
 0x39d   :  { %2317 = vrot.lane.b32.xlu0 %v2298_v50, %s3658_s28  ;;  %v1937_v28 = vmul.f32 %v5364_v39, %v4816_v59  ;;  %v1935_v23 = vmul.f32 %v5364_v39, %v4903_v24  ;;  %v1941_v37 = vmul.f32 %v5364_v39, %v4858_v2 }
 0x39f   :  { %v5346_v25 = vpop.permute.xlu0 %2068  ;;  %v5348_v60 = vpop.permute.xlu1 %1976 }
 0x3a0   :  { %7027 = vst [vmem:[#allocation78_spill] sm:$0xff] %v5346_v25  ;;  %7028 = vst [vmem:[#allocation79_spill] sm:$0xff] %v5348_v60 }
 0x3a1   :  { %2574 = vrot.lane.b32.xlu0 %v5037_v30, %s3657_s23 }
 0x3a3   :  { %v5352_v58 = vpop.permute.xlu0 %2072  ;;  %v5354_v52 = vpop.permute.xlu1 %2103 }
 0x3a4   :  { %7029 = vst [vmem:[#allocation80_spill] sm:$0xff] %v5352_v58  ;;  %v1337_v58 = vld [vmem:[#allocation2 + $0x100] sm:$0x7f] }
 0x3a5   :  { %2578 = vrot.lane.b32.xlu0 %v5043_v45, %s3657_s23  ;;  %v2119_v45 = vadd.f32 %v5354_v52, %v1937_v28 }
 0x3a7   :  { %v5358_v54 = vpop.permute.xlu0 %2076  ;;  %v5360_v41 = vpop.permute.xlu1 %2107  ;;  %v2195_v59 = vrot.slane %v2119_v45, 1 }
 0x3a8   :  { %7030 = vst [vmem:[#allocation81_spill] sm:$0xff] %v5358_v54  ;;  %v5389_v28 = vadd.f32 %v5360_v41, %v1941_v37 }
 0x3a9   :  { %2582 = vrot.lane.b32.xlu0 %v5048_v47, %s3657_s23 }
 0x3aa   :  { %v6809_v45 = vrot.slane %v5389_v28, 1 }
 0x3ab   :  { %v5366_v4 = vpop.permute.xlu0 %2080  ;;  %v5368_v30 = vpop.permute.xlu1 %2523 }
 0x3ac   :  { %7031 = vst [vmem:[#allocation82_spill] sm:$0xff] %v5366_v4  ;;  %7032 = vst [vmem:[#allocation83_spill] sm:$0xff] %v5368_v30 }
 0x3ad   :  { %3103 = vrot.lane.b32.xlu0 %v5059_v53, %s3657_s23  ;;  %v1939_v53 = vmul.f32 %v5364_v39, %v4825_v27 }
 0x3af   :  { %v5377_v38 = vpop.permute.xlu0 %2101  ;;  %v5379_v47 = vpop.permute.xlu1 %2527 }
 0x3b0   :  { %7033 = vst [vmem:[#allocation84_spill] sm:$0xff] %v5379_v47  ;;  %v2117_v50 = vadd.f32 %v5377_v38, %v1935_v23 }
 0x3b1   :  { %3107 = vrot.lane.b32.xlu0 %v5066_v21, %s3657_s23 }
 0x3b2   :  { %v2194_v18 = vrot.slane %v2117_v50, 1  ;;  %v7036_v50 = vrot.slane %v5054_v43, 1 }
 0x3b3   :  { %v5391_v24 = vpop.permute.xlu0 %2105  ;;  %v5393_v5 = vpop.permute.xlu1 %2621 }
 0x3b4   :  { %7034 = vst [vmem:[#allocation85_spill] sm:$0xff] %v5393_v5  ;;  %v2121_v23 = vadd.f32 %v5391_v24, %v1939_v53  ;;  %v5397_v2 = vsel %vm254_vm2, %v2194_v18, %v2195_v59  ;;  %v5442_v5 = vstv %s3556_s12 }
 0x3b5   :  { %3111 = vrot.lane.b32.xlu0 %v5074_v51, %s3657_s23 }
 0x3b6   :  { %v2199_v21 = vrot.slane %v2121_v23, 1  ;;  %v5421_v23 = vstv %s3541_s11 }
 0x3b7   :  { %v5402_v27 = vpop.permute.xlu0 %2525  ;;  %v5404_v37 = vpop.permute.xlu1 %2654  ;;  %v2488_v31 = vmul.f32 %v5421_v23, %v5082_v6  ;;  %v2492_v43 = vmul.f32 %v5421_v23, %v4943_v55  ;;  %v2494_v30 = vmul.f32 %v5421_v23, %v4970_v56 }
 0x3b8   :  { %7035 = vst [vmem:[#allocation86_spill] sm:$0xff] %v5402_v27  ;;  %v5410_v47 = vsel %vm254_vm2, %v2195_v59, %v2199_v21  ;;  %v5415_v18 = vsel %vm254_vm2, %v2199_v21, %v6809_v45  ;;  %v2490_v59 = vmul.f32 %v5421_v23, %v4915_v7 }
 0x3b9   :  { %3115 = vrot.lane.b32.xlu0 %v7036_v50, %s3657_s23  ;;  %v2670_v21 = vadd.f32 %v5404_v37, %v2488_v31  ;;  %s3522_s23 = sld [smem:[#allocation3 + $0x1f]] }
 0x3bb   :  { %v5417_v51 = vpop.permute.xlu0 %2529  ;;  %v5419_v53 = vpop.permute.xlu1 %2658  ;;  %v2747_v33 = vrot.slane %v2670_v21, 1 }
 0x3bc   :  { %7037 = vst [vmem:[#allocation87_spill] sm:$0xff] %v5417_v51  ;;  %v2674_v45 = vadd.f32 %v5419_v53, %v2492_v43  ;;  %v3019_v43 = vmul.f32 %v5442_v5, %v4915_v7  ;;  %v3023_v7 = vmul.f32 %v5442_v5, %v4970_v56 }
 0x3be   :  { %v2752_v60 = vrot.slane %v2674_v45, 1  ;;  %v3017_v45 = vmul.f32 %v5442_v5, %v5082_v6  ;;  %v3021_v6 = vmul.f32 %v5442_v5, %v4943_v55 }
 0x3bf   :  { %v5429_v50 = vpop.permute.xlu0 %2656  ;;  %v5433_v34 = vpop.permute.xlu1 %3185 }
 0x3c0   :  { %v2672_v9 = vadd.f32 %v5429_v50, %v2490_v59  ;;  %v3201_v1 = vadd.f32 %v5433_v34, %v3019_v43 }
 0x3c2   :  { %v2748_v27 = vrot.slane %v2672_v9, 1  ;;  %v3277_v54 = vrot.slane %v3201_v1, 1 }
 0x3c3   :  { %v5438_v51 = vpop.permute.xlu0 %2660  ;;  %v5440_v3 = vpop.permute.xlu1 %3189 }
 0x3c4   :  { %7038 = vst [vmem:[#allocation88_spill] sm:$0xff] %v5440_v3  ;;  %v5445_v31 = vadd.f32 %v5438_v51, %v2494_v30  ;;  %v5450_v59 = vsel %vm254_vm2, %v2747_v33, %v2748_v27  ;;  %v5453_v9 = vsel %vm254_vm2, %v2748_v27, %v2752_v60  ;;  %v5476_v43 = vadd.f32 %v5440_v3, %v3023_v7  ;;  %v1333_v7 = vld [vmem:[#allocation2 + $0xa0] sm:$0x80] }
 0x3c6   :  { %v6819_v21 = vrot.slane %v5445_v31, 1  ;;  %7040 = vst [vmem:[#allocation90_spill] sm:$0xff] %v5476_v43 }
 0x3c7   :  { %v5458_v44 = vpop.permute.xlu0 %3183  ;;  %v5461_v30 = vpop.permute.xlu1 %2625 }
 0x3c8   :  { %7039 = vst [vmem:[#allocation89_spill] sm:$0xff] %v5461_v30  ;;  %v3199_v4 = vadd.f32 %v5458_v44, %v3017_v45  ;;  %v5469_v33 = vsel %vm254_vm2, %v2752_v60, %v6819_v21 }
 0x3ca   :  { %v3276_v27 = vrot.slane %v3199_v4, 1  ;;  %v6821_v4 = vrot.slane %v5476_v43, 1  ;;  %v1588_v43 = vadd.f32 %v5305_v15, %v1406_v26 }
 0x3cb   :  { %v5473_v19 = vpop.permute.xlu0 %3187  ;;  %v5478_v30 = vpop.permute.xlu1 %2629 }
 0x3cc   :  { %7041 = vst [vmem:[#allocation91_spill] sm:$0xff] %v5478_v30  ;;  %v3203_v56 = vadd.f32 %v5473_v19, %v3021_v6  ;;  %v5482_v45 = vsel %vm254_vm2, %v3276_v27, %v3277_v54 }
 0x3ce   :  { %v3281_v60 = vrot.slane %v3203_v56, 1  ;;  %v5501_v56 = vstv %s3522_s23 }
 0x3cf   :  { %v5485_v21 = vpop.permute.xlu0 %3150  ;;  %v5487_v55 = vpop.permute.xlu1 %2633  ;;  %v1905_v13 = vmul.f32 %v5501_v56, %v1337_v58 }
 0x3d0   :  { %7042 = vst [vmem:[#allocation92_spill] sm:$0xff] %v5485_v21  ;;  %7043 = vst [vmem:[#allocation93_spill] sm:$0xff] %v5487_v55  ;;  %v5490_v1 = vsel %vm254_vm2, %v3277_v54, %v3281_v60  ;;  %v5495_v30 = vsel %vm254_vm2, %v3281_v60, %v6821_v4  ;;  %v1897_v21 = vmul.f32 %v5501_v56, %v1333_v7  ;;  %v5513_v4 = vstv %s3512_s13 }
 0x3d1   :  { %7044 = vst [vmem:[#allocation94_spill] sm:$0xff] %v5490_v1  ;;  %7045 = vst [vmem:[#allocation95_spill] sm:$0xff] %v5495_v30 }
 0x3d3   :  { %v5497_v6 = vpop.permute.xlu0 %3154  ;;  %v5499_v27 = vpop.permute.xlu1 %1773 }
 0x3d4   :  { %7046 = vst [vmem:[#allocation96_spill] sm:$0xff] %v5497_v6  ;;  %7047 = vst [vmem:[#allocation97_spill] sm:$0xff] %v5499_v27  ;;  %v1369_v6 = vmul.f32 %v5513_v4, %v1333_v7  ;;  %v5527_v7 = vstv %s3537_s14 }
 0x3d7   :  { %v5504_v55 = vpop.permute.xlu0 %3158  ;;  %v5506_v54 = vpop.permute.xlu1 %2017 }
 0x3d8   :  { %7048 = vst [vmem:[#allocation98_spill] sm:$0xff] %v5504_v55  ;;  %v2051_v25 = vadd.f32 %v5506_v54, %v1897_v21  ;;  %v1377_v21 = vmul.f32 %v5513_v4, %v1337_v58 }
 0x3da   :  { %2138 = vrot.lane.b32.xlu0 %v2051_v25, %s3658_s28 }
 0x3db   :  { %v5511_v60 = vpop.permute.xlu0 %3162  ;;  %v5515_v27 = vpop.permute.xlu1 %2033 }
 0x3dc   :  { %7049 = vst [vmem:[#allocation99_spill] sm:$0xff] %v5511_v60  ;;  %v2059_v63 = vadd.f32 %v5515_v27, %v1905_v13  ;;  %v5522_v60 = vld [vmem:[#allocation2 + $0x130] sm:$0x80] }
 0x3dd   :  { %7050 = vst [vmem:[#allocation100_spill] sm:$0xff] %v5522_v60  ;;  %v2450_v13 = vmul.f32 %v5527_v7, %v5522_v60 }
 0x3de   :  { %2154 = vrot.lane.b32.xlu0 %v2059_v63, %s3658_s28  ;;  %v5531_v63 = vld [vmem:[#allocation2 + $0x190] sm:$0x7f] }
 0x3df   :  { %v1490_v55 = vpop.permute.xlu0 %1489  ;;  %7052 = vst [vmem:[#allocation102_spill] sm:$0xff] %v5531_v63 }
 0x3e0   :  { %v1523_v48 = vadd.f32 %v1490_v55, %v1369_v6 }
 0x3e2   :  { %1610 = vrot.lane.b32.xlu1 %v1523_v48, %s3658_s28  ;;  %v2458_v48 = vmul.f32 %v5527_v7, %v5531_v63 }
 0x3e3   :  { %v1506_v25 = vpop.permute.xlu0 %1505 }
 0x3e4   :  { %v1531_v16 = vadd.f32 %v1506_v25, %v1377_v21  ;;  %v5538_v21 = vpop.permute.xlu1 %1777 }
 0x3e5   :  { %7053 = vst [vmem:[#allocation103_spill] sm:$0xff] %v5538_v21  ;;  %v5552_v21 = vld [vmem:[#allocation2 + $0x8] sm:$0xff] }
 0x3e6   :  { %1626 = vrot.lane.b32.xlu1 %v1531_v16, %s3658_s28 }
 0x3e7   :  { %v5525_v20 = vpop.permute.xlu0 %2301 }
 0x3e8   :  { %7051 = vst [vmem:[#allocation101_spill] sm:$0xff] %v5525_v20  ;;  %v3618_v20 = vld [vmem:[#allocation2 + $0x98] sm:$0x80]  ;;  %v5556_v63 = vpop.permute.xlu1 %1781 }
 0x3e9   :  { %v1368_v40 = vmul.f32 %v3618_v20, %v5513_v4 }
 0x3eb   :  { %v5533_v6 = vpop.permute.xlu0 %2570 }
 0x3ec   :  { %v2604_v58 = vadd.f32 %v5533_v6, %v2450_v13  ;;  %v7054_v13 = vld [vmem:[#allocation48_spill] sm:$0xff]  ;;  %v5573_v1 = vpop.permute.xlu1 %1785 }
 0x3ed   :  { %v1507_v10 = vsel %vm289_vm4, %v7054_v13, %v1490_v55  ;;  %7055 = vst [vmem:[#allocation48_spill] sm:$0xff] %v5556_v63  ;;  %v1511_v55 = vsel %vm289_vm4, %v4633_v32, %v1506_v25  ;;  %7057 = vst [vmem:[#allocation105_spill] sm:$0xff] %v5573_v1 }
 0x3ee   :  { %2691 = vrot.lane.b32.xlu0 %v2604_v58, %s3658_s28  ;;  %v1408_v58 = vmul.f32 %v5552_v21, %v5294_v36  ;;  %v1522_v3 = vadd.f32 %v1507_v10, %v1368_v40  ;;  %v1663_v40 = vrot.slane %v1588_v43, 1 }
 0x3ef   :  { %v5543_v16 = vpop.permute.xlu0 %2586 }
 0x3f0   :  { %v2612_v49 = vadd.f32 %v5543_v16, %v2458_v48  ;;  %v1371_v48 = vmul.f32 %v5552_v21, %v5513_v4  ;;  %v1590_v13 = vadd.f32 %v5290_v8, %v1408_v58  ;;  %v1594_v43 = vadd.f32 %v5303_v0, %v1408_v58 }
 0x3f1   :  { %v1415_v0 = vmul.f32 %v5235_v22, %v5294_v36 }
 0x3f2   :  { %2707 = vrot.lane.b32.xlu0 %v2612_v49, %s3658_s28  ;;  %v1376_v49 = vmul.f32 %v5513_v4, %v4917_v29  ;;  %v1664_v32 = vrot.slane %v1590_v13, 1 }
 0x3f3   :  { %v5558_v60 = vpop.permute.xlu0 %3099 }
 0x3f4   :  { %7056 = vst [vmem:[#allocation104_spill] sm:$0xff] %v5558_v60  ;;  %v1530_v63 = vadd.f32 %v1511_v55, %v1376_v49  ;;  %v1592_v60 = vadd.f32 %v5321_v12, %v1408_v58  ;;  %v1665_v25 = vsel %vm254_vm2, %v1663_v40, %v1664_v32 }
 0x3f6   :  { %1608 = vrot.lane.b32.xlu0 %v1522_v3, %s3658_s28  ;;  %v5579_v3 = vld [vmem:[#allocation2 + $0x108] sm:$0x1]  ;;  %v1669_v15 = vrot.slane %v1592_v60, 1 }
 0x3f7   :  { %v5569_v30 = vpop.permute.xlu0 %1493  ;;  %v1414_v12 = vmul.f32 %v5294_v36, %v5579_v3 }
 0x3f8   :  { %v1525_v10 = vadd.f32 %v5569_v30, %v1371_v48  ;;  %v1670_v13 = vsel %vm254_vm2, %v1664_v32, %v1669_v15 }
 0x3f9   :  { %v1596_v60 = vadd.f32 %v4649_v11, %v1414_v12 }
 0x3fa   :  { %1614 = vrot.lane.b32.xlu1 %v1525_v10, %s3658_s28  ;;  %1624 = vrot.lane.b32.xlu0 %v1530_v63, %s3658_s28  ;;  %v5588_v63 = vpop.permute.xlu1 %1789  ;;  %v1673_v10 = vrot.slane %v1594_v43, 1 }
 0x3fb   :  { %v5577_v26 = vpop.permute.xlu0 %1497  ;;  %v1677_v58 = vrot.slane %v1596_v60, 1 }
 0x3fc   :  { %v1527_v8 = vadd.f32 %v5577_v26, %v1371_v48 }
 0x3fe   :  { %1618 = vrot.lane.b32.xlu1 %v1527_v8, %s3658_s28  ;;  %1681 = vrot.lane.b32.xlu0 %v1665_v25, %s3659_s4  ;;  %v5597_v40 = vpop.permute.xlu1 %2021  ;;  %v1674_v8 = vsel %vm254_vm2, %v1669_v15, %v1673_v10  ;;  %v1678_v25 = vsel %vm254_vm2, %v1673_v10, %v1677_v58 }
 0x3ff   :  { %v5590_v55 = vpop.permute.xlu0 %1501 }
 0x400   :  { %v1529_v49 = vadd.f32 %v5590_v55, %v1371_v48  ;;  %v1899_v48 = vmul.f32 %v5552_v21, %v5501_v56 }
 0x402   :  { %1622 = vrot.lane.b32.xlu1 %v1529_v49, %s3658_s28  ;;  %1685 = vrot.lane.b32.xlu0 %v1670_v13, %s3659_s4  ;;  %v5614_v15 = vpop.permute.xlu1 %2025  ;;  %v2053_v12 = vadd.f32 %v5597_v40, %v1899_v48  ;;  %v1896_v49 = vmul.f32 %v3618_v20, %v5501_v56  ;;  %v1934_v13 = vmul.f32 %v5364_v39, %v5540_v14 }
 0x403   :  { %v5607_v32 = vpop.permute.xlu0 %2305  ;;  %v1936_v20 = vmul.f32 %v5552_v21, %v5364_v39 }
 0x404   :  { %7058 = vst [vmem:[#allocation106_spill] sm:$0xff] %v5607_v32  ;;  %v7150_v32 = vld [vmem:[#allocation99_spill] sm:$0xff] }
 0x405   :  { %v2118_v58 = vadd.f32 %v5354_v52, %v1936_v20  ;;  %v1942_v52 = vmul.f32 %v5364_v39, %v5579_v3 }
 0x406   :  { %1683 = vrot.lane.b32.xlu1 %v5327_v61, %s3659_s4  ;;  %1689 = vrot.lane.b32.xlu0 %v1674_v8, %s3659_s4  ;;  %v1597_v61 = vadd.f32 %v4649_v11, %v1415_v0  ;;  %v2035_v11 = vsel %vm289_vm4, %v4753_v17, %v5506_v54  ;;  %v5629_v60 = vpop.permute.xlu1 %2029  ;;  %v2116_v0 = vadd.f32 %v5377_v38, %v1934_v13 }
 0x407   :  { %v5620_v43 = vpop.permute.xlu0 %2309  ;;  %v2050_v8 = vadd.f32 %v2035_v11, %v1896_v49  ;;  %v2057_v14 = vadd.f32 %v5629_v60, %v1899_v48  ;;  %v2039_v17 = vsel %vm289_vm4, %v4771_v62, %v5515_v27  ;;  %v1943_v62 = vmul.f32 %v5235_v22, %v5364_v39 }
 0x408   :  { %v1679_v36 = vrot.slane %v1597_v61, 1  ;;  %7059 = vst [vmem:[#allocation107_spill] sm:$0xff] %v5620_v43  ;;  %v2191_v61 = vrot.slane %v2116_v0, 1  ;;  %v2192_v38 = vrot.slane %v2118_v58, 1  ;;  %v2452_v39 = vmul.f32 %v5552_v21, %v5527_v7  ;;  %v7063_v0 = vld [vmem:[#allocation43_spill] sm:$0xff]  ;;  %v7149_v43 = vld [vmem:[#allocation61_spill] sm:$0xff] }
 0x40a   :  { %1687 = vrot.lane.b32.xlu1 %v5339_v35, %s3659_s4  ;;  %1693 = vrot.lane.b32.xlu0 %v1678_v25, %s3659_s4  ;;  %v2055_v35 = vadd.f32 %v5614_v15, %v1899_v48  ;;  %v2120_v48 = vadd.f32 %v5391_v24, %v1936_v20  ;;  %v7061_v24 = vld [vmem:[#allocation58_spill] sm:$0xff] }
 0x40b   :  { %v5643_v54 = vpop.permute.xlu0 %2313 }
 0x40c   :  { %v2197_v27 = vrot.slane %v2120_v48, 1 }
 0x40e   :  { %1691 = vrot.lane.b32.xlu1 %v5344_v42, %s3659_s4  ;;  %2142 = vrot.lane.b32.xlu0 %v2053_v12, %s3658_s28  ;;  %v7060_v42 = vrot.slane %v5317_v57, 1  ;;  %v1904_v57 = vmul.f32 %v5501_v56, %v4917_v29  ;;  %v2193_v12 = vsel %vm254_vm2, %v2191_v61, %v2192_v38  ;;  %v2198_v22 = vsel %vm254_vm2, %v2192_v38, %v2197_v27 }
 0x40f   :  { %v5656_v29 = vpop.permute.xlu0 %2317 }
 0x410   :  { %v1680_v10 = vsel %vm254_vm2, %v7060_v42, %v1679_v36  ;;  %v2058_v25 = vadd.f32 %v2039_v17, %v1904_v57  ;;  %v2125_v36 = vadd.f32 %v7061_v24, %v1943_v62  ;;  %v2489_v57 = vmul.f32 %v5552_v21, %v5421_v23  ;;  %v7064_v62 = vld [vmem:[#allocation52_spill] sm:$0xff] }
 0x412   :  { %1695 = vrot.lane.b32.xlu1 %v1680_v10, %s3659_s4  ;;  %2146 = vrot.lane.b32.xlu0 %v2055_v35, %s3658_s28  ;;  %v2124_v35 = vadd.f32 %v7061_v24, %v1942_v52  ;;  %v2207_v13 = vrot.slane %v2125_v36, 1  ;;  %v2671_v48 = vadd.f32 %v5429_v50, %v2489_v57 }
 0x413   :  { %v5666_v49 = vpop.permute.xlu0 %2574 }
 0x414   :  { %v2205_v42 = vrot.slane %v2124_v35, 1  ;;  %v2745_v36 = vrot.slane %v2671_v48, 1  ;;  %v5761_v48 = vld [vmem:[#allocation2 + $0xb0] sm:$0xff] }
 0x416   :  { %2136 = vrot.lane.b32.xlu1 %v2050_v8, %s3658_s28  ;;  %2150 = vrot.lane.b32.xlu0 %v2057_v14, %s3658_s28  ;;  %v2606_v14 = vadd.f32 %v5666_v49, %v2452_v39 }
 0x417   :  { %v5681_v10 = vpop.permute.xlu0 %2578 }
 0x418   :  { %v2608_v61 = vadd.f32 %v5681_v10, %v2452_v39 }
 0x41a   :  { %2152 = vrot.lane.b32.xlu1 %v2058_v25, %s3658_s28  ;;  %2211 = vrot.lane.b32.xlu0 %v5397_v2, %s3659_s4  ;;  %v2122_v2 = vadd.f32 %v5360_v41, %v1936_v20  ;;  %v7062_v41 = vrot.slane %v5389_v28, 1  ;;  %v5683_v20 = vld [vmem:[#allocation2 + $0x128] sm:$0x80]  ;;  %v2588_v28 = vsel %vm289_vm4, %v7063_v0, %v5533_v6  ;;  %v2592_v6 = vsel %vm289_vm4, %v7064_v62, %v5543_v16 }
 0x41b   :  { %v2449_v8 = vmul.f32 %v5683_v20, %v5527_v7  ;;  %v5702_v38 = vpop.permute.xlu0 %2582  ;;  %v2673_v16 = vadd.f32 %v5419_v53, %v2489_v57 }
 0x41c   :  { %v2208_v11 = vsel %vm254_vm2, %v7062_v41, %v2207_v13  ;;  %v2610_v24 = vadd.f32 %v5702_v38, %v2452_v39  ;;  %v5722_v13 = vld [vmem:[#allocation2 + $0x1a0] sm:$0x1] }
 0x41d   :  { %v2603_v25 = vadd.f32 %v2588_v28, %v2449_v8  ;;  %v2750_v53 = vrot.slane %v2673_v16, 1 }
 0x41e   :  { %2209 = vrot.lane.b32.xlu1 %v2193_v12, %s3659_s4  ;;  %2215 = vrot.lane.b32.xlu0 %v5410_v47, %s3659_s4  ;;  %v2201_v47 = vrot.slane %v2122_v2, 1  ;;  %v5713_v2 = vld [vmem:[#allocation2 + $0x198] sm:$0x1] }
 0x41f   :  { %v5744_v0 = vpop.permute.xlu0 %3103 }
 0x420   :  { %v2202_v3 = vsel %vm254_vm2, %v2197_v27, %v2201_v47  ;;  %v2206_v17 = vsel %vm254_vm2, %v2201_v47, %v2205_v42  ;;  %v2457_v27 = vmul.f32 %v5527_v7, %v5170_v46  ;;  %v2496_v47 = vmul.f32 %v5722_v13, %v5421_v23 }
 0x421   :  { %v5735_v42 = vmul.f32 %v5552_v21, %v5442_v5 }
 0x422   :  { %2213 = vrot.lane.b32.xlu1 %v2198_v22, %s3659_s4  ;;  %2219 = vrot.lane.b32.xlu0 %v5415_v18, %s3659_s4  ;;  %v2422_v18 = vld [vmem:[#allocation2 + $0x138] sm:$0xfe]  ;;  %v2611_v52 = vadd.f32 %v2592_v6, %v2457_v27  ;;  %v2675_v22 = vadd.f32 %v5438_v51, %v2489_v57  ;;  %v2751_v51 = vsel %vm254_vm2, %v2745_v36, %v2750_v53  ;;  %v7066_v57 = vrot.slane %v5445_v31, 1 }
 0x423   :  { %v2487_v58 = vmul.f32 %v5421_v23, %v2422_v18  ;;  %v1370_v31 = vmul.f32 %v5761_v48, %v5513_v4  ;;  %v5765_v62 = vpop.permute.xlu0 %3107  ;;  %v7068_v27 = vld [vmem:[#allocation51_spill] sm:$0xff] }
 0x424   :  { %v2754_v39 = vrot.slane %v2675_v22, 1 }
 0x425   :  { %v2669_v12 = vadd.f32 %v5404_v37, %v2487_v58  ;;  %v2495_v37 = vmul.f32 %v5421_v23, %v5713_v2 }
 0x426   :  { %2217 = vrot.lane.b32.xlu1 %v2202_v3, %s3659_s4  ;;  %2223 = vrot.lane.b32.xlu0 %v2208_v11, %s3659_s4  ;;  %v3016_v3 = vmul.f32 %v5442_v5, %v2422_v18  ;;  %v2755_v8 = vsel %vm254_vm2, %v2750_v53, %v2754_v39 }
 0x427   :  { %v2744_v50 = vrot.slane %v2669_v12, 1  ;;  %v2036_v12 = vsel %vm289_vm4, %v7068_v27, %v5597_v40  ;;  %v5787_v22 = vpop.permute.xlu0 %3111  ;;  %v7078_v27 = vld [vmem:[#allocation6_spill] sm:$0xff] }
 0x428   :  { %v3198_v23 = vadd.f32 %v5458_v44, %v3016_v3 }
 0x429   :  { %v2746_v35 = vsel %vm254_vm2, %v2744_v50, %v2745_v36  ;;  %v1898_v36 = vmul.f32 %v5761_v48, %v5501_v56  ;;  %v5781_v50 = vld [vmem:[#allocation2 + $0xc8] sm:$0xff] }
 0x42a   :  { %2221 = vrot.lane.b32.xlu1 %v2206_v17, %s3659_s4  ;;  %2695 = vrot.lane.b32.xlu0 %v2606_v14, %s3658_s28  ;;  %v3273_v28 = vrot.slane %v3198_v23, 1  ;;  %v5748_v17 = vadd.f32 %v5473_v19, %v5735_v42  ;;  %v1900_v53 = vmul.f32 %v5781_v50, %v5501_v56 }
 0x42b   :  { %v2052_v40 = vadd.f32 %v2036_v12, %v1898_v36  ;;  %v2591_v12 = vsel %vm289_vm4, %v7078_v27, %v5702_v38  ;;  %v5845_v36 = vld [vmem:[#allocation2 + $0x170] sm:$0xff] }
 0x42e   :  { %2689 = vrot.lane.b32.xlu1 %v2603_v25, %s3658_s28  ;;  %2699 = vrot.lane.b32.xlu0 %v2608_v61, %s3658_s28  ;;  %v7067_v25 = vld [vmem:[#allocation50_spill] sm:$0xff] }
 0x42f   :  { %v1508_v61 = vsel %vm289_vm4, %v7067_v25, %v5569_v30  ;;  %v7069_v30 = vld [vmem:[#allocation8_spill] sm:$0xff] }
 0x430   :  { %v1524_v6 = vadd.f32 %v1508_v61, %v1370_v31  ;;  %v7077_v61 = vld [vmem:[#allocation95_spill] sm:$0xff] }
 0x432   :  { %2705 = vrot.lane.b32.xlu1 %v2611_v52, %s3658_s28  ;;  %2703 = vrot.lane.b32.xlu0 %v2610_v24, %s3658_s28  ;;  %v1509_v52 = vsel %vm289_vm4, %v7069_v30, %v5577_v26  ;;  %v7070_v26 = vld [vmem:[#allocation53_spill] sm:$0xff] }
 0x436   :  { %2762 = vrot.lane.b32.xlu1 %v2746_v35, %s3659_s4  ;;  %2764 = vrot.lane.b32.xlu0 %v5450_v59, %s3659_s4  ;;  %v7065_v59 = vld [vmem:[#allocation54_spill] sm:$0xff]  ;;  %v2037_v35 = vsel %vm289_vm4, %v7070_v26, %v5614_v15  ;;  %v7072_v15 = vld [vmem:[#allocation55_spill] sm:$0xff] }
 0x437   :  { %v2677_v41 = vadd.f32 %v7065_v59, %v2495_v37  ;;  %v2678_v11 = vadd.f32 %v7065_v59, %v2496_v47  ;;  %v7071_v37 = vld [vmem:[#allocation12_spill] sm:$0xff] }
 0x438   :  { %v1510_v47 = vsel %vm289_vm4, %v7071_v37, %v5590_v55 }
 0x439   :  { %v2758_v18 = vrot.slane %v2677_v41, 1  ;;  %v2760_v14 = vrot.slane %v2678_v11, 1  ;;  %v2038_v41 = vsel %vm289_vm4, %v7072_v15, %v5629_v60  ;;  %v5808_v11 = vpop.permute.xlu0 %3115 }
 0x43a   :  { %2766 = vrot.lane.b32.xlu1 %v2751_v51, %s3659_s4  ;;  %2768 = vrot.lane.b32.xlu0 %v5453_v9, %s3659_s4  ;;  %v3200_v9 = vadd.f32 %v5433_v34, %v5735_v42  ;;  %v3279_v34 = vrot.slane %v5748_v17, 1  ;;  %v2054_v51 = vadd.f32 %v2037_v35, %v1900_v53 }
 0x43b   :  { %v2759_v44 = vsel %vm254_vm2, %v2754_v39, %v2758_v18  ;;  %v2761_v58 = vsel %vm254_vm2, %v7066_v57, %v2760_v14  ;;  %v5797_v39 = vld [vmem:[#allocation2 + $0xe0] sm:$0xff] }
 0x43c   :  { %v1374_v3 = vmul.f32 %v5797_v39, %v5513_v4  ;;  %v1902_v55 = vmul.f32 %v5797_v39, %v5501_v56  ;;  %v5817_v14 = vld [vmem:[#allocation2 + $0x140] sm:$0xff] }
 0x43d   :  { %v2451_v56 = vmul.f32 %v5817_v14, %v5527_v7 }
 0x43e   :  { %2770 = vrot.lane.b32.xlu1 %v2755_v8, %s3659_s4  ;;  %2772 = vrot.lane.b32.xlu0 %v5469_v33, %s3659_s4  ;;  %v3274_v33 = vrot.slane %v3200_v9, 1  ;;  %v1528_v59 = vadd.f32 %v1510_v47, %v1374_v3  ;;  %v2056_v23 = vadd.f32 %v2038_v41, %v1902_v55  ;;  %v7073_v8 = vld [vmem:[#allocation7_spill] sm:$0xff]  ;;  %v7074_v9 = vld [vmem:[#allocation94_spill] sm:$0xff]  ;;  %v5863_v3 = vstv %s3552_s16 }
 0x43f   :  { %v2589_v18 = vsel %vm289_vm4, %v7073_v8, %v5666_v49  ;;  %v2980_v17 = vmul.f32 %v5817_v14, %v5863_v3 }
 0x440   :  { %v3275_v19 = vsel %vm254_vm2, %v3273_v28, %v3274_v33  ;;  %v3280_v24 = vsel %vm254_vm2, %v3274_v33, %v3279_v34  ;;  %v7075_v28 = vld [vmem:[#allocation64_spill] sm:$0xff]  ;;  %v2605_v57 = vadd.f32 %v2589_v18, %v2451_v56  ;;  %v5830_v33 = vld [vmem:[#allocation2 + $0x158] sm:$0xff]  ;;  %v7084_v18 = vld [vmem:[#allocation65_spill] sm:$0xff] }
 0x441   :  { %v2453_v25 = vmul.f32 %v5830_v33, %v5527_v7  ;;  %v3118_v56 = vsel %vm289_vm4, %v7084_v18, %v5744_v0 }
 0x442   :  { %2774 = vrot.lane.b32.xlu1 %v2759_v44, %s3659_s4  ;;  %2776 = vrot.lane.b32.xlu0 %v2761_v58, %s3659_s4  ;;  %v7076_v58 = vld [vmem:[#allocation13_spill] sm:$0xff] }
 0x443   :  { %v2590_v49 = vsel %vm289_vm4, %v7076_v58, %v5681_v10  ;;  %v7079_v10 = vld [vmem:[#allocation90_spill] sm:$0xff]  ;;  %v7086_v58 = vld [vmem:[#allocation67_spill] sm:$0xff] }
 0x444   :  { %v2607_v31 = vadd.f32 %v2590_v49, %v2453_v25  ;;  %v7080_v30 = vrot.slane %v7079_v10, 1  ;;  %v3119_v49 = vsel %vm289_vm4, %v7086_v58, %v5765_v62  ;;  %v2982_v25 = vmul.f32 %v5830_v33, %v5863_v3 }
 0x446   :  { %3291 = vrot.lane.b32.xlu1 %v3275_v19, %s3659_s4  ;;  %3293 = vrot.lane.b32.xlu0 %v5482_v45, %s3659_s4  ;;  %v1372_v45 = vmul.f32 %v5781_v50, %v5513_v4  ;;  %v3025_v4 = vmul.f32 %v5722_v13, %v5442_v5 }
 0x448   :  { %v1526_v16 = vadd.f32 %v1509_v52, %v1372_v45  ;;  %v3207_v44 = vadd.f32 %v7075_v28, %v3025_v4  ;;  %v2455_v45 = vmul.f32 %v5845_v36, %v5527_v7 }
 0x44a   :  { %3295 = vrot.lane.b32.xlu1 %v3280_v24, %s3659_s4  ;;  %1612 = vrot.lane.b32.xlu0 %v1524_v6, %s3658_s28  ;;  %v3289_v19 = vrot.slane %v3207_v44, 1  ;;  %v2970_v24 = vstv %s3551_s15  ;;  %v2609_v26 = vadd.f32 %v2591_v12, %v2455_v45  ;;  %v7088_v12 = vld [vmem:[#allocation69_spill] sm:$0xff] }
 0x44b   :  { %v2972_v37 = vmul.f32 %v5817_v14, %v2970_v24  ;;  %v2973_v27 = vmul.f32 %v5830_v33, %v2970_v24  ;;  %v3120_v10 = vsel %vm289_vm4, %v7088_v12, %v5787_v22  ;;  %v7096_v12 = vld [vmem:[#allocation16_spill] sm:$0xff] }
 0x44c   :  { %v5821_v60 = vpop.permute.xlu0 %2138  ;;  %v3290_v52 = vsel %vm254_vm2, %v7080_v30, %v3289_v19  ;;  %v2984_v30 = vmul.f32 %v5845_v36, %v5863_v3 }
 0x44e   :  { %2140 = vrot.lane.b32.xlu1 %v2052_v40, %s3658_s28  ;;  %1616 = vrot.lane.b32.xlu0 %v1526_v16, %s3658_s28  ;;  %v3024_v40 = vmul.f32 %v5442_v5, %v5713_v2  ;;  %v7081_v16 = vld [vmem:[#allocation88_spill] sm:$0xff]  ;;  %v2978_v5 = vmul.f32 %v5683_v20, %v5863_v3 }
 0x44f   :  { %v3204_v38 = vadd.f32 %v7081_v16, %v5735_v42  ;;  %v2974_v42 = vmul.f32 %v5845_v36, %v2970_v24 }
 0x450   :  { %v5837_v6 = vpop.permute.xlu0 %2154  ;;  %v3206_v7 = vadd.f32 %v7075_v28, %v3024_v40  ;;  %v3134_v28 = vadd.f32 %v3118_v56, %v2980_v17  ;;  %v3138_v40 = vadd.f32 %v3120_v10, %v2984_v30  ;;  %v7097_v10 = vld [vmem:[#allocation73_spill] sm:$0xff] }
 0x451   :  { %v3283_v53 = vrot.slane %v3204_v38, 1  ;;  %v1558_v30 = vsel %vm339_vm5, %v7097_v10, %v7096_v12  ;;  %v7106_v12 = vld [vmem:[#allocation30_spill] sm:$0xff] }
 0x452   :  { %2144 = vrot.lane.b32.xlu1 %v2054_v51, %s3658_s28  ;;  %1620 = vrot.lane.b32.xlu0 %v1528_v59, %s3658_s28  ;;  %v7082_v51 = vld [vmem:[#allocation104_spill] sm:$0xff]  ;;  %v7083_v59 = vld [vmem:[#allocation63_spill] sm:$0xff]  ;;  %v3287_v55 = vrot.slane %v3206_v7, 1  ;;  %v2514_v10 = vmul.f32 %v5722_v13, %v7106_v12 }
 0x453   :  { %v3117_v15 = vsel %vm289_vm4, %v7083_v59, %v7082_v51  ;;  %v3284_v41 = vsel %vm254_vm2, %v3279_v34, %v3283_v53  ;;  %v2971_v34 = vmul.f32 %v5683_v20, %v2970_v24  ;;  %v7091_v7 = vld [vmem:[#allocation39_spill] sm:$0xff]  ;;  %v7093_v59 = vld [vmem:[#allocation42_spill] sm:$0xff] }
 0x454   :  { %v5858_v47 = vpop.permute.xlu1 %1610  ;;  %v3132_v4 = vadd.f32 %v3117_v15, %v2978_v5  ;;  %v2986_v5 = vmul.f32 %v5863_v3, %v5170_v46 }
 0x456   :  { %3297 = vrot.lane.b32.xlu0 %v7074_v9, %s3659_s4  ;;  %2148 = vrot.lane.b32.xlu1 %v2056_v23, %s3658_s28  ;;  %v3288_v9 = vsel %vm254_vm2, %v3283_v53, %v3287_v55  ;;  %v3121_v53 = vsel %vm289_vm4, %v7091_v7, %v5808_v11  ;;  %v2981_v55 = vmul.f32 %v5552_v21, %v5863_v3 }
 0x458   :  { %v5878_v23 = vpop.permute.xlu1 %1626  ;;  %v3137_v7 = vadd.f32 %v5765_v62, %v2981_v55 }
 0x45a   :  { %3301 = vrot.lane.b32.xlu0 %v7077_v61, %s3659_s4  ;;  %2693 = vrot.lane.b32.xlu1 %v2605_v57, %s3658_s28  ;;  %v3136_v61 = vadd.f32 %v3119_v49, %v2982_v25  ;;  %v3135_v49 = vadd.f32 %v5744_v0, %v2981_v55 }
 0x45e   :  { %3305 = vrot.lane.b32.xlu0 %v3290_v52, %s3659_s4  ;;  %2697 = vrot.lane.b32.xlu1 %v2607_v31, %s3658_s28  ;;  %v7089_v52 = vld [vmem:[#allocation100_spill] sm:$0xff] }
 0x45f   :  { %v2979_v45 = vmul.f32 %v5863_v3, %v7089_v52 }
 0x460   :  { %v5855_v35 = vpop.permute.xlu0 %2691 }
 0x462   :  { %3052 = vrot.lane.b32.xlu0 %v2972_v37, %s3656_s0  ;;  %2701 = vrot.lane.b32.xlu1 %v2609_v26, %s3658_s28  ;;  %v2975_v26 = vmul.f32 %v2970_v24, %v5170_v46  ;;  %v1389_v37 = vstv %s3514_s1  ;;  %v3133_v24 = vadd.f32 %v7082_v51, %v2979_v45  ;;  %v7095_v46 = vld [vmem:[#allocation71_spill] sm:$0xff] }
 0x463   :  { %v1391_v58 = vmul.f32 %v5781_v50, %v1389_v37  ;;  %v1392_v52 = vmul.f32 %v5797_v39, %v1389_v37 }
 0x464   :  { %v5867_v2 = vpop.permute.xlu0 %2707 }
 0x465   :  { %v1566_v0 = vadd.f32 %v1558_v30, %v1392_v52 }
 0x466   :  { %3056 = vrot.lane.b32.xlu0 %v2974_v42, %s3656_s0  ;;  %3299 = vrot.lane.b32.xlu1 %v3284_v41, %s3659_s4  ;;  %v7092_v42 = vld [vmem:[#allocation10_spill] sm:$0xff]  ;;  %v1390_v41 = vmul.f32 %v5761_v48, %v1389_v37 }
 0x467   :  { %v1556_v15 = vsel %vm339_vm5, %v7093_v59, %v7092_v42 }
 0x468   :  { %v5880_v8 = vpop.permute.xlu0 %1608 }
 0x46a   :  { %3218 = vrot.lane.b32.xlu0 %v3132_v4, %s3658_s28  ;;  %3303 = vrot.lane.b32.xlu1 %v3288_v9, %s3659_s4  ;;  %v3140_v4 = vadd.f32 %v3121_v53, %v2986_v5  ;;  %v7094_v9 = vld [vmem:[#allocation11_spill] sm:$0xff] }
 0x46b   :  { %v1557_v17 = vsel %vm339_vm5, %v7095_v46, %v7094_v9  ;;  %v7103_v46 = vld [vmem:[#allocation33_spill] sm:$0xff] }
 0x46c   :  { %v5891_v44 = vpop.permute.xlu0 %1624  ;;  %v5893_v57 = vpop.permute.xlu1 %1614  ;;  %v1565_v51 = vadd.f32 %v1557_v17, %v1391_v58  ;;  %v5969_v17 = vld [vmem:[#allocation2 + $0x148] sm:$0xfe] }
 0x46d   :  { %7085 = vst [vmem:[#allocation58_spill] sm:$0xff] %v5893_v57  ;;  %v7165_v57 = vld [vmem:[#allocation97_spill] sm:$0xff] }
 0x46e   :  { %3222 = vrot.lane.b32.xlu0 %v3134_v28, %s3658_s28  ;;  %3050 = vrot.lane.b32.xlu1 %v2971_v34, %s3656_s0  ;;  %v1564_v28 = vadd.f32 %v1556_v15, %v1390_v41  ;;  %v7101_v15 = vld [vmem:[#allocation19_spill] sm:$0xff] }
 0x470   :  { %v1682_v19 = vpop.permute.xlu0 %1681  ;;  %v5902_v31 = vpop.permute.xlu1 %1618 }
 0x471   :  { %7087 = vst [vmem:[#allocation43_spill] sm:$0xff] %v5902_v31 }
 0x472   :  { %3226 = vrot.lane.b32.xlu0 %v3136_v61, %s3658_s28  ;;  %3054 = vrot.lane.b32.xlu1 %v2973_v27, %s3656_s0 }
 0x474   :  { %v1686_v16 = vpop.permute.xlu0 %1685  ;;  %v5914_v38 = vpop.permute.xlu1 %1622 }
 0x475   :  { %7090 = vst [vmem:[#allocation52_spill] sm:$0xff] %v5914_v38 }
 0x476   :  { %3230 = vrot.lane.b32.xlu0 %v3138_v40, %s3658_s28  ;;  %3058 = vrot.lane.b32.xlu1 %v2975_v26, %s3656_s0  ;;  %v7098_v40 = vld [vmem:[#allocation32_spill] sm:$0xff] }
 0x477   :  { %v7099_v26 = vrot.slane %v7098_v40, 2 }
 0x478   :  { %v1690_v18 = vpop.permute.xlu0 %1689  ;;  %v1684_v56 = vpop.permute.xlu1 %1683 }
 0x479   :  { %v1697_v34 = vsel %vm482_vm6, %v1682_v19, %v1684_v56 }
 0x47a   :  { %3234 = vrot.lane.b32.xlu0 %v3140_v4, %s3658_s28  ;;  %3220 = vrot.lane.b32.xlu1 %v3133_v24, %s3658_s28  ;;  %v5939_v25 = vadd.f32 %v1697_v34, %v1564_v28  ;;  %v5958_v4 = vld [vmem:[#allocation2 + $0xf8] sm:$0xff]  ;;  %v7104_v28 = vld [vmem:[#allocation102_spill] sm:$0xff] }
 0x47b   :  { %v1393_v56 = vmul.f32 %v5958_v4, %v1389_v37  ;;  %v2987_v58 = vmul.f32 %v5863_v3, %v7104_v28 }
 0x47c   :  { %v1694_v61 = vpop.permute.xlu0 %1693  ;;  %v1688_v27 = vpop.permute.xlu1 %1687  ;;  %v1713_v53 = vrot.slane %v5939_v25, 1 }
 0x47d   :  { %v1698_v19 = vsel %vm482_vm6, %v1686_v16, %v1688_v27  ;;  %v7102_v16 = vld [vmem:[#allocation74_spill] sm:$0xff] }
 0x47e   :  { %v1706_v45 = vadd.f32 %v1698_v19, %v1565_v51  ;;  %2854 = vrot.lane.b32.xlu0 %v7099_v26, %s3658_s28  ;;  %3224 = vrot.lane.b32.xlu1 %v3135_v49, %s3658_s28  ;;  %v1559_v41 = vsel %vm339_vm5, %v7102_v16, %v7101_v15  ;;  %v7107_v19 = vld [vmem:[#allocation40_spill] sm:$0xff]  ;;  %v2850_v26 = vrot.slane %v2514_v10, 2  ;;  %v1917_v16 = vstv %s3524_s17 }
 0x47f   :  { %v1567_v34 = vadd.f32 %v1559_v41, %v1393_v56  ;;  %v7109_v41 = vld [vmem:[#allocation29_spill] sm:$0xff]  ;;  %v1918_v28 = vmul.f32 %v5761_v48, %v1917_v16  ;;  %v7114_v10 = vld [vmem:[#allocation80_spill] sm:$0xff] }
 0x480   :  { %v1714_v5 = vrot.slane %v1706_v45, 1  ;;  %v5952_v42 = vpop.permute.xlu0 %2142  ;;  %v1692_v59 = vpop.permute.xlu1 %1691 }
 0x481   :  { %7100 = vst [vmem:[#allocation54_spill] sm:$0xff] %v5952_v42  ;;  %v1699_v24 = vsel %vm482_vm6, %v1690_v18, %v1692_v59  ;;  %v3139_v18 = vadd.f32 %v5787_v22, %v2981_v55  ;;  %v2507_v22 = vmul.f32 %v7106_v12, %v5969_v17  ;;  %v2509_v55 = vmul.f32 %v5552_v21, %v7106_v12 }
 0x482   :  { %v1707_v9 = vadd.f32 %v1699_v24, %v1566_v0  ;;  %2858 = vrot.lane.b32.xlu0 %v7103_v46, %s3658_s28  ;;  %3228 = vrot.lane.b32.xlu1 %v3137_v7, %s3658_s28  ;;  %v5967_v62 = vsel %vm254_vm2, %v1713_v53, %v1714_v5  ;;  %v7108_v0 = vld [vmem:[#allocation34_spill] sm:$0xff]  ;;  %v7110_v24 = vrot.slane %v7109_v41, 2 }
 0x483   :  { %v2837_v7 = vrot.slane %v2507_v22, 2  ;;  %v2840_v59 = vrot.slane %v2509_v55, 2  ;;  %v7112_v46 = vld [vmem:[#allocation78_spill] sm:$0xff] }
 0x484   :  { %v1716_v37 = vrot.slane %v1707_v9, 1  ;;  %v5974_v51 = vpop.permute.xlu0 %2146  ;;  %v1696_v49 = vpop.permute.xlu1 %1695  ;;  %v2851_v56 = vsel %vm541_vm3, %v7110_v24, %v2850_v26  ;;  %v7111_v9 = vld [vmem:[#allocation15_spill] sm:$0xff] }
 0x485   :  { %7105 = vst [vmem:[#allocation50_spill] sm:$0xff] %v5974_v51  ;;  %v1700_v27 = vsel %vm482_vm6, %v1694_v61, %v1696_v49  ;;  %v3141_v61 = vadd.f32 %v5808_v11, %v2987_v58  ;;  %v6017_v49 = vld [vmem:[#allocation2 + $0x1a8] sm:$0x1]  ;;  %v7115_v26 = vld [vmem:[#allocation31_spill] sm:$0xff] }
 0x486   :  { %v5979_v30 = vadd.f32 %v1700_v27, %v1567_v34  ;;  %2862 = vrot.lane.b32.xlu0 %v7107_v19, %s3658_s28  ;;  %3232 = vrot.lane.b32.xlu1 %v3139_v18, %s3658_s28  ;;  %v5987_v3 = vsel %vm254_vm2, %v1714_v5, %v1716_v37  ;;  %v2084_v34 = vsel %vm339_vm5, %v7112_v46, %v7111_v9  ;;  %v7113_v27 = vld [vmem:[#allocation17_spill] sm:$0xff]  ;;  %v7117_v9 = vld [vmem:[#allocation23_spill] sm:$0xff] }
 0x487   :  { %v2841_v18 = vsel %vm541_vm3, %v2837_v7, %v2840_v59  ;;  %v2085_v19 = vsel %vm339_vm5, %v7114_v10, %v7113_v27  ;;  %v2092_v55 = vadd.f32 %v2084_v34, %v1918_v28  ;;  %v2515_v48 = vmul.f32 %v7106_v12, %v6017_v49  ;;  %v7118_v46 = vld [vmem:[#allocation81_spill] sm:$0xff] }
 0x488   :  { %v1718_v52 = vrot.slane %v5979_v30, 1  ;;  %v5993_v45 = vpop.permute.xlu0 %2150  ;;  %v5995_v40 = vpop.permute.xlu1 %2136  ;;  %v1920_v34 = vmul.f32 %v5797_v39, %v1917_v16 }
 0x489   :  { %v2852_v12 = vrot.slane %v2515_v48, 2  ;;  %v7123_v48 = vld [vmem:[#allocation35_spill] sm:$0xff] }
 0x48a   :  { %2866 = vrot.lane.b32.xlu0 %v7108_v0, %s3658_s28  ;;  %3236 = vrot.lane.b32.xlu1 %v3141_v61, %s3658_s28  ;;  %v6003_v5 = vsel %vm254_vm2, %v1716_v37, %v1718_v52  ;;  %v1919_v61 = vmul.f32 %v5781_v50, %v1917_v16  ;;  %v7116_v0 = vrot.slane %v7115_v26, 2  ;;  %v7121_v26 = vld [vmem:[#allocation82_spill] sm:$0xff] }
 0x48c   :  { %v2212_v11 = vpop.permute.xlu0 %2211  ;;  %v6005_v15 = vpop.permute.xlu1 %2152 }
 0x48e   :  { %2870 = vrot.lane.b32.xlu0 %v2851_v56, %s3658_s28  ;;  %2856 = vrot.lane.b32.xlu1 %v2837_v7, %s3658_s28  ;;  %v2093_v7 = vadd.f32 %v2085_v19, %v1919_v61  ;;  %v7120_v61 = vld [vmem:[#allocation27_spill] sm:$0xff] }
 0x490   :  { %v2216_v58 = vpop.permute.xlu0 %2215  ;;  %v2210_v37 = vpop.permute.xlu1 %2209 }
 0x491   :  { %v2225_v22 = vsel %vm482_vm6, %v2210_v37, %v2212_v11  ;;  %v2086_v11 = vsel %vm339_vm5, %v7118_v46, %v7117_v9  ;;  %v7119_v37 = vld [vmem:[#allocation49_spill] sm:$0xff] }
 0x492   :  { %3383 = vrot.lane.b32.xlu0 %v7116_v0, %s3658_s28  ;;  %2860 = vrot.lane.b32.xlu1 %v2841_v18, %s3658_s28  ;;  %v6030_v41 = vadd.f32 %v2225_v22, %v2092_v55  ;;  %v2094_v18 = vadd.f32 %v2086_v11, %v1920_v34  ;;  %v1921_v55 = vmul.f32 %v5958_v4, %v1917_v16 }
 0x493   :  { %v2853_v16 = vsel %vm541_vm3, %v2840_v59, %v2852_v12 }
 0x494   :  { %v2220_v24 = vpop.permute.xlu0 %2219  ;;  %v2214_v56 = vpop.permute.xlu1 %2213  ;;  %v2241_v27 = vrot.slane %v6030_v41, 1 }
 0x495   :  { %v2226_v50 = vsel %vm482_vm6, %v2214_v56, %v2216_v58  ;;  %v2087_v58 = vsel %vm339_vm5, %v7121_v26, %v7120_v61 }
 0x496   :  { %v2234_v28 = vadd.f32 %v2226_v50, %v2093_v7  ;;  %3387 = vrot.lane.b32.xlu0 %v7119_v37, %s3658_s28  ;;  %2864 = vrot.lane.b32.xlu1 %v2840_v59, %s3658_s28  ;;  %v7122_v7 = vld [vmem:[#allocation36_spill] sm:$0xff] }
 0x497   :  { %v3043_v56 = vmul.f32 %v5722_v13, %v7122_v7  ;;  %v3036_v46 = vmul.f32 %v7122_v7, %v5969_v17  ;;  %v2095_v13 = vadd.f32 %v2087_v58, %v1921_v55 }
 0x498   :  { %v2242_v10 = vrot.slane %v2234_v28, 1  ;;  %v2224_v19 = vpop.permute.xlu0 %2223  ;;  %v2218_v22 = vpop.permute.xlu1 %2217 }
 0x499   :  { %v2227_v0 = vsel %vm482_vm6, %v2218_v22, %v2220_v24  ;;  %v3038_v24 = vmul.f32 %v5552_v21, %v7122_v7  ;;  %v3379_v37 = vrot.slane %v3043_v56, 2 }
 0x49a   :  { %v2235_v9 = vadd.f32 %v2227_v0, %v2094_v18  ;;  %3391 = vrot.lane.b32.xlu0 %v7123_v48, %s3658_s28  ;;  %2868 = vrot.lane.b32.xlu1 %v2840_v59, %s3658_s28  ;;  %v6056_v4 = vsel %vm254_vm2, %v2241_v27, %v2242_v10  ;;  %v7124_v18 = vld [vmem:[#allocation38_spill] sm:$0xff]  ;;  %v3366_v59 = vrot.slane %v3036_v46, 2  ;;  %v2470_v46 = vstv %s3539_s18 }
 0x49b   :  { %v3369_v22 = vrot.slane %v3038_v24, 2  ;;  %v7129_v24 = vld [vmem:[#allocation85_spill] sm:$0xff]  ;;  %v2472_v25 = vmul.f32 %v5830_v33, %v2470_v46 }
 0x49c   :  { %v2244_v11 = vrot.slane %v2235_v9, 1  ;;  %v6061_v50 = vpop.permute.xlu0 %2695  ;;  %v2222_v34 = vpop.permute.xlu1 %2221 }
 0x49d   :  { %v2228_v28 = vsel %vm482_vm6, %v2222_v34, %v2224_v19  ;;  %v7125_v19 = vld [vmem:[#allocation37_spill] sm:$0xff]  ;;  %v3370_v56 = vsel %vm541_vm3, %v3366_v59, %v3369_v22  ;;  %v2471_v34 = vmul.f32 %v5817_v14, %v2470_v46 }
 0x49e   :  { %v6064_v17 = vadd.f32 %v2228_v28, %v2095_v13  ;;  %3395 = vrot.lane.b32.xlu0 %v7124_v18, %s3658_s28  ;;  %2872 = vrot.lane.b32.xlu1 %v2853_v16, %s3658_s28  ;;  %v6070_v12 = vsel %vm254_vm2, %v2242_v10, %v2244_v11  ;;  %v7126_v58 = vrot.slane %v7125_v19, 2  ;;  %v7128_v16 = vld [vmem:[#allocation62_spill] sm:$0xff] }
 0x49f   :  { %v2637_v13 = vsel %vm339_vm5, %v7129_v24, %v7128_v16  ;;  %v7130_v18 = vld [vmem:[#allocation66_spill] sm:$0xff]  ;;  %v7132_v24 = vld [vmem:[#allocation68_spill] sm:$0xff] }
 0x4a0   :  { %v6832_v55 = vrot.slane %v6064_v17, 1  ;;  %v6073_v61 = vpop.permute.xlu0 %2699  ;;  %v6075_v26 = vpop.permute.xlu1 %2689  ;;  %v3380_v0 = vsel %vm541_vm3, %v7126_v58, %v3379_v37 }
 0x4a2   :  { %3399 = vrot.lane.b32.xlu0 %v3380_v0, %s3658_s28  ;;  %3385 = vrot.lane.b32.xlu1 %v3366_v59, %s3658_s28  ;;  %v6085_v10 = vsel %vm254_vm2, %v2244_v11, %v6832_v55  ;;  %v3044_v11 = vmul.f32 %v7122_v7, %v6017_v49  ;;  %v7131_v59 = vld [vmem:[#allocation89_spill] sm:$0xff]  ;;  %v2645_v0 = vadd.f32 %v2637_v13, %v2471_v34  ;;  %v7133_v55 = vld [vmem:[#allocation91_spill] sm:$0xff] }
 0x4a3   :  { %v2638_v19 = vsel %vm339_vm5, %v7131_v59, %v7130_v18  ;;  %v2639_v18 = vsel %vm339_vm5, %v7133_v55, %v7132_v24  ;;  %v2473_v34 = vmul.f32 %v5845_v36, %v2470_v46  ;;  %v6122_v24 = vld [vmem:[#allocation2 + $0x188] sm:$0xff] }
 0x4a4   :  { %v6088_v9 = vpop.permute.xlu0 %2703  ;;  %v6090_v48 = vpop.permute.xlu1 %2705  ;;  %v2646_v49 = vadd.f32 %v2638_v19, %v2472_v25 }
 0x4a5   :  { %7127 = vst [vmem:[#allocation51_spill] sm:$0xff] %v6088_v9 }
 0x4a6   :  { %3389 = vrot.lane.b32.xlu1 %v3370_v56, %s3658_s28  ;;  %1720 = vrot.lane.b32.xlu0 %v1713_v53, %s3656_s0  ;;  %v3381_v53 = vrot.slane %v3044_v11, 2 }
 0x4a8   :  { %v2765_v28 = vpop.permute.xlu0 %2764  ;;  %v2763_v37 = vpop.permute.xlu1 %2762  ;;  %v3382_v30 = vsel %vm541_vm3, %v3369_v22, %v3381_v53 }
 0x4a9   :  { %v2778_v58 = vsel %vm482_vm6, %v2763_v37, %v2765_v28 }
 0x4aa   :  { %3393 = vrot.lane.b32.xlu1 %v3369_v22, %s3658_s28  ;;  %1728 = vrot.lane.b32.xlu0 %v1718_v52, %s3656_s0  ;;  %v2786_v7 = vadd.f32 %v2778_v58, %v2645_v0  ;;  %v2647_v52 = vadd.f32 %v2639_v18, %v2473_v34  ;;  %v7134_v58 = vld [vmem:[#allocation70_spill] sm:$0xff]  ;;  %v7135_v0 = vld [vmem:[#allocation93_spill] sm:$0xff] }
 0x4ab   :  { %v2640_v25 = vsel %vm339_vm5, %v7135_v0, %v7134_v58 }
 0x4ac   :  { %v2769_v56 = vpop.permute.xlu0 %2768  ;;  %v2767_v16 = vpop.permute.xlu1 %2766  ;;  %v2794_v11 = vrot.slane %v2786_v7, 1 }
 0x4ad   :  { %v2779_v13 = vsel %vm482_vm6, %v2767_v16, %v2769_v56  ;;  %v2474_v56 = vmul.f32 %v6122_v24, %v2470_v46  ;;  %v7136_v46 = vld [vmem:[#allocation56_spill] sm:$0xff] }
 0x4ae   :  { %v2787_v28 = vadd.f32 %v2779_v13, %v2646_v49  ;;  %3397 = vrot.lane.b32.xlu1 %v3369_v22, %s3658_s28  ;;  %v2999_v13 = vstv %s3554_s19 }
 0x4af   :  { %v2648_v53 = vadd.f32 %v2640_v25, %v2474_v56  ;;  %v3003_v1 = vmul.f32 %v6122_v24, %v2999_v13 }
 0x4b0   :  { %v2795_v37 = vrot.slane %v2787_v28, 1  ;;  %v2773_v59 = vpop.permute.xlu0 %2772  ;;  %v2771_v19 = vpop.permute.xlu1 %2770 }
 0x4b1   :  { %v2780_v55 = vsel %vm482_vm6, %v2771_v19, %v2773_v59  ;;  %v3000_v19 = vmul.f32 %v5817_v14, %v2999_v13 }
 0x4b2   :  { %v2788_v49 = vadd.f32 %v2780_v55, %v2647_v52  ;;  %3401 = vrot.lane.b32.xlu1 %v3382_v30, %s3658_s28  ;;  %v2796_v22 = vsel %vm254_vm2, %v2794_v11, %v2795_v37  ;;  %v7137_v52 = vld [vmem:[#allocation92_spill] sm:$0xff]  ;;  %s3550_s28 = sld [smem:[#allocation3 + $0x2f]] }
 0x4b3   :  { %v3166_v30 = vsel %vm339_vm5, %v7137_v52, %v7136_v46  ;;  %v7145_v46 = vld [vmem:[#allocation96_spill] sm:$0xff] }
 0x4b4   :  { %v2797_v7 = vrot.slane %v2788_v49, 1  ;;  %v2777_v16 = vpop.permute.xlu0 %2776  ;;  %v2775_v18 = vpop.permute.xlu1 %2774  ;;  %v3174_v56 = vadd.f32 %v3166_v30, %v3000_v19  ;;  %v7138_v49 = vrot.slane %v6064_v17, 1 }
 0x4b5   :  { %v2781_v34 = vsel %vm482_vm6, %v2775_v18, %v2777_v16 }
 0x4b6   :  { %v2789_v28 = vadd.f32 %v2781_v34, %v2648_v53  ;;  %2248 = vrot.lane.b32.xlu1 %v2241_v27, %s3656_s0  ;;  %v2798_v59 = vsel %vm254_vm2, %v2795_v37, %v2797_v7 }
 0x4b8   :  { %v2799_v58 = vrot.slane %v2789_v28, 1  ;;  %v3294_v0 = vpop.permute.xlu0 %3293  ;;  %v3292_v25 = vpop.permute.xlu1 %3291  ;;  %v7144_v28 = vld [vmem:[#allocation57_spill] sm:$0xff] }
 0x4b9   :  { %v3307_v55 = vsel %vm482_vm6, %v3292_v25, %v3294_v0 }
 0x4ba   :  { %2256 = vrot.lane.b32.xlu1 %v7138_v49, %s3656_s0  ;;  %2809 = vrot.lane.b32.xlu0 %v2799_v58, %s3656_s0  ;;  %v6142_v41 = vsel %vm254_vm2, %v2797_v7, %v2799_v58  ;;  %v3315_v27 = vadd.f32 %v3307_v55, %v3174_v56 }
 0x4bc   :  { %v6144_v37 = vpop.permute.xlu0 %1612  ;;  %v3296_v53 = vpop.permute.xlu1 %3295  ;;  %v3323_v16 = vrot.slane %v3315_v27, 1  ;;  %v2958_v27 = vstv %s3550_s28 }
 0x4bd   :  { %7139 = vst [vmem:[#allocation8_spill] sm:$0xff] %v6144_v37 }
 0x4be   :  { %2801 = vrot.lane.b32.xlu1 %v2794_v11, %s3656_s0  ;;  %1724 = vrot.lane.b32.xlu0 %v5987_v3, %s3656_s0  ;;  %v3167_v11 = vsel %vm339_vm5, %v7145_v46, %v7144_v28  ;;  %v3001_v3 = vmul.f32 %v5830_v33, %v2999_v13  ;;  %v2962_v28 = vmul.f32 %v5817_v14, %v2958_v27 }
 0x4c0   :  { %v6149_v18 = vpop.permute.xlu0 %1616  ;;  %v6151_v34 = vpop.permute.xlu1 %2140  ;;  %v3175_v52 = vadd.f32 %v3167_v11, %v3001_v3  ;;  %v7148_v11 = vld [vmem:[#allocation98_spill] sm:$0xff] }
 0x4c1   :  { %7140 = vst [vmem:[#allocation53_spill] sm:$0xff] %v6149_v18  ;;  %7141 = vst [vmem:[#allocation12_spill] sm:$0xff] %v6151_v34 }
 0x4c2   :  { %2250 = vrot.lane.b32.xlu0 %v6056_v4, %s3656_s0  ;;  %3330 = vrot.lane.b32.xlu1 %v3323_v16, %s3656_s0 }
 0x4c4   :  { %v6156_v17 = vpop.permute.xlu0 %1620  ;;  %v6158_v7 = vpop.permute.xlu1 %2144 }
 0x4c5   :  { %7142 = vst [vmem:[#allocation55_spill] sm:$0xff] %v6156_v17  ;;  %7143 = vst [vmem:[#allocation7_spill] sm:$0xff] %v6158_v7 }
 0x4c6   :  { %2254 = vrot.lane.b32.xlu0 %v6085_v10, %s3656_s0 }
 0x4c8   :  { %v3298_v30 = vpop.permute.xlu0 %3297  ;;  %v6166_v19 = vpop.permute.xlu1 %2148 }
 0x4c9   :  { %v3308_v4 = vsel %vm482_vm6, %v3296_v53, %v3298_v30 }
 0x4ca   :  { %v3316_v58 = vadd.f32 %v3308_v4, %v3175_v52  ;;  %2803 = vrot.lane.b32.xlu0 %v2796_v22, %s3656_s0  ;;  %v7147_v22 = vld [vmem:[#allocation59_spill] sm:$0xff] }
 0x4cb   :  { %v3168_v3 = vsel %vm339_vm5, %v7148_v11, %v7147_v22  ;;  %v6193_v22 = vld [vmem:[#allocation2 + $0x120] sm:$0x80] }
 0x4cc   :  { %v3324_v0 = vrot.slane %v3316_v58, 1  ;;  %v3302_v25 = vpop.permute.xlu0 %3301  ;;  %v6170_v55 = vpop.permute.xlu1 %2693  ;;  %v2959_v34 = vmul.f32 %v2958_v27, %v6193_v22 }
 0x4ce   :  { %2805 = vrot.lane.b32.xlu0 %v2798_v59, %s3656_s0  ;;  %v3325_v56 = vsel %vm254_vm2, %v3323_v16, %v3324_v0  ;;  %v3002_v59 = vmul.f32 %v5845_v36, %v2999_v13  ;;  %v2966_v16 = vmul.f32 %v5845_v36, %v2958_v27 }
 0x4d0   :  { %v3306_v49 = vpop.permute.xlu0 %3305  ;;  %v6174_v10 = vpop.permute.xlu1 %2697  ;;  %v3176_v30 = vadd.f32 %v3168_v3, %v3002_v59 }
 0x4d2   :  { %3332 = vrot.lane.b32.xlu0 %v3325_v56, %s3656_s0  ;;  %v3169_v56 = vsel %vm339_vm5, %v7150_v32, %v7149_v43 }
 0x4d3   :  { %v3177_v11 = vadd.f32 %v3169_v56, %v3003_v1  ;;  %v2960_v56 = vmul.f32 %v5683_v20, %v2958_v27 }
 0x4d4   :  { %v3053_v53 = vpop.permute.xlu0 %3052  ;;  %v6178_v46 = vpop.permute.xlu1 %2701 }
 0x4d5   :  { %7146 = vst [vmem:[#allocation94_spill] sm:$0xff] %v6178_v46  ;;  %v3068_v52 = vadd.f32 %v3053_v53, %v2962_v28  ;;  %v2961_v28 = vmul.f32 %v5552_v21, %v2958_v27 }
 0x4d8   :  { %v3057_v4 = vpop.permute.xlu0 %3056  ;;  %v3300_v58 = vpop.permute.xlu1 %3299 }
 0x4d9   :  { %v6188_v9 = vadd.f32 %v3057_v4, %v2966_v16  ;;  %v3309_v46 = vsel %vm482_vm6, %v3300_v58, %v3302_v25  ;;  %v3067_v16 = vadd.f32 %v3053_v53, %v2961_v28 }
 0x4da   :  { %v3317_v7 = vadd.f32 %v3309_v46, %v3176_v30  ;;  %v6206_v30 = vld [vmem:[#allocation2 + $0x180] sm:$0x7f] }
 0x4dc   :  { %v3326_v36 = vrot.slane %v3317_v7, 1  ;;  %v3219_v3 = vpop.permute.xlu0 %3218  ;;  %v3304_v59 = vpop.permute.xlu1 %3303  ;;  %v2964_v7 = vmul.f32 %v5830_v33, %v2958_v27 }
 0x4dd   :  { %v3310_v51 = vsel %vm482_vm6, %v3304_v59, %v3306_v49 }
 0x4de   :  { %v3318_v32 = vadd.f32 %v3310_v51, %v3177_v11  ;;  %v3327_v43 = vsel %vm254_vm2, %v3324_v0, %v3326_v36  ;;  %v2967_v11 = vmul.f32 %v2958_v27, %v6206_v30 }
 0x4e0   :  { %v3328_v25 = vrot.slane %v3318_v32, 1  ;;  %v3223_v58 = vpop.permute.xlu0 %3222  ;;  %v3051_v24 = vpop.permute.xlu1 %3050 }
 0x4e1   :  { %v6198_v13 = vadd.f32 %v3223_v58, %v3067_v16  ;;  %v3065_v21 = vadd.f32 %v3051_v24, %v2959_v34  ;;  %v3071_v34 = vadd.f32 %v3057_v4, %v2961_v28 }
 0x4e2   :  { %3338 = vrot.lane.b32.xlu1 %v3328_v25, %s3656_s0  ;;  %v3329_v1 = vsel %vm254_vm2, %v3326_v36, %v3328_v25  ;;  %v6212_v36 = vld [vmem:[#allocation2 + $0x188] sm:$0x7f] }
 0x4e3   :  { %3336 = vrot.lane.b32.xlu0 %v3329_v1, %s3656_s0  ;;  %v6204_v49 = vadd.f32 %v3219_v3, %v3065_v21  ;;  %v2968_v33 = vmul.f32 %v6212_v36, %v2958_v27  ;;  %v3066_v1 = vadd.f32 %v3051_v24, %v2960_v56 }
 0x4e4   :  { %v3227_v51 = vpop.permute.xlu0 %3226  ;;  %v3055_v46 = vpop.permute.xlu1 %3054 }
 0x4e5   :  { %v3069_v0 = vadd.f32 %v3055_v46, %v2961_v28  ;;  %v3070_v53 = vadd.f32 %v3055_v46, %v2964_v7 }
 0x4e6   :  { %1722 = vrot.lane.b32.xlu1 %v5967_v62, %s3656_s0 }
 0x4e7   :  { %v6215_v59 = vadd.f32 %v3227_v51, %v3069_v0 }
 0x4e8   :  { %v3231_v32 = vpop.permute.xlu0 %3230  ;;  %v3059_v16 = vpop.permute.xlu1 %3058 }
 0x4e9   :  { %7151 = vst [vmem:[#allocation64_spill] sm:$0xff] %v6215_v59  ;;  %v6217_v25 = vadd.f32 %v3231_v32, %v3071_v34  ;;  %v3074_v21 = vadd.f32 %v3059_v16, %v2968_v33  ;;  %v3073_v20 = vadd.f32 %v3059_v16, %v2967_v11 }
 0x4ea   :  { %1726 = vrot.lane.b32.xlu1 %v6003_v5, %s3656_s0 }
 0x4eb   :  { %7152 = vst [vmem:[#allocation13_spill] sm:$0xff] %v6217_v25  ;;  %v7163_v25 = vld [vmem:[#allocation72_spill] sm:$0xff] }
 0x4ec   :  { %v3235_v62 = vpop.permute.xlu0 %3234  ;;  %v3221_v4 = vpop.permute.xlu1 %3220 }
 0x4ed   :  { %v6221_v28 = vadd.f32 %v3235_v62, %v3073_v20  ;;  %v3238_v7 = vsel %vm412_vm7, %v3219_v3, %v3221_v4 }
 0x4ee   :  { %v6224_v46 = vadd.f32 %v3238_v7, %v3066_v1  ;;  %2252 = vrot.lane.b32.xlu1 %v6070_v12, %s3656_s0 }
 0x4ef   :  { %7153 = vst [vmem:[#allocation95_spill] sm:$0xff] %v6221_v28 }
 0x4f0   :  { %v6228_v27 = vpop.permute.xlu0 %2854  ;;  %v3225_v0 = vpop.permute.xlu1 %3224 }
 0x4f1   :  { %v3239_v24 = vsel %vm412_vm7, %v3223_v58, %v3225_v0 }
 0x4f2   :  { %v6231_v56 = vadd.f32 %v3239_v24, %v3068_v52  ;;  %2807 = vrot.lane.b32.xlu1 %v6142_v41, %s3656_s0 }
 0x4f4   :  { %v6235_v5 = vpop.permute.xlu0 %2858  ;;  %v3229_v34 = vpop.permute.xlu1 %3228 }
 0x4f5   :  { %v3240_v3 = vsel %vm412_vm7, %v3227_v51, %v3229_v34 }
 0x4f6   :  { %v6238_v11 = vadd.f32 %v3240_v3, %v3070_v53  ;;  %3334 = vrot.lane.b32.xlu1 %v3327_v43, %s3656_s0  ;;  %s3510_s0 = sld [smem:[#allocation3 + $0x14]] }
 0x4f8   :  { %7154 = vst [vmem:[#allocation6_spill] sm:$0xff] %v6238_v11  ;;  %v6241_v12 = vpop.permute.xlu0 %2862  ;;  %v3233_v33 = vpop.permute.xlu1 %3232 }
 0x4f9   :  { %v3241_v16 = vsel %vm412_vm7, %v3231_v32, %v3233_v33  ;;  %v3631_v33 = vld [vmem:[#allocation2 + $0x98] sm:$0x80] }
 0x4fa   :  { %v6245_v52 = vadd.f32 %v3241_v16, %v6188_v9 }
 0x4fc   :  { %7155 = vst [vmem:[#allocation90_spill] sm:$0xff] %v6245_v52  ;;  %v6247_v58 = vpop.permute.xlu0 %2866  ;;  %v3237_v41 = vpop.permute.xlu1 %3236 }
 0x4fd   :  { %7156 = vst [vmem:[#allocation88_spill] sm:$0xff] %v6247_v58  ;;  %v3242_v1 = vsel %vm412_vm7, %v3235_v62, %v3237_v41  ;;  %v1323_v62 = vld [vmem:[#allocation2 + $0x90] sm:$0x80]  ;;  %v1331_v41 = vld [vmem:[#allocation2 + $0xf0] sm:$0x7f]  ;;  %v7162_v58 = vld [vmem:[#allocation47_spill] sm:$0xff] }
 0x4fe   :  { %v6250_v20 = vadd.f32 %v3242_v1, %v3074_v21  ;;  %v6268_v21 = vstv %s3510_s0 }
 0x4ff   :  { %7160 = vst [vmem:[#allocation67_spill] sm:$0xff] %v6268_v21  ;;  %v1349_v3 = vmul.f32 %v6268_v21, %v1323_v62  ;;  %v1350_v16 = vmul.f32 %v3631_v33, %v6268_v21  ;;  %v1357_v1 = vmul.f32 %v6268_v21, %v1331_v41 }
 0x500   :  { %7157 = vst [vmem:[#allocation104_spill] sm:$0xff] %v6250_v20  ;;  %v6252_v51 = vpop.permute.xlu0 %2870  ;;  %v6254_v53 = vpop.permute.xlu1 %2856 }
 0x501   :  { %v1456_v42 = vadd.f32 %v7162_v58, %v1350_v16  ;;  %v1463_v20 = vadd.f32 %v7163_v25, %v1357_v1  ;;  %v7164_v16 = vld [vmem:[#allocation18_spill] sm:$0xff] }
 0x504   :  { %v6256_v43 = vpop.permute.xlu0 %3383  ;;  %v6258_v4 = vpop.permute.xlu1 %2860 }
 0x508   :  { %v6260_v32 = vpop.permute.xlu0 %3387  ;;  %v6262_v9 = vpop.permute.xlu1 %2864 }
 0x50c   :  { %v6264_v7 = vpop.permute.xlu0 %3391  ;;  %v6266_v0 = vpop.permute.xlu1 %2868 }
 0x50d   :  { %7158 = vst [vmem:[#allocation63_spill] sm:$0xff] %v6264_v7  ;;  %7159 = vst [vmem:[#allocation65_spill] sm:$0xff] %v6266_v0  ;;  %v1628_v7 = vsel %vm412_vm7, %v5880_v8, %v5858_v47  ;;  %v1455_v0 = vadd.f32 %v7162_v58, %v1349_v3  ;;  %v1632_v47 = vsel %vm412_vm7, %v5891_v44, %v5878_v23 }
 0x50e   :  { %v1644_v52 = vadd.f32 %v1628_v7, %v1456_v42  ;;  %v6300_v42 = vstv %s3519_s20  ;;  %v1651_v7 = vadd.f32 %v5891_v44, %v1463_v20 }
 0x50f   :  { %v1643_v38 = vadd.f32 %v5880_v8, %v1455_v0  ;;  %v1793_v8 = vsel %vm412_vm7, %v7165_v57, %v7164_v16  ;;  %v7166_v16 = vld [vmem:[#allocation9_spill] sm:$0xff] }
 0x510   :  { %v6270_v24 = vpop.permute.xlu0 %3395  ;;  %v6272_v34 = vpop.permute.xlu1 %2872  ;;  %v1797_v44 = vsel %vm412_vm7, %v5588_v63, %v7166_v16 }
 0x511   :  { %7161 = vst [vmem:[#allocation69_spill] sm:$0xff] %v6270_v24  ;;  %v3632_v24 = vld [vmem:[#allocation2 + $0xf8] sm:$0x7f] }
 0x512   :  { %v1358_v17 = vmul.f32 %v3632_v24, %v6268_v21 }
 0x514   :  { %v6280_v11 = vpop.permute.xlu0 %3399  ;;  %v6282_v59 = vpop.permute.xlu1 %3385  ;;  %v1464_v31 = vadd.f32 %v7163_v25, %v1358_v17 }
 0x516   :  { %v1652_v1 = vadd.f32 %v1632_v47, %v1464_v31 }
 0x518   :  { %v1721_v28 = vpop.permute.xlu0 %1720  ;;  %v3390_v18 = vpop.permute.xlu1 %3389 }
 0x519   :  { %v1735_v3 = vadd.f32 %v1721_v28, %v1643_v38  ;;  %v1736_v37 = vadd.f32 %v1721_v28, %v1644_v52  ;;  %v6295_v58 = vsel %vm412_vm7, %v6260_v32, %v3390_v18  ;;  %v6308_v52 = vstv %s3520_s21 }
 0x51a   :  { %v1877_v20 = vmul.f32 %v6308_v52, %v1323_v62  ;;  %v1878_v47 = vmul.f32 %v3631_v33, %v6308_v52 }
 0x51b   :  { %v1808_v23 = vadd.f32 %v7165_v57, %v1735_v3  ;;  %v1809_v0 = vadd.f32 %v1793_v8, %v1736_v37 }
 0x51c   :  { %v1729_v21 = vpop.permute.xlu0 %1728  ;;  %v6304_v17 = vpop.permute.xlu1 %3393 }
 0x51d   :  { %v1820_v38 = vadd.f32 %v6300_v42, %v1808_v23  ;;  %v1821_v18 = vadd.f32 %v6300_v42, %v1809_v0  ;;  %v1743_v25 = vadd.f32 %v1729_v21, %v1651_v7  ;;  %v1744_v28 = vadd.f32 %v1729_v21, %v1652_v1  ;;  %v7167_v7 = vld [vmem:[#allocation14_spill] sm:$0xff] }
 0x51e   :  { %v1983_v23 = vadd.f32 %v7167_v7, %v1877_v20  ;;  %v1984_v62 = vadd.f32 %v7167_v7, %v1878_v47  ;;  %v6329_v0 = vstv %s3535_s22  ;;  %v1885_v1 = vmul.f32 %v6308_v52, %v1331_v41 }
 0x51f   :  { %v1816_v57 = vadd.f32 %v5588_v63, %v1743_v25  ;;  %v1817_v37 = vadd.f32 %v1797_v44, %v1744_v28  ;;  %1840 = vrot.lane.b32.xlu1 %v1820_v38, %s3659_s4  ;;  %1842 = vrot.lane.b32.xlu0 %v1821_v18, %s3659_s4  ;;  %v2156_v63 = vsel %vm412_vm7, %v5995_v40, %v5821_v60  ;;  %v3633_v44 = vld [vmem:[#allocation2 + $0x128] sm:$0x80] }
 0x520   :  { %v6316_v31 = vpop.permute.xlu1 %3397  ;;  %v2171_v38 = vadd.f32 %v5995_v40, %v1983_v23  ;;  %v2172_v18 = vadd.f32 %v2156_v63, %v1984_v62  ;;  %v2430_v25 = vmul.f32 %v6329_v0, %v6193_v22  ;;  %v1886_v60 = vmul.f32 %v3632_v24, %v6308_v52  ;;  %v7168_v40 = vld [vmem:[#allocation79_spill] sm:$0xff]  ;;  %v7169_v22 = vld [vmem:[#allocation21_spill] sm:$0xff] }
 0x521   :  { %v1828_v21 = vadd.f32 %v6300_v42, %v1816_v57  ;;  %v1829_v3 = vadd.f32 %v6300_v42, %v1817_v37  ;;  %v2438_v28 = vmul.f32 %v6329_v0, %v6206_v30  ;;  %v2431_v57 = vmul.f32 %v3633_v44, %v6329_v0  ;;  %v7171_v23 = vld [vmem:[#allocation87_spill] sm:$0xff] }
 0x522   :  { %v2160_v37 = vsel %vm412_vm7, %v6005_v15, %v5837_v6  ;;  %v1991_v47 = vadd.f32 %v7168_v40, %v1885_v1  ;;  %v6351_v63 = vstv %s3529_s24  ;;  %v2439_v30 = vmul.f32 %v6212_v36, %v6329_v0 }
 0x523   :  { %1856 = vrot.lane.b32.xlu1 %v1828_v21, %s3659_s4  ;;  %1858 = vrot.lane.b32.xlu0 %v1829_v3, %s3659_s4  ;;  %v1992_v21 = vadd.f32 %v7168_v40, %v1886_v60  ;;  %v7170_v3 = vld [vmem:[#allocation101_spill] sm:$0xff]  ;;  %v2544_v6 = vadd.f32 %v7171_v23, %v2438_v28  ;;  %v2713_v1 = vsel %vm412_vm7, %v6090_v48, %v5867_v2 }
 0x524   :  { %v3402_v8 = vpop.permute.xlu1 %3401  ;;  %v2321_v24 = vsel %vm412_vm7, %v7170_v3, %v7169_v22  ;;  %v2179_v62 = vadd.f32 %v6005_v15, %v1991_v47  ;;  %v2709_v36 = vsel %vm412_vm7, %v6075_v26, %v5855_v35  ;;  %v7172_v15 = vld [vmem:[#allocation60_spill] sm:$0xff] }
 0x525   :  { %v6333_v33 = vsel %vm412_vm7, %v6280_v11, %v3402_v8  ;;  %v2536_v28 = vadd.f32 %v7172_v15, %v2430_v25 }
 0x527   :  { %v2724_v35 = vadd.f32 %v6075_v26, %v2536_v28  ;;  %v2874_v26 = vsel %vm412_vm7, %v6228_v27, %v6254_v53 }
 0x528   :  { %v2249_v16 = vpop.permute.xlu1 %2248 }
 0x529   :  { %v2263_v41 = vadd.f32 %v2249_v16, %v2171_v38  ;;  %v2264_v20 = vadd.f32 %v2249_v16, %v2172_v18  ;;  %v2180_v18 = vadd.f32 %v2160_v37, %v1992_v21  ;;  %v2545_v16 = vadd.f32 %v7171_v23, %v2439_v30  ;;  %v7173_v37 = vld [vmem:[#allocation46_spill] sm:$0xff] }
 0x52a   :  { %v2325_v47 = vsel %vm412_vm7, %v5656_v29, %v7173_v37  ;;  %v2732_v21 = vadd.f32 %v6090_v48, %v2544_v6  ;;  %v7175_v37 = vld [vmem:[#allocation83_spill] sm:$0xff] }
 0x52b   :  { %v2336_v8 = vadd.f32 %v7170_v3, %v2263_v41  ;;  %v2337_v7 = vadd.f32 %v2321_v24, %v2264_v20  ;;  %v2537_v20 = vadd.f32 %v7172_v15, %v2431_v57  ;;  %v2733_v22 = vadd.f32 %v2713_v1, %v2545_v16  ;;  %v7174_v16 = vld [vmem:[#allocation76_spill] sm:$0xff] }
 0x52c   :  { %v2810_v38 = vpop.permute.xlu0 %2809  ;;  %v2257_v60 = vpop.permute.xlu1 %2256  ;;  %v1884_v1 = vmul.f32 %v5797_v39, %v6308_v52 }
 0x52d   :  { %v2348_v44 = vadd.f32 %v6351_v63, %v2336_v8  ;;  %v2349_v41 = vadd.f32 %v6351_v63, %v2337_v7  ;;  %v2271_v2 = vadd.f32 %v2257_v60, %v2179_v62  ;;  %v2272_v40 = vadd.f32 %v2257_v60, %v2180_v18 }
 0x52e   :  { %v2725_v57 = vadd.f32 %v2709_v36, %v2537_v20  ;;  %v2824_v8 = vadd.f32 %v2810_v38, %v2732_v21  ;;  %v2825_v7 = vadd.f32 %v2810_v38, %v2733_v22  ;;  %v2878_v38 = vsel %vm412_vm7, %v6252_v51, %v6272_v34 }
 0x52f   :  { %2370 = vrot.lane.b32.xlu1 %v2349_v41, %s3659_s4  ;;  %2368 = vrot.lane.b32.xlu0 %v2348_v44, %s3659_s4  ;;  %v2344_v3 = vadd.f32 %v5656_v29, %v2271_v2  ;;  %v2345_v25 = vadd.f32 %v2325_v47, %v2272_v40  ;;  %v2159_v29 = vsel %vm412_vm7, %v6166_v19, %v5993_v45  ;;  %v6403_v44 = vstv %s6367_s25 }
 0x530   :  { %v6379_v24 = vpop.permute.xlu0 %1724  ;;  %v2802_v30 = vpop.permute.xlu1 %2801  ;;  %v1990_v36 = vadd.f32 %v7174_v16, %v1884_v1  ;;  %v2897_v53 = vadd.f32 %v6252_v51, %v2824_v8  ;;  %v2898_v41 = vadd.f32 %v2878_v38, %v2825_v7  ;;  %v2433_v20 = vmul.f32 %v5817_v14, %v6329_v0 }
 0x531   :  { %v2356_v23 = vadd.f32 %v6351_v63, %v2344_v3  ;;  %v2357_v48 = vadd.f32 %v6351_v63, %v2345_v25  ;;  %v2816_v6 = vadd.f32 %v2802_v30, %v2724_v35  ;;  %v2817_v62 = vadd.f32 %v2802_v30, %v2725_v57  ;;  %v3634_v25 = vld [vmem:[#allocation2 + $0x158] sm:$0xff] }
 0x532   :  { %v2178_v2 = vadd.f32 %v2159_v29, %v1990_v36  ;;  %v2710_v40 = vsel %vm412_vm7, %v6170_v55, %v6061_v50  ;;  %v2539_v47 = vadd.f32 %v7175_v37, %v2433_v20  ;;  %v3403_v14 = vsel %vm412_vm7, %v6256_v43, %v6282_v59 }
 0x533   :  { %v2889_v18 = vadd.f32 %v6228_v27, %v2816_v6  ;;  %v2890_v60 = vadd.f32 %v2874_v26, %v2817_v62  ;;  %2386 = vrot.lane.b32.xlu1 %v2357_v48, %s3659_s4  ;;  %2384 = vrot.lane.b32.xlu0 %v2356_v23, %s3659_s4  ;;  %v2909_v50 = vadd.f32 %v6403_v44, %v2897_v53  ;;  %v6432_v30 = vstv %s6391_s26  ;;  %v7177_v48 = vld [vmem:[#allocation86_spill] sm:$0xff] }
 0x534   :  { %v6399_v39 = vpop.permute.xlu0 %2250  ;;  %v3331_v45 = vpop.permute.xlu1 %3330  ;;  %v2910_v22 = vadd.f32 %v6403_v44, %v2898_v41  ;;  %v2435_v57 = vmul.f32 %v3634_v25, %v6329_v0  ;;  %v2727_v7 = vadd.f32 %v2710_v40, %v2539_v47  ;;  %v2711_v59 = vsel %vm412_vm7, %v6174_v10, %v6073_v61  ;;  %v3636_v47 = vld [vmem:[#allocation2 + $0xb0] sm:$0xff] }
 0x535   :  { %v2901_v15 = vadd.f32 %v6403_v44, %v2889_v18  ;;  %v2902_v34 = vadd.f32 %v6403_v44, %v2890_v60  ;;  %v3345_v27 = vadd.f32 %v3331_v45, %v6204_v49  ;;  %v3346_v28 = vadd.f32 %v3331_v45, %v6224_v46  ;;  %v7176_v49 = vld [vmem:[#allocation25_spill] sm:$0xff] }
 0x536   :  { %v2324_v46 = vsel %vm412_vm7, %v5643_v54, %v7176_v49  ;;  %v2875_v1 = vsel %vm412_vm7, %v6235_v5, %v6258_v4  ;;  %v2876_v45 = vsel %vm412_vm7, %v6241_v12, %v6262_v9  ;;  %v6474_v9 = vld [vmem:[#allocation2 + $0x8] sm:$0xff]  ;;  %v3638_v49 = vld [vmem:[#allocation2 + $0xe0] sm:$0xff] }
 0x537   :  { %2923 = vrot.lane.b32.xlu1 %v2902_v34, %s3659_s4  ;;  %2921 = vrot.lane.b32.xlu0 %v2901_v15, %s3659_s4  ;;  %v3418_v35 = vadd.f32 %v6256_v43, %v3345_v27  ;;  %v3419_v3 = vadd.f32 %v3403_v14, %v3346_v28  ;;  %v2541_v43 = vadd.f32 %v7177_v48, %v2435_v57  ;;  %v7180_v57 = vld [vmem:[#allocation58_spill] sm:$0xff] }
 0x538   :  { %v6417_v51 = vpop.permute.xlu0 %2254  ;;  %v1880_v14 = vmul.f32 %v3636_v47, %v6308_v52 }
 0x539   :  { %v2270_v21 = vadd.f32 %v6417_v51, %v2178_v2  ;;  %v3430_v29 = vadd.f32 %v6432_v30, %v3418_v35  ;;  %v3431_v61 = vadd.f32 %v6432_v30, %v3419_v3  ;;  %v2729_v38 = vadd.f32 %v2711_v59, %v2541_v43  ;;  %v7178_v2 = vld [vmem:[#allocation67_spill] sm:$0xff]  ;;  %v3639_v3 = vld [vmem:[#allocation2 + $0x170] sm:$0xff]  ;;  %v7182_v59 = vld [vmem:[#allocation45_spill] sm:$0xff] }
 0x53a   :  { %v1351_v40 = vmul.f32 %v6474_v9, %v7178_v2  ;;  %v2437_v25 = vmul.f32 %v3639_v3, %v6329_v0  ;;  %v7191_v3 = vld [vmem:[#allocation13_spill] sm:$0xff] }
 0x53b   :  { %v2343_v8 = vadd.f32 %v2324_v46, %v2270_v21  ;;  %2939 = vrot.lane.b32.xlu1 %v2910_v22, %s3659_s4  ;;  %2937 = vrot.lane.b32.xlu0 %v2909_v50, %s3659_s4  ;;  %v1356_v46 = vmul.f32 %v3638_v49, %v7178_v2  ;;  %v7179_v50 = vld [vmem:[#allocation41_spill] sm:$0xff] }
 0x53c   :  { %v6439_v23 = vpop.permute.xlu0 %2803  ;;  %v1457_v22 = vadd.f32 %v7179_v50, %v1351_v40  ;;  %v1459_v43 = vadd.f32 %v7182_v59, %v1351_v40 }
 0x53d   :  { %v6443_v6 = vadd.f32 %v6351_v63, %v2343_v8  ;;  %v2819_v62 = vadd.f32 %v6439_v23, %v2727_v7  ;;  %v7181_v8 = vld [vmem:[#allocation8_spill] sm:$0xff] }
 0x53e   :  { %v1629_v7 = vsel %vm412_vm7, %v7181_v8, %v7180_v57 }
 0x53f   :  { %v6451_v26 = vadd.f32 %v2875_v1, %v2819_v62  ;;  %3452 = vrot.lane.b32.xlu1 %v3431_v61, %s3659_s4  ;;  %3450 = vrot.lane.b32.xlu0 %v3430_v29, %s3659_s4  ;;  %v7183_v1 = vld [vmem:[#allocation44_spill] sm:$0xff]  ;;  %v7184_v61 = vld [vmem:[#allocation43_spill] sm:$0xff] }
 0x540   :  { %v6455_v18 = vpop.permute.xlu0 %2805  ;;  %v1461_v29 = vadd.f32 %v7183_v1, %v1351_v40 }
 0x541   :  { %v2821_v60 = vadd.f32 %v6455_v18, %v2729_v38  ;;  %v7185_v38 = vld [vmem:[#allocation53_spill] sm:$0xff] }
 0x543   :  { %v2894_v4 = vadd.f32 %v2876_v45, %v2821_v60  ;;  %v1462_v60 = vadd.f32 %v7183_v1, %v1356_v46  ;;  %v7186_v45 = vld [vmem:[#allocation75_spill] sm:$0xff]  ;;  %v1647_v46 = vadd.f32 %v7185_v38, %v1459_v43  ;;  %v7193_v1 = vld [vmem:[#allocation52_spill] sm:$0xff] }
 0x544   :  { %v3333_v36 = vpop.permute.xlu0 %3332 }
 0x545   :  { %v6462_v53 = vadd.f32 %v6403_v44, %v2894_v4  ;;  %v3347_v41 = vadd.f32 %v3333_v36, %v6198_v13  ;;  %v3348_v15 = vadd.f32 %v3333_v36, %v6231_v56  ;;  %v1352_v13 = vmul.f32 %v3636_v47, %v7178_v2  ;;  %v7189_v47 = vld [vmem:[#allocation95_spill] sm:$0xff] }
 0x546   :  { %v6481_v56 = vmul.f32 %v6474_v9, %v6308_v52  ;;  %v1986_v36 = vadd.f32 %v7186_v45, %v1880_v14 }
 0x547   :  { %v3420_v34 = vadd.f32 %v6260_v32, %v3347_v41  ;;  %v3421_v27 = vadd.f32 %v6295_v58, %v3348_v15  ;;  %v3637_v32 = vld [vmem:[#allocation2 + $0xc8] sm:$0xff]  ;;  %v1458_v35 = vadd.f32 %v7179_v50, %v1352_v13  ;;  %v7187_v41 = vld [vmem:[#allocation24_spill] sm:$0xff]  ;;  %v7188_v15 = vld [vmem:[#allocation103_spill] sm:$0xff] }
 0x548   :  { %v1354_v58 = vmul.f32 %v3637_v32, %v7178_v2  ;;  %v1882_v21 = vmul.f32 %v3637_v32, %v6308_v52  ;;  %v1630_v52 = vsel %vm412_vm7, %v7185_v38, %v7184_v61  ;;  %v1985_v4 = vadd.f32 %v7186_v45, %v6481_v56  ;;  %v7190_v13 = vld [vmem:[#allocation104_spill] sm:$0xff]  ;;  %v7194_v61 = vld [vmem:[#allocation55_spill] sm:$0xff] }
 0x549   :  { %v6469_v28 = vadd.f32 %v6432_v30, %v3420_v34  ;;  %v6472_v20 = vadd.f32 %v6432_v30, %v3421_v27  ;;  %v1794_v34 = vsel %vm412_vm7, %v7188_v15, %v7187_v41  ;;  %v1645_v2 = vadd.f32 %v7181_v8, %v1457_v22  ;;  %v7195_v41 = vld [vmem:[#allocation69_spill] sm:$0xff] }
 0x54a   :  { %v1460_v62 = vadd.f32 %v7182_v59, %v1354_v58  ;;  %v1646_v49 = vadd.f32 %v1629_v7, %v1458_v35  ;;  %v7192_v59 = vld [vmem:[#allocation90_spill] sm:$0xff]  ;;  %v1631_v45 = vsel %vm412_vm7, %v7194_v61, %v7193_v1  ;;  %v3406_v22 = vsel %vm412_vm7, %v7195_v41, %v6316_v31 }
 0x54b   :  { %v1739_v35 = vadd.f32 %v6379_v24, %v1647_v46  ;;  %v7201_v1 = vld [vmem:[#allocation50_spill] sm:$0xff] }
 0x54c   :  { %v1648_v50 = vadd.f32 %v1630_v52, %v1460_v62 }
 0x54e   :  { %v1740_v7 = vadd.f32 %v6379_v24, %v1648_v50 }
 0x554   :  { %v3339_v27 = vpop.permute.xlu1 %3338 }
 0x555   :  { %v3353_v40 = vadd.f32 %v3339_v27, %v7189_v47  ;;  %v3354_v32 = vadd.f32 %v3339_v27, %v7190_v13  ;;  %v3337_v58 = vpop.permute.xlu0 %3336 }
 0x556   :  { %v3351_v57 = vadd.f32 %v3337_v58, %v7191_v3  ;;  %v3352_v14 = vadd.f32 %v3337_v58, %v7192_v59  ;;  %v7196_v58 = vld [vmem:[#allocation26_spill] sm:$0xff]  ;;  %v1649_v3 = vadd.f32 %v7194_v61, %v1461_v29  ;;  %v7200_v59 = vld [vmem:[#allocation77_spill] sm:$0xff] }
 0x557   :  { %v3426_v8 = vadd.f32 %v6280_v11, %v3353_v40  ;;  %v3427_v27 = vadd.f32 %v6333_v33, %v3354_v32  ;;  %v7197_v11 = vld [vmem:[#allocation48_spill] sm:$0xff]  ;;  %v7198_v40 = vld [vmem:[#allocation54_spill] sm:$0xff] }
 0x558   :  { %v3424_v43 = vadd.f32 %v7195_v41, %v3351_v57  ;;  %v3425_v62 = vadd.f32 %v3406_v22, %v3352_v14  ;;  %v1723_v38 = vpop.permute.xlu1 %1722  ;;  %v1795_v33 = vsel %vm412_vm7, %v7197_v11, %v7196_v58  ;;  %v7199_v32 = vld [vmem:[#allocation12_spill] sm:$0xff]  ;;  %v1988_v14 = vadd.f32 %v7200_v59, %v1882_v21  ;;  %v7202_v41 = vld [vmem:[#allocation7_spill] sm:$0xff] }
 0x559   :  { %v6524_v52 = vadd.f32 %v6432_v30, %v3426_v8  ;;  %v6527_v47 = vadd.f32 %v6432_v30, %v3427_v27  ;;  %v1737_v13 = vadd.f32 %v1723_v38, %v1645_v2  ;;  %v1738_v31 = vadd.f32 %v1723_v38, %v1646_v49 }
 0x55a   :  { %v2157_v24 = vsel %vm412_vm7, %v7199_v32, %v7198_v40  ;;  %v6536_v46 = vadd.f32 %v6432_v30, %v3424_v43  ;;  %v6539_v50 = vadd.f32 %v6432_v30, %v3425_v62  ;;  %v1650_v49 = vadd.f32 %v1631_v45, %v1462_v60  ;;  %v7204_v45 = vld [vmem:[#allocation28_spill] sm:$0xff] }
 0x55b   :  { %v1810_v57 = vadd.f32 %v7188_v15, %v1737_v13  ;;  %v1811_v2 = vadd.f32 %v1794_v34, %v1738_v31  ;;  %v2158_v22 = vsel %vm412_vm7, %v7202_v41, %v7201_v1  ;;  %v1812_v8 = vadd.f32 %v7197_v11, %v1739_v35  ;;  %v7203_v34 = vld [vmem:[#allocation84_spill] sm:$0xff]  ;;  %v7205_v13 = vld [vmem:[#allocation105_spill] sm:$0xff]  ;;  %v7206_v31 = vld [vmem:[#allocation51_spill] sm:$0xff] }
 0x55c   :  { %v1813_v27 = vadd.f32 %v1795_v33, %v1740_v7  ;;  %v1727_v43 = vpop.permute.xlu1 %1726  ;;  %v1987_v15 = vadd.f32 %v7200_v59, %v6481_v56  ;;  %v2173_v60 = vadd.f32 %v7199_v32, %v1985_v4  ;;  %v2174_v21 = vadd.f32 %v2157_v24, %v1986_v36  ;;  %v7207_v11 = vld [vmem:[#allocation94_spill] sm:$0xff] }
 0x55d   :  { %v1822_v38 = vadd.f32 %v6300_v42, %v1810_v57  ;;  %v1823_v62 = vadd.f32 %v6300_v42, %v1811_v2  ;;  %v1741_v58 = vadd.f32 %v1727_v43, %v1649_v3  ;;  %v1742_v29 = vadd.f32 %v1727_v43, %v1650_v49  ;;  %v7208_v49 = vld [vmem:[#allocation20_spill] sm:$0xff]  ;;  %v7209_v59 = vld [vmem:[#allocation106_spill] sm:$0xff] }
 0x55e   :  { %v2543_v61 = vadd.f32 %v7203_v34, %v2437_v25  ;;  %v1796_v35 = vsel %vm412_vm7, %v7205_v13, %v7204_v45  ;;  %v2176_v7 = vadd.f32 %v2158_v22, %v1988_v14  ;;  %v2712_v33 = vsel %vm412_vm7, %v7207_v11, %v7206_v31  ;;  %v7210_v1 = vld [vmem:[#allocation22_spill] sm:$0xff]  ;;  %v7211_v22 = vld [vmem:[#allocation107_spill] sm:$0xff]  ;;  %v7212_v45 = vld [vmem:[#allocation65_spill] sm:$0xff] }
 0x55f   :  { %1846 = vrot.lane.b32.xlu0 %v1823_v62, %s3659_s4  ;;  %1844 = vrot.lane.b32.xlu1 %v1822_v38, %s3659_s4  ;;  %v2265_v40 = vadd.f32 %v6399_v39, %v2173_v60  ;;  %v2266_v4 = vadd.f32 %v6399_v39, %v2174_v21  ;;  %v1814_v36 = vadd.f32 %v7205_v13, %v1741_v58  ;;  %v7213_v13 = vld [vmem:[#allocation88_spill] sm:$0xff] }
 0x560   :  { %v2253_v25 = vpop.permute.xlu1 %2252  ;;  %v1824_v32 = vadd.f32 %v6300_v42, %v1812_v8  ;;  %v1825_v24 = vadd.f32 %v6300_v42, %v1813_v27  ;;  %v1815_v3 = vadd.f32 %v1796_v35, %v1742_v29  ;;  %v2432_v2 = vmul.f32 %v6474_v9, %v6329_v0 }
 0x561   :  { %v2268_v57 = vadd.f32 %v2253_v25, %v2176_v7  ;;  %v2322_v14 = vsel %vm412_vm7, %v7209_v59, %v7208_v49  ;;  %v2323_v39 = vsel %vm412_vm7, %v7211_v22, %v7210_v1  ;;  %v2175_v43 = vadd.f32 %v7202_v41, %v1987_v15 }
 0x562   :  { %v2731_v8 = vadd.f32 %v2712_v33, %v2543_v61  ;;  %v1989_v27 = vadd.f32 %v7174_v16, %v6481_v56  ;;  %v2338_v0 = vadd.f32 %v7209_v59, %v2265_v40  ;;  %v2339_v9 = vadd.f32 %v2322_v14, %v2266_v4  ;;  %v7214_v40 = vld [vmem:[#allocation64_spill] sm:$0xff] }
 0x563   :  { %v2341_v38 = vadd.f32 %v2323_v39, %v2268_v57  ;;  %1850 = vrot.lane.b32.xlu0 %v1825_v24, %s3659_s4  ;;  %1848 = vrot.lane.b32.xlu1 %v1824_v32, %s3659_s4  ;;  %v1826_v62 = vadd.f32 %v6300_v42, %v1814_v36  ;;  %v1827_v29 = vadd.f32 %v6300_v42, %v1815_v3  ;;  %v7215_v36 = vld [vmem:[#allocation6_spill] sm:$0xff]  ;;  %v7216_v32 = vld [vmem:[#allocation63_spill] sm:$0xff] }
 0x564   :  { %v2808_v58 = vpop.permute.xlu1 %2807  ;;  %v2267_v60 = vadd.f32 %v2253_v25, %v2175_v43  ;;  %v2177_v21 = vadd.f32 %v6166_v19, %v1989_v27  ;;  %v2877_v61 = vsel %vm412_vm7, %v7213_v13, %v7212_v45  ;;  %v2538_v16 = vadd.f32 %v7175_v37, %v2432_v2 }
 0x565   :  { %v2353_v41 = vadd.f32 %v6351_v63, %v2341_v38  ;;  %v2823_v15 = vadd.f32 %v2808_v58, %v2731_v8  ;;  %v2350_v56 = vadd.f32 %v6351_v63, %v2338_v0  ;;  %v2351_v42 = vadd.f32 %v6351_v63, %v2339_v9 }
 0x566   :  { %v2269_v7 = vadd.f32 %v6417_v51, %v2177_v21  ;;  %v2340_v19 = vadd.f32 %v7211_v22, %v2267_v60  ;;  %v3405_v24 = vsel %vm412_vm7, %v7216_v32, %v6304_v17  ;;  %v2726_v37 = vadd.f32 %v6170_v55, %v2538_v16 }
 0x567   :  { %v2896_v35 = vadd.f32 %v2877_v61, %v2823_v15  ;;  %1854 = vrot.lane.b32.xlu0 %v1827_v29, %s3659_s4  ;;  %1852 = vrot.lane.b32.xlu1 %v1826_v62, %s3659_s4  ;;  %v2540_v51 = vadd.f32 %v7177_v48, %v2432_v2  ;;  %v2542_v22 = vadd.f32 %v7203_v34, %v2432_v2 }
 0x568   :  { %v3335_v31 = vpop.permute.xlu1 %3334  ;;  %v2342_v49 = vadd.f32 %v5643_v54, %v2269_v7  ;;  %v2818_v59 = vadd.f32 %v6439_v23, %v2726_v37  ;;  %v2352_v14 = vadd.f32 %v6351_v63, %v2340_v19 }
 0x569   :  { %v2908_v33 = vadd.f32 %v6403_v44, %v2896_v35  ;;  %v3349_v4 = vadd.f32 %v3335_v31, %v7214_v40  ;;  %v3350_v25 = vadd.f32 %v3335_v31, %v7215_v36  ;;  %v2728_v55 = vadd.f32 %v6174_v10, %v2540_v51 }
 0x56a   :  { %v2354_v48 = vadd.f32 %v6351_v63, %v2342_v49  ;;  %v2891_v54 = vadd.f32 %v6235_v5, %v2818_v59  ;;  %v2730_v39 = vadd.f32 %v7207_v11, %v2542_v22 }
 0x56b   :  { %v3422_v3 = vadd.f32 %v7216_v32, %v3349_v4  ;;  %v3423_v57 = vadd.f32 %v3405_v24, %v3350_v25  ;;  %2372 = vrot.lane.b32.xlu0 %v2350_v56, %s3659_s4  ;;  %2374 = vrot.lane.b32.xlu1 %v2351_v42, %s3659_s4  ;;  %v2820_v23 = vadd.f32 %v6455_v18, %v2728_v55 }
 0x56c   :  { %v2903_v10 = vadd.f32 %v6403_v44, %v2891_v54  ;;  %v2822_v2 = vadd.f32 %v2808_v58, %v2730_v39 }
 0x56d   :  { %v3434_v1 = vadd.f32 %v6432_v30, %v3422_v3  ;;  %v3435_v17 = vadd.f32 %v6432_v30, %v3423_v57  ;;  %v2904_v30 = vadd.f32 %v6403_v44, %v6451_v26  ;;  %v2893_v34 = vadd.f32 %v6241_v12, %v2820_v23 }
 0x56e   :  { %v2895_v63 = vadd.f32 %v7213_v13, %v2822_v2 }
 0x56f   :  { %2378 = vrot.lane.b32.xlu1 %v2353_v41, %s3659_s4  ;;  %2376 = vrot.lane.b32.xlu0 %v2352_v14, %s3659_s4  ;;  %v2905_v5 = vadd.f32 %v6403_v44, %v2893_v34 }
 0x573   :  { %2382 = vrot.lane.b32.xlu1 %v6443_v6, %s3659_s4  ;;  %2380 = vrot.lane.b32.xlu0 %v2354_v48, %s3659_s4  ;;  %v2907_v6 = vadd.f32 %v6403_v44, %v2895_v63 }
 0x577   :  { %2927 = vrot.lane.b32.xlu1 %v2904_v30, %s3659_s4  ;;  %2925 = vrot.lane.b32.xlu0 %v2903_v10, %s3659_s4 }
 0x57b   :  { %2931 = vrot.lane.b32.xlu1 %v6462_v53, %s3659_s4  ;;  %2929 = vrot.lane.b32.xlu0 %v2905_v5, %s3659_s4 }
 0x57f   :  { %2935 = vrot.lane.b32.xlu1 %v2908_v33, %s3659_s4  ;;  %2933 = vrot.lane.b32.xlu0 %v2907_v6, %s3659_s4 }
 0x583   :  { %3456 = vrot.lane.b32.xlu1 %v6472_v20, %s3659_s4  ;;  %3454 = vrot.lane.b32.xlu0 %v6469_v28, %s3659_s4 }
 0x587   :  { %3460 = vrot.lane.b32.xlu1 %v3435_v17, %s3659_s4  ;;  %3458 = vrot.lane.b32.xlu0 %v3434_v1, %s3659_s4 }
 0x58b   :  { %3464 = vrot.lane.b32.xlu1 %v6539_v50, %s3659_s4  ;;  %3462 = vrot.lane.b32.xlu0 %v6536_v46, %s3659_s4 }
 0x58f   :  { %3468 = vrot.lane.b32.xlu1 %v6527_v47, %s3659_s4  ;;  %3466 = vrot.lane.b32.xlu0 %v6524_v52, %s3659_s4 }
 0x591   :  { %v1843_v12 = vpop.permute.xlu0 %1842  ;;  %v1841_v44 = vpop.permute.xlu1 %1840 }
 0x592   :  { %v1860_v26 = vsel %vm482_vm6, %v1841_v44, %v1843_v12 }
 0x593   :  { %1870 = vst [vmem:[%s6732_s2 - $0x7] sm:$0x80] %v1860_v26 }
 0x595   :  { %v1859_v18 = vpop.permute.xlu0 %1858  ;;  %v1857_v53 = vpop.permute.xlu1 %1856 }
 0x596   :  { %v1864_v28 = vsel %vm482_vm6, %v1857_v53, %v1859_v18 }
 0x597   :  { %1874 = vst [vmem:[%s6732_s2 + $0x19] sm:$0x7f] %v1864_v28 }
 0x5a1   :  { %v2369_v20 = vpop.permute.xlu0 %2368  ;;  %v2371_v47 = vpop.permute.xlu1 %2370 }
 0x5a2   :  { %v2388_v52 = vsel %vm482_vm6, %v2369_v20, %v2371_v47 }
 0x5a3   :  { %3530 = vst [vmem:[%s6732_s2 + $0x19] sm:$0x80] %v2388_v52 }
 0x5a5   :  { %v2385_v46 = vpop.permute.xlu0 %2384  ;;  %v2387_v50 = vpop.permute.xlu1 %2386 }
 0x5a6   :  { %v2392_v11 = vsel %vm482_vm6, %v2385_v46, %v2387_v50 }
 0x5a7   :  { %3534 = vst [vmem:[%s6732_s2 + $0x39] sm:$0x7f] %v2392_v11 }
 0x5a9   :  { %v2922_v43 = vpop.permute.xlu0 %2921  ;;  %v2924_v38 = vpop.permute.xlu1 %2923 }
 0x5aa   :  { %v2941_v8 = vsel %vm482_vm6, %v2922_v43, %v2924_v38 }
 0x5ab   :  { %3545 = vst [vmem:[%s6732_s2 + $0x39] sm:$0x80] %v2941_v8 }
 0x5ad   :  { %v2938_v27 = vpop.permute.xlu0 %2937  ;;  %v2940_v0 = vpop.permute.xlu1 %2939 }
 0x5ae   :  { %v2945_v9 = vsel %vm482_vm6, %v2938_v27, %v2940_v0 }
 0x5af   :  { %3549 = vst [vmem:[%s6732_s2 + $0x59] sm:$0x7f] %v2945_v9 }
 0x5b1   :  { %v3451_v62 = vpop.permute.xlu0 %3450  ;;  %v3453_v58 = vpop.permute.xlu1 %3452 }
 0x5b2   :  { %v3470_v29 = vsel %vm482_vm6, %v3451_v62, %v3453_v58 }
 0x5b3   :  { %3560 = vst [vmem:[%s6732_s2 + $0x59] sm:$0x80] %v3470_v29 }
 0x5d1   :  { %v1847_v60 = vpop.permute.xlu0 %1846  ;;  %v1845_v41 = vpop.permute.xlu1 %1844 }
 0x5d2   :  { %v1861_v15 = vsel %vm482_vm6, %v1845_v41, %v1847_v60 }
 0x5d3   :  { %1871 = vst [vmem:[%s6732_s2 + $0x1] sm:$0xff] %v1861_v15 }
 0x5d5   :  { %v1851_v21 = vpop.permute.xlu0 %1850  ;;  %v1849_v45 = vpop.permute.xlu1 %1848 }
 0x5d6   :  { %v1862_v13 = vsel %vm482_vm6, %v1849_v45, %v1851_v21 }
 0x5d7   :  { %1872 = vst [vmem:[%s6732_s2 + $0x9] sm:$0xff] %v1862_v13 }
 0x5d9   :  { %v1855_v61 = vpop.permute.xlu0 %1854  ;;  %v1853_v35 = vpop.permute.xlu1 %1852 }
 0x5da   :  { %v1863_v16 = vsel %vm482_vm6, %v1853_v35, %v1855_v61 }
 0x5db   :  { %1873 = vst [vmem:[%s6732_s2 + $0x11] sm:$0xff] %v1863_v16 }
 0x5dd   :  { %v2373_v56 = vpop.permute.xlu0 %2372  ;;  %v2375_v42 = vpop.permute.xlu1 %2374 }
 0x5de   :  { %v2389_v7 = vsel %vm482_vm6, %v2373_v56, %v2375_v42 }
 0x5df   :  { %3531 = vst [vmem:[%s6732_s2 + $0x21] sm:$0xff] %v2389_v7 }
 0x5e1   :  { %v2377_v31 = vpop.permute.xlu0 %2376  ;;  %v2379_v19 = vpop.permute.xlu1 %2378 }
 0x5e2   :  { %v2390_v33 = vsel %vm482_vm6, %v2377_v31, %v2379_v19 }
 0x5e3   :  { %3532 = vst [vmem:[%s6732_s2 + $0x29] sm:$0xff] %v2390_v33 }
 0x5e5   :  { %v2381_v40 = vpop.permute.xlu0 %2380  ;;  %v2383_v4 = vpop.permute.xlu1 %2382 }
 0x5e6   :  { %v2391_v36 = vsel %vm482_vm6, %v2381_v40, %v2383_v4 }
 0x5e7   :  { %3533 = vst [vmem:[%s6732_s2 + $0x31] sm:$0xff] %v2391_v36 }
 0x5e9   :  { %v2926_v25 = vpop.permute.xlu0 %2925  ;;  %v2928_v32 = vpop.permute.xlu1 %2927 }
 0x5ea   :  { %v2942_v24 = vsel %vm482_vm6, %v2926_v25, %v2928_v32 }
 0x5eb   :  { %3546 = vst [vmem:[%s6732_s2 + $0x41] sm:$0xff] %v2942_v24 }
 0x5ed   :  { %v2930_v37 = vpop.permute.xlu0 %2929  ;;  %v2932_v3 = vpop.permute.xlu1 %2931 }
 0x5ee   :  { %v2943_v57 = vsel %vm482_vm6, %v2930_v37, %v2932_v3 }
 0x5ef   :  { %3547 = vst [vmem:[%s6732_s2 + $0x49] sm:$0xff] %v2943_v57 }
 0x5f1   :  { %v2934_v51 = vpop.permute.xlu0 %2933  ;;  %v2936_v49 = vpop.permute.xlu1 %2935 }
 0x5f2   :  { %v2944_v59 = vsel %vm482_vm6, %v2934_v51, %v2936_v49 }
 0x5f3   :  { %3548 = vst [vmem:[%s6732_s2 + $0x51] sm:$0xff] %v2944_v59 }
 0x5f5   :  { %v3455_v14 = vpop.permute.xlu0 %3454  ;;  %v3457_v1 = vpop.permute.xlu1 %3456 }
 0x5f6   :  { %v3471_v17 = vsel %vm482_vm6, %v3455_v14, %v3457_v1 }
 0x5f7   :  { %3561 = vst [vmem:[%s6732_s2 + $0x61] sm:$0xff] %v3471_v17 }
 0x5f9   :  { %v3459_v55 = vpop.permute.xlu0 %3458  ;;  %v3461_v22 = vpop.permute.xlu1 %3460 }
 0x5fa   :  { %v3472_v48 = vsel %vm482_vm6, %v3459_v55, %v3461_v22 }
 0x5fb   :  { %3562 = vst [vmem:[%s6732_s2 + $0x69] sm:$0xff] %v3472_v48 }
 0x5fd   :  { %v3463_v54 = vpop.permute.xlu0 %3462  ;;  %v3465_v23 = vpop.permute.xlu1 %3464 }
 0x5fe   :  { %v3473_v39 = vsel %vm482_vm6, %v3463_v54, %v3465_v23 }
 0x5ff   :  { %3563 = vst [vmem:[%s6732_s2 + $0x71] sm:$0xff] %v3473_v39 }
 0x601   :  { %v3467_v10 = vpop.permute.xlu0 %3466  ;;  %v3469_v30 = vpop.permute.xlu1 %3468 }
 0x602   :  { %v3474_v34 = vsel %vm482_vm6, %v3467_v10, %v3469_v30 }
 0x603   :  { %3564 = vst [vmem:[%s6732_s2 + $0x79] sm:$0x7f] %v3474_v34 }
 0x604   :  { %3490 = vsyncpa [#allocation4], 1 }

</bundles_post_ra>
